<compile_context>
chip_gen: v7x
topology: tpu7x:2x2x1
jax: 0.10.0
libtpu: 0.0.40
codegen_flags: <defaults>
</compile_context>

<pallas_src>
import numpy as np

import jax
import jax.numpy as jnp
from jax import lax
from jax.experimental import pallas as pl
from jax.experimental.pallas import tpu as pltpu


# ---------------------------------------------------------------------------
# The fused whole-net kernel (one grid step == B images)
# ---------------------------------------------------------------------------
def _net_kernel(x_ref, m1_ref, b1_ref, m2_ref, b2_ref, wfc_ref, bfc_ref, out_ref):
    f32 = jnp.float32
    bf16 = jnp.bfloat16
    B = out_ref.shape[0]          # images per grid step
    RE = 14 * B                   # rows in each (even/odd) half of the layer-1 output

    # ---- layer1: Conv2d(1,16,k5,p2)+BN+ReLU as ONE (2*RE,160)x(160,512) bf16 matmul.
    # LHS rows are pre-permuted in the prologue: [even conv rows | odd conv rows], each half
    # ordered (row-in-image major, image minor).  Output lane = (col%2)*256 + (col//2)*16 + ch.
    acc1 = jnp.dot(x_ref[0], m1_ref[...], preferred_element_type=f32)     # (2*RE, 512)
    acc1 = jnp.maximum(acc1 + b1_ref[...], 0.0)                           # BN bias + ReLU

    # ---- MaxPool 2x2 (pure VPU): horizontal = lane-split at 256, vertical = row-split at RE.
    hp1 = jnp.maximum(acc1[:, :256], acc1[:, 256:])                       # (2*RE, 256)
    vp1 = jnp.maximum(hp1[:RE, :], hp1[RE:, :]).astype(bf16)              # (RE, 256), row = q*B+b

    # ---- layer2 LHS: shared zero vertical halo + five 8-aligned row-shifted slices,
    # lane-concatenated into K = 5*256 = 1280 (unused lanes hit zero rows of M2).
    halo = jnp.zeros((2 * B, 256), bf16)
    vpad = jnp.concatenate([halo, vp1, halo], axis=0)                     # (18*B, 256)
    lhs2 = jnp.concatenate([vpad[dy * B: dy * B + RE, :] for dy in range(5)],
                           axis=1)                                        # (RE, 1280)

    # ---- layer2: Conv2d(16,32,k5,p2)+BN+ReLU as ONE (RE,1280)x(1280,512) bf16 matmul.
    acc2 = jnp.dot(lhs2, m2_ref[...], preferred_element_type=f32)         # (RE, 512), row = r*B+b
    acc2 = jnp.maximum(acc2 + b2_ref[...], 0.0)
    hp2 = jnp.maximum(acc2[:, :256], acc2[:, 256:])                       # (RE, 256)

    # ---- MaxPool 2x2 vertical + fc LHS: rows (2s)*B.. and (2s+1)*B.. are 8-aligned blocks,
    # so the vertical max is a plain VPU maximum; pooled rows concatenate along lanes.
    pooled = [jnp.maximum(hp2[(2 * s) * B:(2 * s + 1) * B, :],
                          hp2[(2 * s + 1) * B:(2 * s + 2) * B, :]) for s in range(7)]
    fc_lhs = jnp.concatenate(pooled, axis=1).astype(bf16)                 # (B, 1792)

    # ---- fc: Linear(7*7*32 -> 10) as ONE (B,1792)x(1792,128) matmul (cols 0..9 used).
    logits = jnp.dot(fc_lhs, wfc_ref[...], preferred_element_type=f32)    # (B, 128)
    out_ref[...] = logits + bfc_ref[...]


# ---------------------------------------------------------------------------
# Wrapper: one pallas_call for the whole network
# ---------------------------------------------------------------------------
def cnn_forward(x_nchw, kp, block_b=8):
    B = block_b
    n = x_nchw.shape[0]
    g = -(-n // B)
    npad = g * B
    bf16 = jnp.bfloat16

    x = x_nchw[:, 0, :, :]
    if npad != n:
        x = jnp.pad(x, ((0, npad - n), (0, 0), (0, 0)))
    xpad = jnp.pad(x, ((0, 0), (2, 2), (2, 2))).astype(bf16)              # (npad, 32, 32) bf16

    # XLA prologue: im2row over dy (K = 5*32 = 160) + even/odd output-row permutation,
    # ordered (row-in-image major, image minor) within each B-image block.
    xcat = jnp.concatenate([xpad[:, dy:dy + 28, :] for dy in range(5)], axis=-1)  # (npad,28,160)
    xe = xcat[:, 0::2, :].reshape(g, B, 14, 160).transpose(0, 2, 1, 3).reshape(g, 14 * B, 160)
    xo = xcat[:, 1::2, :].reshape(g, B, 14, 160).transpose(0, 2, 1, 3).reshape(g, 14 * B, 160)
    lhs1 = jnp.concatenate([xe, xo], axis=1)                              # (g, 28*B, 160) bf16

    out = pl.pallas_call(
        _net_kernel,
        out_shape=jax.ShapeDtypeStruct((npad, 128), jnp.float32),
        grid_spec=pltpu.PrefetchScalarGridSpec(
            num_scalar_prefetch=0,
            grid=(g,),
            in_specs=[
                pl.BlockSpec((1, 28 * B, 160), lambda i: (i, 0, 0)),   # per-step layer-1 LHS (bf16)
                pl.BlockSpec((160, 512), lambda i: (0, 0)),            # layer-1 banded weights (bf16)
                pl.BlockSpec((1, 512), lambda i: (0, 0)),              # layer-1 folded bias (f32)
                pl.BlockSpec((1280, 512), lambda i: (0, 0)),           # layer-2 banded weights (bf16)
                pl.BlockSpec((1, 512), lambda i: (0, 0)),              # layer-2 folded bias (f32)
                pl.BlockSpec((1792, 128), lambda i: (0, 0)),           # fc weights (bf16, padded)
                pl.BlockSpec((1, 128), lambda i: (0, 0)),              # fc bias (f32, padded)
            ],
            out_specs=pl.BlockSpec((B, 128), lambda i: (i, 0)),
        ),
        compiler_params=pltpu.CompilerParams(
            dimension_semantics=("parallel",),                         # batch-tile axis -> 2 TCs on v7x
        ),
    )(lhs1, kp["m1"], kp["b1"], kp["m2"], kp["b2"], kp["wfc"], kp["bfc"])

    return out[:n, :10]


# ---------------------------------------------------------------------------
# One-time parameter folding (BN fold, banded conv matrices, permuted fc weights)
# ---------------------------------------------------------------------------
def fold_params(p, eps=1e-5):
    w1 = np.asarray(p["w1"], np.float32)      # (16, 1, 5, 5)
    w2 = np.asarray(p["w2"], np.float32)      # (32, 16, 5, 5)
    fcw = np.asarray(p["fcw"], np.float32)    # (10, 1568)
    fcb = np.asarray(p["fcb"], np.float32)

    s1 = np.asarray(p["g1"], np.float32) / np.sqrt(np.asarray(p["v1"], np.float32) + eps)
    c1 = np.asarray(p["be1"], np.float32) + (np.asarray(p["b1"], np.float32)
                                             - np.asarray(p["m1"], np.float32)) * s1
    s2 = np.asarray(p["g2"], np.float32) / np.sqrt(np.asarray(p["v2"], np.float32) + eps)
    c2 = np.asarray(p["be2"], np.float32) + (np.asarray(p["b2"], np.float32)
                                             - np.asarray(p["m2"], np.float32)) * s2
    w1s = w1 * s1[:, None, None, None]        # BN scale folded into conv weights
    w2s = w2 * s2[:, None, None, None]

    # layer-1 banded matrix (160, 512): row = dy*32 + padded_col, col = (j%2)*256 + (j//2)*16 + co
    ocol1 = (np.arange(28) % 2) * 256 + (np.arange(28) // 2) * 16
    M1 = np.zeros((160, 512), np.float32)
    for dy in range(5):
        for dx in range(5):
            for j in range(28):
                M1[dy * 32 + j + dx, ocol1[j]:ocol1[j] + 16] += w1s[:, 0, dy, dx]
    b1row = np.zeros((1, 512), np.float32)
    for j in range(28):
        b1row[0, ocol1[j]:ocol1[j] + 16] = c1

    # layer-2 banded matrix (1280, 512): row = dy*256 + pooled_col*16 + ci,
    # col = (j%2)*256 + (j//2)*32 + co.  Horizontal halo cols contribute 0 and are dropped.
    ocol2 = (np.arange(14) % 2) * 256 + (np.arange(14) // 2) * 32
    M2 = np.zeros((1280, 512), np.float32)
    for dy in range(5):
        for dx in range(5):
            for j in range(14):
                pc = j + dx                       # padded input col 0..17
                if 2 <= pc <= 15:
                    for ci in range(16):
                        M2[dy * 256 + (pc - 2) * 16 + ci,
                           ocol2[j]:ocol2[j] + 32] += w2s[:, ci, dy, dx]
    b2row = np.zeros((1, 512), np.float32)
    for j in range(14):
        b2row[0, ocol2[j]:ocol2[j] + 32] = c2

    # fc weights (1792, 128): row = s*256 + jp*32 + co  <->  PyTorch flat index co*49 + s*7 + jp
    Wfc = np.zeros((1792, 128), np.float32)
    for s in range(7):
        for jp in range(7):
            for co in range(32):
                Wfc[s * 256 + jp * 32 + co, :10] = fcw[:, co * 49 + s * 7 + jp]
    bfc = np.zeros((1, 128), np.float32)
    bfc[0, :10] = fcb

    bf16 = jnp.bfloat16
    return {
        "m1": jnp.asarray(M1, bf16), "b1": jnp.asarray(b1row),
        "m2": jnp.asarray(M2, bf16), "b2": jnp.asarray(b2row),
        "wfc": jnp.asarray(Wfc, bf16), "bfc": jnp.asarray(bfc),
    }


# ---------------------------------------------------------------------------
# PyTorch-layout parameter init + pure-JAX reference for a correctness check
# ---------------------------------------------------------------------------
def init_params(key):
    ks = jax.random.split(key, 10)
    f32 = jnp.float32
    return {
        "w1": 0.1 * jax.random.normal(ks[0], (16, 1, 5, 5), f32),
        "b1": 0.05 * jax.random.normal(ks[1], (16,), f32),
        "g1": 1.0 + 0.1 * jax.random.normal(ks[2], (16,), f32),
        "be1": 0.05 * jax.random.normal(ks[3], (16,), f32),
        "m1": jnp.zeros((16,), f32), "v1": jnp.ones((16,), f32),
        "w2": 0.05 * jax.random.normal(ks[4], (32, 16, 5, 5), f32),
        "b2": 0.05 * jax.random.normal(ks[5], (32,), f32),
        "g2": 1.0 + 0.1 * jax.random.normal(ks[6], (32,), f32),
        "be2": 0.05 * jax.random.normal(ks[7], (32,), f32),
        "m2": jnp.zeros((32,), f32), "v2": jnp.ones((32,), f32),
        "fcw": 0.02 * jax.random.normal(ks[8], (10, 7 * 7 * 32), f32),
        "fcb": 0.01 * jax.random.normal(ks[9], (10,), f32),
    }


def reference_forward(x_nchw, p, eps=1e-5):
    def block(x, w, b, g, be, m, v):
        y = lax.conv_general_dilated(
            x, w, window_strides=(1, 1), padding=((2, 2), (2, 2)),
            dimension_numbers=("NCHW", "OIHW", "NCHW"))
        y = y + b[None, :, None, None]
        s = (g / jnp.sqrt(v + eps))
        y = (y - m[None, :, None, None]) * s[None, :, None, None] + be[None, :, None, None]
        y = jnp.maximum(y, 0.0)
        n_, c_, h_, w_ = y.shape
        return y.reshape(n_, c_, h_ // 2, 2, w_ // 2, 2).max(axis=(3, 5))

    y = block(x_nchw, p["w1"], p["b1"], p["g1"], p["be1"], p["m1"], p["v1"])
    y = block(y, p["w2"], p["b2"], p["g2"], p["be2"], p["m2"], p["v2"])
    y = y.reshape(y.shape[0], -1)
    return y @ p["fcw"].T + p["fcb"]


if __name__ == "__main__":
    key = jax.random.PRNGKey(0)
    params = init_params(key)
    kparams = fold_params(params)            # one-time folding (not on the per-call path)

    # fc(7*7*32, 10) pins the input at 1x28x28; 12 images -> padded to 2 grid steps of 8
    # (exercises both the batch-tile padding path and the multi-step / megacore path).
    x = jax.random.normal(jax.random.fold_in(key, 1), (12, 1, 28, 28), jnp.float32)

    fwd = jax.jit(cnn_forward)
    logits = jax.block_until_ready(fwd(x, kparams))
    assert logits.shape == (12, 10), logits.shape

    # Correctness check vs. a pure-JAX reference (loose tolerance: bf16 matmul operands).
    ref = jax.block_until_ready(reference_forward(x, params))
    np.testing.assert_allclose(np.asarray(logits), np.asarray(ref), rtol=0.1, atol=0.05)

    print("KERNEL_OK")
</pallas_src>

<mosaic_0001>
module attributes {stable_mosaic.version = 11 : i64} {
  func.func @_net_kernel(%arg0: i32, %arg1: memref<1x224x160xbf16, #tpu.memory_space<vmem>>, %arg2: memref<160x512xbf16, #tpu.memory_space<vmem>>, %arg3: memref<1x512xf32, #tpu.memory_space<vmem>>, %arg4: memref<1280x512xbf16, #tpu.memory_space<vmem>>, %arg5: memref<1x512xf32, #tpu.memory_space<vmem>>, %arg6: memref<1792x128xbf16, #tpu.memory_space<vmem>>, %arg7: memref<1x128xf32, #tpu.memory_space<vmem>>, %arg8: memref<8x128xf32, #tpu.memory_space<vmem>>) attributes {dimension_semantics = [#tpu.dimension_semantics<parallel>], iteration_bounds = array<i64: 2>, scalar_prefetch = 0 : i64, scratch_operands = 0 : i64, tpu.core_type = #tpu.core_type<tc>, window_params = [{transform_indices = @transform_0, window_bounds = array<i64: 1, 224, 160>}, {pipeline_mode = #tpu.pipeline_mode<synchronous>, transform_indices = @transform_1, window_bounds = array<i64: 160, 512>}, {pipeline_mode = #tpu.pipeline_mode<synchronous>, transform_indices = @transform_2, window_bounds = array<i64: 1, 512>}, {pipeline_mode = #tpu.pipeline_mode<synchronous>, transform_indices = @transform_3, window_bounds = array<i64: 1280, 512>}, {pipeline_mode = #tpu.pipeline_mode<synchronous>, transform_indices = @transform_4, window_bounds = array<i64: 1, 512>}, {pipeline_mode = #tpu.pipeline_mode<synchronous>, transform_indices = @transform_5, window_bounds = array<i64: 1792, 128>}, {pipeline_mode = #tpu.pipeline_mode<synchronous>, transform_indices = @transform_6, window_bounds = array<i64: 1, 128>}, {transform_indices = @transform_7, window_bounds = array<i64: 8, 128>}]} {
    %c0 = arith.constant 0 : index
    %c0_0 = arith.constant 0 : index
    %c0_1 = arith.constant 0 : index
    %0 = vector.load %arg1[%c0, %c0_0, %c0_1] : memref<1x224x160xbf16, #tpu.memory_space<vmem>>, vector<1x224x160xbf16>
    %1 = vector.shape_cast %0 : vector<1x224x160xbf16> to vector<224x160xbf16>
    %c0_2 = arith.constant 0 : index
    %c0_3 = arith.constant 0 : index
    %2 = vector.load %arg2[%c0_2, %c0_3] : memref<160x512xbf16, #tpu.memory_space<vmem>>, vector<160x512xbf16>
    %cst = arith.constant dense<0.000000e+00> : vector<224x512xf32>
    %3 = tpu.matmul %1, %2, %cst {dimension_numbers = #tpu.dot_dimension_numbers<[1], [0], [0], [1], [0, 0, 1, 1], [], []>} : vector<224x160xbf16>, vector<160x512xbf16>, vector<224x512xf32> -> vector<224x512xf32>
    %c0_4 = arith.constant 0 : index
    %c0_5 = arith.constant 0 : index
    %4 = vector.load %arg3[%c0_4, %c0_5] : memref<1x512xf32, #tpu.memory_space<vmem>>, vector<1x512xf32>
    %5 = vector.broadcast %4 : vector<1x512xf32> to vector<224x512xf32>
    %6 = arith.addf %3, %5 : vector<224x512xf32>
    %cst_6 = arith.constant 0.000000e+00 : f32
    %7 = vector.broadcast %cst_6 : f32 to vector<224x512xf32>
    %8 = arith.maximumf %6, %7 : vector<224x512xf32>
    %9 = vector.extract_strided_slice %8 {offsets = [0, 0], sizes = [224, 256], strides = [1, 1]} : vector<224x512xf32> to vector<224x256xf32>
    %10 = vector.extract_strided_slice %8 {offsets = [0, 256], sizes = [224, 256], strides = [1, 1]} : vector<224x512xf32> to vector<224x256xf32>
    %11 = arith.maximumf %9, %10 : vector<224x256xf32>
    %12 = vector.extract_strided_slice %11 {offsets = [0, 0], sizes = [112, 256], strides = [1, 1]} : vector<224x256xf32> to vector<112x256xf32>
    %13 = vector.extract_strided_slice %11 {offsets = [112, 0], sizes = [112, 256], strides = [1, 1]} : vector<224x256xf32> to vector<112x256xf32>
    %14 = arith.maximumf %12, %13 : vector<112x256xf32>
    %15 = arith.truncf %14 : vector<112x256xf32> to vector<112x256xbf16>
    %cst_7 = arith.constant 0.000000e+00 : bf16
    %16 = vector.broadcast %cst_7 : bf16 to vector<16x256xbf16>
    %17 = tpu.concatenate %16, %15, %16 in 0 : vector<16x256xbf16>, vector<112x256xbf16>, vector<16x256xbf16> -> vector<144x256xbf16>
    %18 = vector.extract_strided_slice %17 {offsets = [0, 0], sizes = [112, 256], strides = [1, 1]} : vector<144x256xbf16> to vector<112x256xbf16>
    %19 = vector.extract_strided_slice %17 {offsets = [8, 0], sizes = [112, 256], strides = [1, 1]} : vector<144x256xbf16> to vector<112x256xbf16>
    %20 = vector.extract_strided_slice %17 {offsets = [16, 0], sizes = [112, 256], strides = [1, 1]} : vector<144x256xbf16> to vector<112x256xbf16>
    %21 = vector.extract_strided_slice %17 {offsets = [24, 0], sizes = [112, 256], strides = [1, 1]} : vector<144x256xbf16> to vector<112x256xbf16>
    %22 = vector.extract_strided_slice %17 {offsets = [32, 0], sizes = [112, 256], strides = [1, 1]} : vector<144x256xbf16> to vector<112x256xbf16>
    %23 = tpu.concatenate %18, %19, %20, %21, %22 in 1 : vector<112x256xbf16>, vector<112x256xbf16>, vector<112x256xbf16>, vector<112x256xbf16>, vector<112x256xbf16> -> vector<112x1280xbf16>
    %c0_8 = arith.constant 0 : index
    %c0_9 = arith.constant 0 : index
    %24 = vector.load %arg4[%c0_8, %c0_9] : memref<1280x512xbf16, #tpu.memory_space<vmem>>, vector<1280x512xbf16>
    %cst_10 = arith.constant dense<0.000000e+00> : vector<112x512xf32>
    %25 = tpu.matmul %23, %24, %cst_10 {dimension_numbers = #tpu.dot_dimension_numbers<[1], [0], [0], [1], [0, 0, 1, 1], [], []>} : vector<112x1280xbf16>, vector<1280x512xbf16>, vector<112x512xf32> -> vector<112x512xf32>
    %c0_11 = arith.constant 0 : index
    %c0_12 = arith.constant 0 : index
    %26 = vector.load %arg5[%c0_11, %c0_12] : memref<1x512xf32, #tpu.memory_space<vmem>>, vector<1x512xf32>
    %27 = vector.broadcast %26 : vector<1x512xf32> to vector<112x512xf32>
    %28 = arith.addf %25, %27 : vector<112x512xf32>
    %cst_13 = arith.constant 0.000000e+00 : f32
    %29 = vector.broadcast %cst_13 : f32 to vector<112x512xf32>
    %30 = arith.maximumf %28, %29 : vector<112x512xf32>
    %31 = vector.extract_strided_slice %30 {offsets = [0, 0], sizes = [112, 256], strides = [1, 1]} : vector<112x512xf32> to vector<112x256xf32>
    %32 = vector.extract_strided_slice %30 {offsets = [0, 256], sizes = [112, 256], strides = [1, 1]} : vector<112x512xf32> to vector<112x256xf32>
    %33 = arith.maximumf %31, %32 : vector<112x256xf32>
    %34 = vector.extract_strided_slice %33 {offsets = [0, 0], sizes = [8, 256], strides = [1, 1]} : vector<112x256xf32> to vector<8x256xf32>
    %35 = vector.extract_strided_slice %33 {offsets = [8, 0], sizes = [8, 256], strides = [1, 1]} : vector<112x256xf32> to vector<8x256xf32>
    %36 = arith.maximumf %34, %35 : vector<8x256xf32>
    %37 = vector.extract_strided_slice %33 {offsets = [16, 0], sizes = [8, 256], strides = [1, 1]} : vector<112x256xf32> to vector<8x256xf32>
    %38 = vector.extract_strided_slice %33 {offsets = [24, 0], sizes = [8, 256], strides = [1, 1]} : vector<112x256xf32> to vector<8x256xf32>
    %39 = arith.maximumf %37, %38 : vector<8x256xf32>
    %40 = vector.extract_strided_slice %33 {offsets = [32, 0], sizes = [8, 256], strides = [1, 1]} : vector<112x256xf32> to vector<8x256xf32>
    %41 = vector.extract_strided_slice %33 {offsets = [40, 0], sizes = [8, 256], strides = [1, 1]} : vector<112x256xf32> to vector<8x256xf32>
    %42 = arith.maximumf %40, %41 : vector<8x256xf32>
    %43 = vector.extract_strided_slice %33 {offsets = [48, 0], sizes = [8, 256], strides = [1, 1]} : vector<112x256xf32> to vector<8x256xf32>
    %44 = vector.extract_strided_slice %33 {offsets = [56, 0], sizes = [8, 256], strides = [1, 1]} : vector<112x256xf32> to vector<8x256xf32>
    %45 = arith.maximumf %43, %44 : vector<8x256xf32>
    %46 = vector.extract_strided_slice %33 {offsets = [64, 0], sizes = [8, 256], strides = [1, 1]} : vector<112x256xf32> to vector<8x256xf32>
    %47 = vector.extract_strided_slice %33 {offsets = [72, 0], sizes = [8, 256], strides = [1, 1]} : vector<112x256xf32> to vector<8x256xf32>
    %48 = arith.maximumf %46, %47 : vector<8x256xf32>
    %49 = vector.extract_strided_slice %33 {offsets = [80, 0], sizes = [8, 256], strides = [1, 1]} : vector<112x256xf32> to vector<8x256xf32>
    %50 = vector.extract_strided_slice %33 {offsets = [88, 0], sizes = [8, 256], strides = [1, 1]} : vector<112x256xf32> to vector<8x256xf32>
    %51 = arith.maximumf %49, %50 : vector<8x256xf32>
    %52 = vector.extract_strided_slice %33 {offsets = [96, 0], sizes = [8, 256], strides = [1, 1]} : vector<112x256xf32> to vector<8x256xf32>
    %53 = vector.extract_strided_slice %33 {offsets = [104, 0], sizes = [8, 256], strides = [1, 1]} : vector<112x256xf32> to vector<8x256xf32>
    %54 = arith.maximumf %52, %53 : vector<8x256xf32>
    %55 = tpu.concatenate %36, %39, %42, %45, %48, %51, %54 in 1 : vector<8x256xf32>, vector<8x256xf32>, vector<8x256xf32>, vector<8x256xf32>, vector<8x256xf32>, vector<8x256xf32>, vector<8x256xf32> -> vector<8x1792xf32>
    %56 = arith.truncf %55 : vector<8x1792xf32> to vector<8x1792xbf16>
    %c0_14 = arith.constant 0 : index
    %c0_15 = arith.constant 0 : index
    %57 = vector.load %arg6[%c0_14, %c0_15] : memref<1792x128xbf16, #tpu.memory_space<vmem>>, vector<1792x128xbf16>
    %cst_16 = arith.constant dense<0.000000e+00> : vector<8x128xf32>
    %58 = tpu.matmul %56, %57, %cst_16 {dimension_numbers = #tpu.dot_dimension_numbers<[1], [0], [0], [1], [0, 0, 1, 1], [], []>} : vector<8x1792xbf16>, vector<1792x128xbf16>, vector<8x128xf32> -> vector<8x128xf32>
    %c0_17 = arith.constant 0 : index
    %c0_18 = arith.constant 0 : index
    %59 = vector.load %arg7[%c0_17, %c0_18] : memref<1x128xf32, #tpu.memory_space<vmem>>, vector<1x128xf32>
    %60 = vector.broadcast %59 : vector<1x128xf32> to vector<8x128xf32>
    %61 = arith.addf %58, %60 : vector<8x128xf32>
    %c0_19 = arith.constant 0 : index
    %c0_20 = arith.constant 0 : index
    %62 = vector.load %arg8[%c0_19, %c0_20] : memref<8x128xf32, #tpu.memory_space<vmem>>, vector<8x128xf32>
    tpu.vector_store %arg8[%c0_19, %c0_20], %61 {strides = array<i32>} : memref<8x128xf32, #tpu.memory_space<vmem>>, vector<8x128xf32>,
    return
  }
  func.func @transform_0(%arg0: i32) -> (i32, i32, i32) {
    %c0_i32 = arith.constant 0 : i32
    %c0_i32_0 = arith.constant 0 : i32
    %c0_i32_1 = arith.constant 0 : i32
    return %arg0, %c0_i32, %c0_i32_0 : i32, i32, i32
  }
  func.func @transform_1(%arg0: i32) -> (i32, i32) {
    %c0_i32 = arith.constant 0 : i32
    %c0_i32_0 = arith.constant 0 : i32
    %c0_i32_1 = arith.constant 0 : i32
    return %c0_i32, %c0_i32_0 : i32, i32
  }
  func.func @transform_2(%arg0: i32) -> (i32, i32) {
    %c0_i32 = arith.constant 0 : i32
    %c0_i32_0 = arith.constant 0 : i32
    %c0_i32_1 = arith.constant 0 : i32
    return %c0_i32, %c0_i32_0 : i32, i32
  }
  func.func @transform_3(%arg0: i32) -> (i32, i32) {
    %c0_i32 = arith.constant 0 : i32
    %c0_i32_0 = arith.constant 0 : i32
    %c0_i32_1 = arith.constant 0 : i32
    return %c0_i32, %c0_i32_0 : i32, i32
  }
  func.func @transform_4(%arg0: i32) -> (i32, i32) {
    %c0_i32 = arith.constant 0 : i32
    %c0_i32_0 = arith.constant 0 : i32
    %c0_i32_1 = arith.constant 0 : i32
    return %c0_i32, %c0_i32_0 : i32, i32
  }
  func.func @transform_5(%arg0: i32) -> (i32, i32) {
    %c0_i32 = arith.constant 0 : i32
    %c0_i32_0 = arith.constant 0 : i32
    %c0_i32_1 = arith.constant 0 : i32
    return %c0_i32, %c0_i32_0 : i32, i32
  }
  func.func @transform_6(%arg0: i32) -> (i32, i32) {
    %c0_i32 = arith.constant 0 : i32
    %c0_i32_0 = arith.constant 0 : i32
    %c0_i32_1 = arith.constant 0 : i32
    return %c0_i32, %c0_i32_0 : i32, i32
  }
  func.func @transform_7(%arg0: i32) -> (i32, i32) {
    %c0_i32 = arith.constant 0 : i32
    %c0_i32_0 = arith.constant 0 : i32
    return %arg0, %c0_i32 : i32, i32
  }
}

</mosaic_0001>

<bundles_post_ra>
// kernel: cnn_forward.1
= control target key start
LH: loop header
LB: loop body
LE: loop exit
PB: predicated region body
PF: predicated region fallthrough
CT: control target
= control target key end

     0   :  { %12 = vsyncpa [#allocation3], 0  ;;  %s9635_s0 = inlined_call_operand.vmem [shape: bf16[2,224,160], index: 0, kind: input, shape index: {}]   ;;  %s9636_s1 = inlined_call_operand.vmem [shape: bf16[160,512], index: 1, kind: input, shape index: {}]   ;;  %s9637_s2 = inlined_call_operand.vmem [shape: f32[1,512], index: 2, kind: input, shape index: {}]   ;;  %s9638_s3 = inlined_call_operand.vmem [shape: bf16[1280,512], index: 3, kind: input, shape index: {}]   ;;  %s9639_s4 = inlined_call_operand.vmem [shape: f32[1,512], index: 4, kind: input, shape index: {}]   ;;  %s9640_s5 = inlined_call_operand.vmem [shape: bf16[1792,128], index: 5, kind: input, shape index: {}]   ;;  %s9641_s6 = inlined_call_operand.vmem [shape: f32[1,128], index: 6, kind: input, shape index: {}]   ;;  %s9642_s7 = inlined_call_operand.hbm [shape: f32[16,128], index: 7, kind: output, shape index: {}]  }
   0x1   :  { %14 = vsyncpa [#allocation3 + $0x1], 0  ;;  %s7511_s24 = smov 0   ;;  %s7513_s25 = smov 0  }
   0x2   :  { %s7515_s26 = smov 0   ;;  %s7517_s27 = smov 0  }
   0x3 LB: > { %s7532_s28 = sadd.s32 4294967295, %s7467_s27   ;;  %s5697_s29 = sadd.s32 4294967294, %s7467_s27   ;;  %s7467_s27 = sphi %s7517_s27, %s9648_s27   ;;  %s7463_s26 = sphi %s7515_s26, %s9647_s26   ;;  %s7459_s25 = sphi %s7513_s25, %s9646_s25   ;;  %s7455_s24 = sphi %s7511_s24, %s9645_s24  }
   0x4   : > { %s7536_s30 = sadd.s32 1, %s7467_s27   ;;  %s179_s8 = sadd.s32 1, %s7463_s26 }
   0x5   : > { %s176_s9 = ssub.s32 %s7467_s27, %s7536_s30  ;;  %p189_p0 = scmp.ne.s32.totalorder %s7463_s26, %s7459_s25 }
   0x6   : > { %p177_p1 = scmp.eq.s32.totalorder %s176_s9, 0  ;;  %p190_p2 = scmp.eq.s32.totalorder %s7532_s28, 1 }
   0x7   : > { %p195_p3 = scmp.ne.s32.totalorder %s7459_s25, %s7455_s24  ;;  %p196_p4 = scmp.eq.s32.totalorder %s5697_s29, 1 }
   0x8   : > { %s7547_s10 = scalar_select %p177_p1, %s7463_s26, %s179_s8  }
   0x9   : > { %p7549_p5 = por %p190_p2, %p189_p0  ;;  %p7553_p6 = por %p196_p4, %p195_p3 }
   0xa   : > { %p5700_p7 = scmp.ge.s32.totalorder %s7467_s27, 1  ;;  %p240_p8 = scmp.lt.s32.totalorder %s7467_s27, 3 }
   0xc   : > { %p241_p9 = pnand %p5700_p7, %p240_p8 }
   0xd   : > { %v6711_v0 = vld [vmem:[%s9636_s1 + $0x4] ss:$16 sps:$4 sm:$0xff] (!%p241_p9)   ;;  %v6713_v1 = vld [vmem:[%s9636_s1 + $0xc] ss:$16 sps:$4 sm:$0xff] (!%p241_p9)   ;;  %v6715_v2 = vld [vmem:[%s9636_s1] ss:$16 sps:$4 sm:$0xff] (!%p241_p9)  }
   0xe   : > { %244 = sbr.rel (%p241_p9) target bundleno = 1133 (0x46d), region = 48  ;;  %737 = vmatprep.subr.bf16.mxu0 (!%p241_p9), %v6711_v0  ;;  %v6716_v3 = vld [vmem:[%s9636_s1 + $0x8] ss:$16 sps:$4 sm:$0xff] (!%p241_p9)   ;;  %910 = vmatprep.subr.bf16.mxu1 (!%p241_p9), %v6713_v1  ;;  %v6717_v4 = vld [vmem:[%s9636_s1 + $0x24] ss:$16 sps:$4 sm:$0xff] (!%p241_p9)   ;;  %p272_p10 = scmp.lt.s32.totalorder (!%p241_p9), %s7532_s28, 1 }
   0xf   : > { %738 = vmatpush1.bf16.msra.mxu0 (!%p241_p9), %v6715_v2  ;;  %911 = vmatpush1.bf16.msra.mxu1 (!%p241_p9), %v6716_v3  ;;  %v6719_v5 = vld [vmem:[%s9636_s1 + $0x2c] ss:$16 sps:$4 sm:$0xff] (!%p241_p9)   ;;  %v6721_v6 = vld [vmem:[%s9636_s1 + $0x20] ss:$16 sps:$4 sm:$0xff] (!%p241_p9)   ;;  %v6722_v7 = vld [vmem:[%s9636_s1 + $0x28] ss:$16 sps:$4 sm:$0xff] (!%p241_p9)  }
  0x10   : > { %739 = vmatprep.subr.bf16.mxu0 (!%p241_p9), %v6717_v4  ;;  %912 = vmatprep.subr.bf16.mxu1 (!%p241_p9), %v6719_v5  ;;  %v6723_v8 = vld [vmem:[%s9636_s1 + $0x44] ss:$16 sps:$4 sm:$0xff] (!%p241_p9)   ;;  %v6725_v9 = vld [vmem:[%s9636_s1 + $0x4c] ss:$16 sps:$4 sm:$0xff] (!%p241_p9)   ;;  %v6727_v10 = vld [vmem:[%s9636_s1 + $0x40] ss:$16 sps:$4 sm:$0xff] (!%p241_p9)  }
  0x11   : > { %v6728_v11 = vld [vmem:[%s9636_s1 + $0x48] ss:$16 sps:$4 sm:$0xff] (!%p241_p9)   ;;  %v6729_v12 = vld [vmem:[%s9636_s1 + $0x64] ss:$16 sps:$4 sm:$0xff] (!%p241_p9)   ;;  %v6731_v13 = vld [vmem:[%s9636_s1 + $0x6c] ss:$16 sps:$4 sm:$0xff] (!%p241_p9)  }
  0x12   : > { %v6733_v14 = vld [vmem:[%s9636_s1 + $0x60] ss:$16 sps:$4 sm:$0xff] (!%p241_p9)   ;;  %v6734_v15 = vld [vmem:[%s9636_s1 + $0x68] ss:$16 sps:$4 sm:$0xff] (!%p241_p9)   ;;  %v6735_v16 = vld [vmem:[%s9636_s1 + $0x84] ss:$16 sps:$4 sm:$0xff] (!%p241_p9)  }
  0x13   : > { %740 = vmatpush1.bf16.msra.mxu0 (!%p241_p9), %v6721_v6  ;;  %913 = vmatpush1.bf16.msra.mxu1 (!%p241_p9), %v6722_v7  ;;  %v6737_v17 = vld [vmem:[%s9636_s1 + $0x8c] ss:$16 sps:$4 sm:$0xff] (!%p241_p9)   ;;  %v6739_v18 = vld [vmem:[%s9636_s1 + $0x80] ss:$16 sps:$4 sm:$0xff] (!%p241_p9)   ;;  %v6740_v19 = vld [vmem:[%s9636_s1 + $0x88] ss:$16 sps:$4 sm:$0xff] (!%p241_p9)  }
  0x14   : > { %741 = vmatprep.subr.bf16.mxu0 (!%p241_p9), %v6723_v8  ;;  %914 = vmatprep.subr.bf16.mxu1 (!%p241_p9), %v6725_v9  ;;  %v6741_v20 = vld [vmem:[%s9636_s1 + $0xa4] ss:$16 sps:$4 sm:$0xff] (!%p241_p9)   ;;  %v6743_v21 = vld [vmem:[%s9636_s1 + $0xac] ss:$16 sps:$4 sm:$0xff] (!%p241_p9)   ;;  %v6745_v22 = vld [vmem:[%s9636_s1 + $0xa0] ss:$16 sps:$4 sm:$0xff] (!%p241_p9)  }
  0x15   : > { %s273_s13 = scalar_select %p272_p10, %s7532_s28, 1  ;;  %v6746_v23 = vld [vmem:[%s9636_s1 + $0xa8] ss:$16 sps:$4 sm:$0xff]   ;;  %v6747_v24 = vld [vmem:[%s9636_s1 + $0xc4] ss:$16 sps:$4 sm:$0xff]   ;;  %vm694_vm0 = vcmask 261120  }
  0x16   : > { %v6749_v25 = vld [vmem:[%s9636_s1 + $0xcc] ss:$16 sps:$4 sm:$0xff]   ;;  %v6751_v26 = vld [vmem:[%s9636_s1 + $0xc0] ss:$16 sps:$4 sm:$0xff]   ;;  %v6752_v27 = vld [vmem:[%s9636_s1 + $0xc8] ss:$16 sps:$4 sm:$0xff]  }
  0x17   : > { %742 = vmatpush1.bf16.msra.mxu0 %v6727_v10  ;;  %915 = vmatpush1.bf16.msra.mxu1 %v6728_v11  ;;  %s6670_s22 = smul.u32 224, %s273_s13  ;;  %v6753_v28 = vld [vmem:[%s9636_s1 + $0xe4] ss:$16 sps:$4 sm:$0xff]   ;;  %v6755_v29 = vld [vmem:[%s9636_s1 + $0xec] ss:$16 sps:$4 sm:$0xff]   ;;  %vm1308_vm1 = vcmask 1043456  }
  0x18   : > { %743 = vmatprep.subr.bf16.mxu0 %v6729_v12  ;;  %916 = vmatprep.subr.bf16.mxu1 %v6731_v13  ;;  %v6757_v30 = vld [vmem:[%s9636_s1 + $0xe0] ss:$16 sps:$4 sm:$0xff]   ;;  %v6758_v31 = vld [vmem:[%s9636_s1 + $0xe8] ss:$16 sps:$4 sm:$0xff]   ;;  %v6759_v33 = vld [vmem:[%s9636_s1 + $0x104] ss:$16 sps:$4 sm:$0xff]  }
  0x19   : > { %s7651_s19 = scalar_lea.vmem %s9635_s0, %s6670_s22  ;;  %v6761_v34 = vld [vmem:[%s9636_s1 + $0x10c] ss:$16 sps:$4 sm:$0xff]   ;;  %v6763_v35 = vld [vmem:[%s9636_s1 + $0x100] ss:$16 sps:$4 sm:$0xff]   ;;  %v6764_v36 = vld [vmem:[%s9636_s1 + $0x108] ss:$16 sps:$4 sm:$0xff]  }
  0x1a   : > { %v6773_v32 = vld [vmem:[%s7651_s19 + $0x4] ss:$8 sps:$4 sm:$0xff]   ;;  %v6769_v39 = vld [vmem:[%s9636_s1 + $0x120] ss:$16 sps:$4 sm:$0xff]   ;;  %v6770_v40 = vld [vmem:[%s9636_s1 + $0x128] ss:$16 sps:$4 sm:$0xff]  }
  0x1b   : > { %744 = vmatpush1.bf16.msra.mxu0 %v6733_v14  ;;  %917 = vmatpush1.bf16.msra.mxu1 %v6734_v15  ;;  %v6765_v37 = vld [vmem:[%s9636_s1 + $0x124] ss:$16 sps:$4 sm:$0xff]   ;;  %v6767_v38 = vld [vmem:[%s9636_s1 + $0x12c] ss:$16 sps:$4 sm:$0xff]   ;;  %v6771_v41 = vld [vmem:[%s7651_s19] ss:$8 sps:$4 sm:$0xff]  }
  0x1c   : > { %745 = vmatprep.subr.bf16.mxu0 %v6735_v16  ;;  %918 = vmatprep.subr.bf16.mxu1 %v6737_v17  ;;  %v6774_v42 = vld [vmem:[%s7651_s19 + $0x14] ss:$8 sps:$4 sm:$0xff]   ;;  %v6776_v43 = vld [vmem:[%s7651_s19 + $0x10] ss:$8 sps:$4 sm:$0xff]   ;;  %v6777_v44 = vld [vmem:[%s7651_s19 + $0x24] ss:$8 sps:$4 sm:$0xff]  }
  0x1d   : > { %5771 = vmatprep.mubr.msk.bf16.mxu0 %vm694_vm0, %v6773_v32  ;;  %5785 = vmatprep.mubr.msk.bf16.mxu1 %vm694_vm0, %v6773_v32  ;;  %v6813_v45 = vld [vmem:[%s9638_s3] ss:$16 sps:$4 sm:$0xff]   ;;  %v6815_v46 = vld [vmem:[%s9638_s3 + $0x4] ss:$16 sps:$4 sm:$0xff]   ;;  %v6816_v47 = vld [vmem:[%s9638_s3 + $0x8] ss:$16 sps:$4 sm:$0xff]  }
  0x1e   : > { %v6818_v48 = vld [vmem:[%s9638_s3 + $0xc] ss:$16 sps:$4 sm:$0xff]   ;;  %v6819_v49 = vld [vmem:[%s9638_s3 + $0x20] ss:$16 sps:$4 sm:$0xff]   ;;  %v6821_v50 = vld [vmem:[%s9638_s3 + $0x24] ss:$16 sps:$4 sm:$0xff]  }
  0x1f   : > { %746 = vmatpush1.bf16.msra.mxu0 %v6739_v18  ;;  %919 = vmatpush1.bf16.msra.mxu1 %v6740_v19  ;;  %v6822_v51 = vld [vmem:[%s9638_s3 + $0x28] ss:$16 sps:$4 sm:$0xff]   ;;  %v6824_v52 = vld [vmem:[%s9638_s3 + $0x2c] ss:$16 sps:$4 sm:$0xff]   ;;  %v6827_v53 = vld [vmem:[%s9638_s3 + $0x44] ss:$16 sps:$4 sm:$0xff]  }
  0x20   : > { %747 = vmatprep.subr.bf16.mxu0 %v6741_v20  ;;  %920 = vmatprep.subr.bf16.mxu1 %v6743_v21  ;;  %v6830_v54 = vld [vmem:[%s9638_s3 + $0x4c] ss:$16 sps:$4 sm:$0xff]   ;;  %v6825_v55 = vld [vmem:[%s9638_s3 + $0x40] ss:$16 sps:$4 sm:$0xff]   ;;  %v6828_v56 = vld [vmem:[%s9638_s3 + $0x48] ss:$16 sps:$4 sm:$0xff]  }
  0x21   : > { %v6779_v57 = vld [vmem:[%s7651_s19 + $0x20] ss:$8 sps:$4 sm:$0xff]   ;;  %v6780_v58 = vld [vmem:[%s7651_s19 + $0x34] ss:$8 sps:$4 sm:$0xff]   ;;  %v6782_v3 = vld [vmem:[%s7651_s19 + $0x30] ss:$8 sps:$4 sm:$0xff]  }
  0x22   : > { %v6833_v59 = vld [vmem:[%s9638_s3 + $0x64] ss:$16 sps:$4 sm:$0xff]   ;;  %v6836_v60 = vld [vmem:[%s9638_s3 + $0x6c] ss:$16 sps:$4 sm:$0xff]   ;;  %v6831_v61 = vld [vmem:[%s9638_s3 + $0x60] ss:$16 sps:$4 sm:$0xff]  }
  0x23   : > { %748 = vmatpush1.bf16.msra.mxu0 %v6745_v22  ;;  %921 = vmatpush1.bf16.msra.mxu1 %v6746_v23  ;;  %v6834_v62 = vld [vmem:[%s9638_s3 + $0x68] ss:$16 sps:$4 sm:$0xff]   ;;  %v6839_v63 = vld [vmem:[%s9638_s3 + $0x84] ss:$16 sps:$4 sm:$0xff]   ;;  %v6842_v0 = vld [vmem:[%s9638_s3 + $0x8c] ss:$16 sps:$4 sm:$0xff]  }
  0x24   : > { %749 = vmatprep.subr.bf16.mxu0 %v6747_v24  ;;  %922 = vmatprep.subr.bf16.mxu1 %v6749_v25  ;;  %v6837_v1 = vld [vmem:[%s9638_s3 + $0x80] ss:$16 sps:$4 sm:$0xff]   ;;  %v6840_v2 = vld [vmem:[%s9638_s3 + $0x88] ss:$16 sps:$4 sm:$0xff]   ;;  %v6783_v4 = vld [vmem:[%s7651_s19 + $0x44] ss:$8 sps:$4 sm:$0xff]  }
  0x25   : > { %v6845_v5 = vld [vmem:[%s9638_s3 + $0xa4] ss:$16 sps:$4 sm:$0xff]   ;;  %v6848_v6 = vld [vmem:[%s9638_s3 + $0xac] ss:$16 sps:$4 sm:$0xff]   ;;  %v6843_v7 = vld [vmem:[%s9638_s3 + $0xa0] ss:$16 sps:$4 sm:$0xff]  }
  0x26   : > { %v6846_v8 = vld [vmem:[%s9638_s3 + $0xa8] ss:$16 sps:$4 sm:$0xff]   ;;  %v6851_v9 = vld [vmem:[%s9638_s3 + $0xc4] ss:$16 sps:$4 sm:$0xff]   ;;  %v6854_v10 = vld [vmem:[%s9638_s3 + $0xcc] ss:$16 sps:$4 sm:$0xff]  }
  0x27   : > { %750 = vmatpush1.bf16.msra.mxu0 %v6751_v26  ;;  %923 = vmatpush1.bf16.msra.mxu1 %v6752_v27  ;;  %v6785_v11 = vld [vmem:[%s7651_s19 + $0x40] ss:$8 sps:$4 sm:$0xff]   ;;  %v6786_v14 = vld [vmem:[%s7651_s19 + $0x54] ss:$8 sps:$4 sm:$0xff]   ;;  %v6788_v23 = vld [vmem:[%s7651_s19 + $0x50] ss:$8 sps:$4 sm:$0xff]  }
  0x28   : > { %751 = vmatprep.subr.bf16.mxu0 %v6753_v28  ;;  %924 = vmatprep.subr.bf16.mxu1 %v6755_v29  ;;  %v6849_v12 = vld [vmem:[%s9638_s3 + $0xc0] ss:$16 sps:$4 sm:$0xff]   ;;  %v6852_v13 = vld [vmem:[%s9638_s3 + $0xc8] ss:$16 sps:$4 sm:$0xff]   ;;  %v6857_v15 = vld [vmem:[%s9638_s3 + $0xe4] ss:$16 sps:$4 sm:$0xff]  }
  0x29   : > { %v6860_v16 = vld [vmem:[%s9638_s3 + $0xec] ss:$16 sps:$4 sm:$0xff]   ;;  %v6855_v17 = vld [vmem:[%s9638_s3 + $0xe0] ss:$16 sps:$4 sm:$0xff]   ;;  %v6858_v18 = vld [vmem:[%s9638_s3 + $0xe8] ss:$16 sps:$4 sm:$0xff]  }
  0x2a   : > { %v6863_v19 = vld [vmem:[%s9638_s3 + $0x104] ss:$16 sps:$4 sm:$0xff]   ;;  %v6866_v20 = vld [vmem:[%s9638_s3 + $0x10c] ss:$16 sps:$4 sm:$0xff]   ;;  %v6861_v21 = vld [vmem:[%s9638_s3 + $0x100] ss:$16 sps:$4 sm:$0xff]  }
  0x2b   : > { %752 = vmatpush1.bf16.msra.mxu0 %v6757_v30  ;;  %925 = vmatpush1.bf16.msra.mxu1 %v6758_v31  ;;  %v6864_v22 = vld [vmem:[%s9638_s3 + $0x108] ss:$16 sps:$4 sm:$0xff]   ;;  %v6789_v24 = vld [vmem:[%s7651_s19 + $0x64] ss:$8 sps:$4 sm:$0xff]   ;;  %v6792_v26 = vld [vmem:[%s7651_s19 + $0x74] ss:$8 sps:$4 sm:$0xff]  }
  0x2c   : > { %753 = vmatprep.subr.bf16.mxu0 %v6759_v33  ;;  %926 = vmatprep.subr.bf16.mxu1 %v6761_v34  ;;  %v6791_v25 = vld [vmem:[%s7651_s19 + $0x60] ss:$8 sps:$4 sm:$0xff]   ;;  %v6794_v27 = vld [vmem:[%s7651_s19 + $0x70] ss:$8 sps:$4 sm:$0xff]   ;;  %v6795_v28 = vld [vmem:[%s7651_s19 + $0x84] ss:$8 sps:$4 sm:$0xff]  }
  0x2d   : > { %v6797_v29 = vld [vmem:[%s7651_s19 + $0x80] ss:$8 sps:$4 sm:$0xff]   ;;  %v6798_v30 = vld [vmem:[%s7651_s19 + $0x94] ss:$8 sps:$4 sm:$0xff]   ;;  %v6800_v31 = vld [vmem:[%s7651_s19 + $0x90] ss:$8 sps:$4 sm:$0xff]  }
  0x2e   : > { %v6801_v32 = vld [vmem:[%s7651_s19 + $0xa4] ss:$8 sps:$4 sm:$0xff]   ;;  %v6803_v33 = vld [vmem:[%s7651_s19 + $0xa0] ss:$8 sps:$4 sm:$0xff]   ;;  %v6804_v34 = vld [vmem:[%s7651_s19 + $0xb4] ss:$8 sps:$4 sm:$0xff]  }
  0x2f   : > { %754 = vmatpush1.bf16.msra.mxu0 %v6763_v35  ;;  %927 = vmatpush1.bf16.msra.mxu1 %v6764_v36  ;;  %v6806_v35 = vld [vmem:[%s7651_s19 + $0xb0] ss:$8 sps:$4 sm:$0xff]   ;;  %v6807_v36 = vld [vmem:[%s7651_s19 + $0xc4] ss:$8 sps:$4 sm:$0xff]   ;;  %s269_s8 = sand.u32 1, %s7459_s25  }
  0x30   : > { %755 = vmatprep.subr.bf16.mxu0 %v6765_v37  ;;  %928 = vmatprep.subr.bf16.mxu1 %v6767_v38  ;;  %v6809_v37 = vld [vmem:[%s7651_s19 + $0xc0] ss:$8 sps:$4 sm:$0xff]   ;;  %v6810_v38 = vld [vmem:[%s7651_s19 + $0xd4] ss:$8 sps:$4 sm:$0xff]   ;;  %s5701_s9 = sshll.u32 %s269_s8, 3  ;;  %s5625_s13 = scalar_lea.sflag [#allocation3], %s269_s8 }
  0x31   : > { %s271_s22 = scalar_lea.vmem [#allocation2], %s5701_s9 }
  0x32   : > { %s5638_s14 = sshll.u32 %s271_s22, 4  ;;  %s9595_s14 = int_to_ptr.vmem [resolvable:$true] %s5638_s14 }
  0x33   : > { %756 = vmatpush1.bf16.msra.mxu0 %v6769_v39  ;;  %929 = vmatpush1.bf16.msra.mxu1 %v6770_v40  ;;  %v6867_v39 = vld [vmem:[%s9638_s3 + $0x120] ss:$16 sps:$4 sm:$0xff]   ;;  %v6869_v40 = vld [vmem:[%s9638_s3 + $0x124] ss:$16 sps:$4 sm:$0xff]   ;;  %s7405_s18 = scalar_lea.vmem %s9595_s14, 128 }
  0x34   : > { %3298 = vmatprep.subr.bf16.mxu0 %v6815_v46  ;;  %3813 = vmatprep.subr.bf16.mxu1 %v6818_v48  ;;  %v6876_v46 = vld [vmem:[%s9638_s3 + $0x148] ss:$16 sps:$4 sm:$0xff]   ;;  %v6879_v48 = vld [vmem:[%s9638_s3 + $0x160] ss:$16 sps:$4 sm:$0xff]   ;;  %p7406_p11 = scmp.ne.s32.totalorder %s9595_s14, %s7405_s18 }
  0x36   : > { %770 = vmatmul.mubr.bf16.vlgmr.msra.gmra.mrb[0].mxu0 %v6771_v41  ;;  %943 = vmatmul.mubr.bf16.vlgmr.msra.gmra.mrb[0].mxu1 %v6771_v41  ;;  %v6870_v41 = vld [vmem:[%s9638_s3 + $0x128] ss:$16 sps:$4 sm:$0xff]   ;;  %p7407_p12 = pnand %p7406_p11, %p7549_p5 }
  0x37   : > { %5772 = vmatprep.mubr.msk.bf16.mxu0 %vm694_vm0, %v6774_v42  ;;  %5786 = vmatprep.mubr.msk.bf16.mxu1 %vm694_vm0, %v6774_v42  ;;  %v6872_v42 = vld [vmem:[%s9638_s3 + $0x12c] ss:$16 sps:$4 sm:$0xff]  }
  0x38   : > { %3299 = vmatpush1.bf16.msra.mxu0 %v6813_v45  ;;  %3814 = vmatpush1.bf16.msra.mxu1 %v6816_v47  ;;  %v6875_v45 = vld [vmem:[%s9638_s3 + $0x144] ss:$16 sps:$4 sm:$0xff]   ;;  %v6878_v47 = vld [vmem:[%s9638_s3 + $0x14c] ss:$16 sps:$4 sm:$0xff]   ;;  %p7408_p13 = pneg %p7407_p12 }
  0x39   : > { %3300 = vmatprep.subr.bf16.mxu0 %v6821_v50  ;;  %3815 = vmatprep.subr.bf16.mxu1 %v6824_v52  ;;  %v6882_v50 = vld [vmem:[%s9638_s3 + $0x168] ss:$16 sps:$4 sm:$0xff]   ;;  %v6885_v52 = vld [vmem:[%s9638_s3 + $0x180] ss:$16 sps:$4 sm:$0xff]  }
  0x3c   : > { %3301 = vmatpush1.bf16.msra.mxu0 %v6819_v49  ;;  %3816 = vmatpush1.bf16.msra.mxu1 %v6822_v51  ;;  %v6881_v49 = vld [vmem:[%s9638_s3 + $0x164] ss:$16 sps:$4 sm:$0xff]   ;;  %v6884_v51 = vld [vmem:[%s9638_s3 + $0x16c] ss:$16 sps:$4 sm:$0xff]  }
  0x3d   : > { %3302 = vmatprep.subr.bf16.mxu0 %v6827_v53  ;;  %3817 = vmatprep.subr.bf16.mxu1 %v6830_v54  ;;  %v6887_v53 = vld [vmem:[%s9638_s3 + $0x184] ss:$16 sps:$4 sm:$0xff]   ;;  %v6888_v54 = vld [vmem:[%s9638_s3 + $0x188] ss:$16 sps:$4 sm:$0xff]  }
  0x3e   : > { %780 = vmatmul.mubr.bf16.gmra.mrb[4].mxu0 %v6776_v43  ;;  %953 = vmatmul.mubr.bf16.gmra.mrb[4].mxu1 %v6776_v43  ;;  %v6812_v43 = vld [vmem:[%s7651_s19 + $0xd0] ss:$8 sps:$4 sm:$0xff]   ;;  %s6233_s19 = sshll.u32 %s7532_s28, 7  ;;  %s7470_s28 = smov [#allocation2]  }
  0x3f   : > { %5773 = vmatprep.mubr.msk.bf16.mxu0 %vm694_vm0, %v6777_v44  ;;  %5787 = vmatprep.mubr.msk.bf16.mxu1 %vm694_vm0, %v6777_v44  ;;  %v6873_v44 = vld [vmem:[%s9638_s3 + $0x140] ss:$16 sps:$4 sm:$0xff]   ;;  %s9593_s17 = scalar_lea.hbm %s9642_s7, %s6233_s19  ;;  %s7409_s20 = sshll.u32 %s7470_s28, 4  ;;  %s7410_s20 = int_to_ptr.vmem [resolvable:$false] %s7409_s20 }
  0x40   : > { %3303 = vmatpush1.bf16.msra.mxu0 %v6825_v55  ;;  %3818 = vmatpush1.bf16.msra.mxu1 %v6828_v56  ;;  %v6890_v55 = vld [vmem:[%s9638_s3 + $0x18c] ss:$16 sps:$4 sm:$0xff]   ;;  %v6891_v56 = vld [vmem:[%s9638_s3 + $0x1a0] ss:$16 sps:$4 sm:$0xff]   ;;  %s7411_s21 = scalar_lea.vmem %s7410_s20, 256  ;;  %p7412_p0 = scmp.lt.s32.totalorder %s9595_s14, %s7410_s20 }
  0x41   : > { %3304 = vmatprep.subr.bf16.mxu0 %v6833_v59  ;;  %3819 = vmatprep.subr.bf16.mxu1 %v6836_v60  ;;  %v6896_v59 = vld [vmem:[%s9638_s3 + $0x1ac] ss:$16 sps:$4 sm:$0xff]   ;;  %v6899_v60 = vld [vmem:[%s9638_s3 + $0x1c4] ss:$16 sps:$4 sm:$0xff]   ;;  %p7413_p1 = scmp.lt.s32.totalorder %s7411_s21, %s7405_s18 }
  0x43   : > { %p7414_p2 = por %p7413_p1, %p7412_p0 }
  0x44   : > { %3305 = vmatpush1.bf16.msra.mxu0 %v6831_v61  ;;  %3820 = vmatpush1.bf16.msra.mxu1 %v6834_v62  ;;  %v6902_v61 = vld [vmem:[%s9638_s3 + $0x1cc] ss:$16 sps:$4 sm:$0xff]   ;;  %v6897_v62 = vld [vmem:[%s9638_s3 + $0x1c0] ss:$16 sps:$4 sm:$0xff]  }
  0x45   : > { %3306 = vmatprep.subr.bf16.mxu0 %v6839_v63  ;;  %3821 = vmatprep.subr.bf16.mxu1 %v6842_v0  ;;  %v6900_v63 = vld [vmem:[%s9638_s3 + $0x1c8] ss:$16 sps:$4 sm:$0xff]   ;;  %v6903_v0 = vld [vmem:[%s9638_s3 + $0x1e0] ss:$16 sps:$4 sm:$0xff]   ;;  %p7415_p3 = pnand %p7414_p2, %p7408_p13 }
  0x46   : > { %790 = vmatmul.mubr.bf16.gmra.mrb[8].mxu0 %v6779_v57  ;;  %963 = vmatmul.mubr.bf16.gmra.mrb[8].mxu1 %v6779_v57  ;;  %v6893_v57 = vld [vmem:[%s9638_s3 + $0x1a4] ss:$16 sps:$4 sm:$0xff]  }
  0x47   : > { %5774 = vmatprep.mubr.msk.bf16.mxu0 %vm694_vm0, %v6780_v58  ;;  %5788 = vmatprep.mubr.msk.bf16.mxu1 %vm694_vm0, %v6780_v58  ;;  %v6894_v58 = vld [vmem:[%s9638_s3 + $0x1a8] ss:$16 sps:$4 sm:$0xff]  }
  0x48   : > { %3307 = vmatpush1.bf16.msra.mxu0 %v6837_v1  ;;  %3822 = vmatpush1.bf16.msra.mxu1 %v6840_v2  ;;  %v6905_v1 = vld [vmem:[%s9638_s3 + $0x1e4] ss:$16 sps:$4 sm:$0xff]   ;;  %v6906_v2 = vld [vmem:[%s9638_s3 + $0x1e8] ss:$16 sps:$4 sm:$0xff]  }
  0x49   : > { %3308 = vmatprep.subr.bf16.mxu0 %v6845_v5  ;;  %3823 = vmatprep.subr.bf16.mxu1 %v6848_v6  ;;  %v6914_v5 = vld [vmem:[%s9638_s3 + $0x20c] ss:$16 sps:$4 sm:$0xff]   ;;  %v6909_v6 = vld [vmem:[%s9638_s3 + $0x200] ss:$16 sps:$4 sm:$0xff]  }
  0x4c   : > { %3309 = vmatpush1.bf16.msra.mxu0 %v6843_v7  ;;  %3824 = vmatpush1.bf16.msra.mxu1 %v6846_v8  ;;  %v6912_v7 = vld [vmem:[%s9638_s3 + $0x208] ss:$16 sps:$4 sm:$0xff]   ;;  %v7469_v8 = vmov 0  }
  0x4d   : > { %3310 = vmatprep.subr.bf16.mxu0 %v6851_v9  ;;  %3825 = vmatprep.subr.bf16.mxu1 %v6854_v10  ;;  %v6917_v9 = vld [vmem:[%s9638_s3 + $0x224] ss:$16 sps:$4 sm:$0xff]   ;;  %v6920_v10 = vld [vmem:[%s9638_s3 + $0x22c] ss:$16 sps:$4 sm:$0xff]  }
  0x4e   : > { %800 = vmatmul.mubr.bf16.gmra.mrb[12].mxu0 %v6782_v3  ;;  %973 = vmatmul.mubr.bf16.gmra.mrb[12].mxu1 %v6782_v3  ;;  %v6908_v3 = vld [vmem:[%s9638_s3 + $0x1ec] ss:$16 sps:$4 sm:$0xff]  }
  0x4f   : > { %5775 = vmatprep.mubr.msk.bf16.mxu0 %vm694_vm0, %v6783_v4  ;;  %5789 = vmatprep.mubr.msk.bf16.mxu1 %vm694_vm0, %v6783_v4  ;;  %v6911_v4 = vld [vmem:[%s9638_s3 + $0x204] ss:$16 sps:$4 sm:$0xff]  }
  0x50   : > { %3311 = vmatpush1.bf16.msra.mxu0 %v6849_v12  ;;  %3826 = vmatpush1.bf16.msra.mxu1 %v6852_v13  ;;  %v6918_v12 = vld [vmem:[%s9638_s3 + $0x228] ss:$16 sps:$4 sm:$0xff]   ;;  %v6923_v13 = vld [vmem:[%s9638_s3 + $0x244] ss:$16 sps:$4 sm:$0xff]  }
  0x51   : > { %3312 = vmatprep.subr.bf16.mxu0 %v6857_v15  ;;  %3827 = vmatprep.subr.bf16.mxu1 %v6860_v16  ;;  %v6921_v15 = vld [vmem:[%s9638_s3 + $0x240] ss:$16 sps:$4 sm:$0xff]   ;;  %v6924_v16 = vld [vmem:[%s9638_s3 + $0x248] ss:$16 sps:$4 sm:$0xff]  }
  0x54   : > { %3313 = vmatpush1.bf16.msra.mxu0 %v6855_v17  ;;  %3828 = vmatpush1.bf16.msra.mxu1 %v6858_v18  ;;  %v6929_v17 = vld [vmem:[%s9638_s3 + $0x264] ss:$16 sps:$4 sm:$0xff]   ;;  %v6932_v18 = vld [vmem:[%s9638_s3 + $0x26c] ss:$16 sps:$4 sm:$0xff]  }
  0x55   : > { %3314 = vmatprep.subr.bf16.mxu0 %v6863_v19  ;;  %3829 = vmatprep.subr.bf16.mxu1 %v6866_v20  ;;  %v6927_v19 = vld [vmem:[%s9638_s3 + $0x260] ss:$16 sps:$4 sm:$0xff]   ;;  %v6930_v20 = vld [vmem:[%s9638_s3 + $0x268] ss:$16 sps:$4 sm:$0xff]  }
  0x56   : > { %810 = vmatmul.mubr.bf16.gmra.mrb[16].mxu0 %v6785_v11  ;;  %983 = vmatmul.mubr.bf16.gmra.mrb[16].mxu1 %v6785_v11  ;;  %v6915_v11 = vld [vmem:[%s9638_s3 + $0x220] ss:$16 sps:$4 sm:$0xff]  }
  0x57   : > { %5776 = vmatprep.mubr.msk.bf16.mxu0 %vm694_vm0, %v6786_v14  ;;  %5790 = vmatprep.mubr.msk.bf16.mxu1 %vm694_vm0, %v6786_v14  ;;  %v6926_v14 = vld [vmem:[%s9638_s3 + $0x24c] ss:$16 sps:$4 sm:$0xff]  }
  0x58   : > { %3315 = vmatpush1.bf16.msra.mxu0 %v6861_v21  ;;  %3830 = vmatpush1.bf16.msra.mxu1 %v6864_v22  ;;  %v348_v21 = vlaneseq  ;;  %v6935_v22 = vld [vmem:[%s9638_s3 + $0x284] ss:$16 sps:$4 sm:$0xff]  }
  0x59   : > { %3316 = vmatprep.subr.bf16.mxu0 %v6869_v40  ;;  %3831 = vmatprep.subr.bf16.mxu1 %v6872_v42  ;;  %v6962_v40 = vld [vmem:[%s9638_s3 + $0x30c] ss:$16 sps:$4 sm:$0xff]   ;;  %v6960_v42 = vld [vmem:[%s9638_s3 + $0x308] ss:$16 sps:$4 sm:$0xff]  }
  0x5c   : > { %3317 = vmatpush1.bf16.msra.mxu0 %v6867_v39  ;;  %3832 = vmatpush1.bf16.msra.mxu1 %v6870_v41  ;;  %v6959_v39 = vld [vmem:[%s9638_s3 + $0x304] ss:$16 sps:$4 sm:$0xff]   ;;  %v6957_v41 = vld [vmem:[%s9638_s3 + $0x300] ss:$16 sps:$4 sm:$0xff]  }
  0x5d   : > { %3318 = vmatprep.subr.bf16.mxu0 %v6875_v45  ;;  %3833 = vmatprep.subr.bf16.mxu1 %v6878_v47  ;;  %v6963_v45 = vld [vmem:[%s9638_s3 + $0x320] ss:$16 sps:$4 sm:$0xff]   ;;  %v6971_v47 = vld [vmem:[%s9638_s3 + $0x344] ss:$16 sps:$4 sm:$0xff]  }
  0x5e   : > { %820 = vmatmul.mubr.bf16.gmra.mrb[20].mxu0 %v6788_v23  ;;  %993 = vmatmul.mubr.bf16.gmra.mrb[20].mxu1 %v6788_v23  ;;  %v6938_v23 = vld [vmem:[%s9638_s3 + $0x28c] ss:$16 sps:$4 sm:$0xff]  }
  0x5f   : > { %5777 = vmatprep.mubr.msk.bf16.mxu0 %vm694_vm0, %v6789_v24  ;;  %5791 = vmatprep.mubr.msk.bf16.mxu1 %vm694_vm0, %v6789_v24  ;;  %v6933_v24 = vld [vmem:[%s9638_s3 + $0x280] ss:$16 sps:$4 sm:$0xff]  }
  0x60   : > { %3319 = vmatpush1.bf16.msra.mxu0 %v6873_v44  ;;  %3834 = vmatpush1.bf16.msra.mxu1 %v6876_v46  ;;  %v6968_v44 = vld [vmem:[%s9638_s3 + $0x32c] ss:$16 sps:$4 sm:$0xff]   ;;  %v6966_v46 = vld [vmem:[%s9638_s3 + $0x328] ss:$16 sps:$4 sm:$0xff]  }
  0x61   : > { %3320 = vmatprep.subr.bf16.mxu0 %v6881_v49  ;;  %3835 = vmatprep.subr.bf16.mxu1 %v6884_v51  ;;  %v6969_v49 = vld [vmem:[%s9638_s3 + $0x340] ss:$16 sps:$4 sm:$0xff]   ;;  %v6977_v51 = vld [vmem:[%s9638_s3 + $0x364] ss:$16 sps:$4 sm:$0xff]  }
  0x64   : > { %3321 = vmatpush1.bf16.msra.mxu0 %v6879_v48  ;;  %3836 = vmatpush1.bf16.msra.mxu1 %v6882_v50  ;;  %v6974_v48 = vld [vmem:[%s9638_s3 + $0x34c] ss:$16 sps:$4 sm:$0xff]   ;;  %v6972_v50 = vld [vmem:[%s9638_s3 + $0x348] ss:$16 sps:$4 sm:$0xff]  }
  0x65   : > { %3322 = vmatprep.subr.bf16.mxu0 %v6887_v53  ;;  %3837 = vmatprep.subr.bf16.mxu1 %v6890_v55  ;;  %v6975_v53 = vld [vmem:[%s9638_s3 + $0x360] ss:$16 sps:$4 sm:$0xff]   ;;  %v6983_v55 = vld [vmem:[%s9638_s3 + $0x384] ss:$16 sps:$4 sm:$0xff]  }
  0x66   : > { %830 = vmatmul.mubr.bf16.gmra.mrb[24].mxu0 %v6791_v25  ;;  %1003 = vmatmul.mubr.bf16.gmra.mrb[24].mxu1 %v6791_v25  ;;  %v6936_v25 = vld [vmem:[%s9638_s3 + $0x288] ss:$16 sps:$4 sm:$0xff]  }
  0x67   : > { %5778 = vmatprep.mubr.msk.bf16.mxu0 %vm694_vm0, %v6792_v26  ;;  %5792 = vmatprep.mubr.msk.bf16.mxu1 %vm694_vm0, %v6792_v26  ;;  %v7998_v26 = vshrl.u32 %v348_v21, 7 }
  0x68   : > { %3323 = vmatpush1.bf16.msra.mxu0 %v6885_v52  ;;  %3838 = vmatpush1.bf16.msra.mxu1 %v6888_v54  ;;  %v6980_v52 = vld [vmem:[%s9638_s3 + $0x36c] ss:$16 sps:$4 sm:$0xff]   ;;  %v6978_v54 = vld [vmem:[%s9638_s3 + $0x368] ss:$16 sps:$4 sm:$0xff]  }
  0x69   : > { %3324 = vmatprep.subr.bf16.mxu0 %v6893_v57  ;;  %3839 = vmatprep.subr.bf16.mxu1 %v6896_v59  ;;  %v6981_v57 = vld [vmem:[%s9638_s3 + $0x380] ss:$16 sps:$4 sm:$0xff]   ;;  %v6989_v59 = vld [vmem:[%s9638_s3 + $0x3a4] ss:$16 sps:$4 sm:$0xff]  }
  0x6c   : > { %3325 = vmatpush1.bf16.msra.mxu0 %v6891_v56  ;;  %3840 = vmatpush1.bf16.msra.mxu1 %v6894_v58  ;;  %v6986_v56 = vld [vmem:[%s9638_s3 + $0x38c] ss:$16 sps:$4 sm:$0xff]   ;;  %v6984_v58 = vld [vmem:[%s9638_s3 + $0x388] ss:$16 sps:$4 sm:$0xff]  }
  0x6d   : > { %3326 = vmatprep.subr.bf16.mxu0 %v6899_v60  ;;  %3841 = vmatprep.subr.bf16.mxu1 %v6902_v61  ;;  %v6992_v60 = vld [vmem:[%s9638_s3 + $0x3ac] ss:$16 sps:$4 sm:$0xff]   ;;  %v6987_v61 = vld [vmem:[%s9638_s3 + $0x3a0] ss:$16 sps:$4 sm:$0xff]  }
  0x6e   : > { %840 = vmatmul.mubr.bf16.gmra.mrb[28].mxu0 %v6794_v27  ;;  %1013 = vmatmul.mubr.bf16.gmra.mrb[28].mxu1 %v6794_v27  ;;  %v6941_v27 = vld [vmem:[%s9638_s3 + $0x2a4] ss:$16 sps:$4 sm:$0xff]  }
  0x6f   : > { %5779 = vmatprep.mubr.msk.bf16.mxu0 %vm694_vm0, %v6795_v28  ;;  %5793 = vmatprep.mubr.msk.bf16.mxu1 %vm694_vm0, %v6795_v28  ;;  %v6944_v28 = vld [vmem:[%s9638_s3 + $0x2ac] ss:$16 sps:$4 sm:$0xff]  }
  0x70   : > { %3327 = vmatpush1.bf16.msra.mxu0 %v6897_v62  ;;  %3842 = vmatpush1.bf16.msra.mxu1 %v6900_v63  ;;  %v6990_v62 = vld [vmem:[%s9638_s3 + $0x3a8] ss:$16 sps:$4 sm:$0xff]   ;;  %v6995_v63 = vld [vmem:[%s9638_s3 + $0x3c4] ss:$16 sps:$4 sm:$0xff]  }
  0x71   : > { %3328 = vmatprep.subr.bf16.mxu0 %v6905_v1  ;;  %3843 = vmatprep.subr.bf16.mxu1 %v6908_v3  ;;  %v6993_v1 = vld [vmem:[%s9638_s3 + $0x3c0] ss:$16 sps:$4 sm:$0xff]   ;;  %v7001_v3 = vld [vmem:[%s9638_s3 + $0x3e4] ss:$16 sps:$4 sm:$0xff]  }
  0x74   : > { %3329 = vmatpush1.bf16.msra.mxu0 %v6903_v0  ;;  %3844 = vmatpush1.bf16.msra.mxu1 %v6906_v2  ;;  %v6998_v0 = vld [vmem:[%s9638_s3 + $0x3cc] ss:$16 sps:$4 sm:$0xff]   ;;  %v6996_v2 = vld [vmem:[%s9638_s3 + $0x3c8] ss:$16 sps:$4 sm:$0xff]  }
  0x75   : > { %3401 = vmatprep.subr.bf16.mxu0 %v6911_v4  ;;  %3916 = vmatprep.subr.bf16.mxu1 %v6914_v5  ;;  %v7004_v4 = vld [vmem:[%s9638_s3 + $0x3ec] ss:$16 sps:$4 sm:$0xff]   ;;  %v6999_v5 = vld [vmem:[%s9638_s3 + $0x3e0] ss:$16 sps:$4 sm:$0xff]  }
  0x76   : > { %850 = vmatmul.mubr.bf16.gmra.mrb[32].mxu0 %v6797_v29  ;;  %1023 = vmatmul.mubr.bf16.gmra.mrb[32].mxu1 %v6797_v29  ;;  %v6939_v29 = vld [vmem:[%s9638_s3 + $0x2a0] ss:$16 sps:$4 sm:$0xff]  }
  0x77   : > { %5780 = vmatprep.mubr.msk.bf16.mxu0 %vm694_vm0, %v6798_v30  ;;  %5794 = vmatprep.mubr.msk.bf16.mxu1 %vm694_vm0, %v6798_v30  ;;  %v6942_v30 = vld [vmem:[%s9638_s3 + $0x2a8] ss:$16 sps:$4 sm:$0xff]  }
  0x7e   : > { %860 = vmatmul.mubr.bf16.gmra.mrb[36].mxu0 %v6800_v31  ;;  %1033 = vmatmul.mubr.bf16.gmra.mrb[36].mxu1 %v6800_v31  ;;  %v6947_v31 = vld [vmem:[%s9638_s3 + $0x2c4] ss:$16 sps:$4 sm:$0xff]  }
  0x7f   : > { %5781 = vmatprep.mubr.msk.bf16.mxu0 %vm694_vm0, %v6801_v32  ;;  %5795 = vmatprep.mubr.msk.bf16.mxu1 %vm694_vm0, %v6801_v32  ;;  %v6950_v32 = vld [vmem:[%s9638_s3 + $0x2cc] ss:$16 sps:$4 sm:$0xff]  }
  0x86   : > { %870 = vmatmul.mubr.bf16.gmra.mrb[40].mxu0 %v6803_v33  ;;  %1043 = vmatmul.mubr.bf16.gmra.mrb[40].mxu1 %v6803_v33  ;;  %v6945_v33 = vld [vmem:[%s9638_s3 + $0x2c0] ss:$16 sps:$4 sm:$0xff]  }
  0x87   : > { %5782 = vmatprep.mubr.msk.bf16.mxu0 %vm694_vm0, %v6804_v34  ;;  %5796 = vmatprep.mubr.msk.bf16.mxu1 %vm694_vm0, %v6804_v34  ;;  %v6948_v34 = vld [vmem:[%s9638_s3 + $0x2c8] ss:$16 sps:$4 sm:$0xff]  }
  0x8e   : > { %880 = vmatmul.mubr.bf16.gmra.mrb[44].mxu0 %v6806_v35  ;;  %1053 = vmatmul.mubr.bf16.gmra.mrb[44].mxu1 %v6806_v35  ;;  %v6953_v35 = vld [vmem:[%s9638_s3 + $0x2e4] ss:$16 sps:$4 sm:$0xff]  }
  0x8f   : > { %5783 = vmatprep.mubr.msk.bf16.mxu0 %vm694_vm0, %v6807_v36  ;;  %5797 = vmatprep.mubr.msk.bf16.mxu1 %vm694_vm0, %v6807_v36  ;;  %v6956_v36 = vld [vmem:[%s9638_s3 + $0x2ec] ss:$16 sps:$4 sm:$0xff]  }
  0x96   : > { %890 = vmatmul.mubr.bf16.gmra.mrb[48].mxu0 %v6809_v37  ;;  %1063 = vmatmul.mubr.bf16.gmra.mrb[48].mxu1 %v6809_v37  ;;  %v6951_v37 = vld [vmem:[%s9638_s3 + $0x2e0] ss:$16 sps:$4 sm:$0xff]  }
  0x97   : > { %5784 = vmatprep.mubr.msk.bf16.mxu0 %vm694_vm0, %v6810_v38  ;;  %5798 = vmatprep.mubr.msk.bf16.mxu1 %vm694_vm0, %v6810_v38  ;;  %v6954_v38 = vld [vmem:[%s9638_s3 + $0x2e8] ss:$16 sps:$4 sm:$0xff]  }
  0x9e   : > { %900 = vmatmul.mubr.bf16.gmra.mrb[52].mxu0 %v6812_v43  ;;  %1073 = vmatmul.mubr.bf16.gmra.mrb[52].mxu1 %v6812_v43  ;;  %v6965_v43 = vld [vmem:[%s9638_s3 + $0x324] ss:$16 sps:$4 sm:$0xff]  }
  0x9f   : > { %3330 = vmatprep.mubr.bf16.mxu0 %v7469_v8  ;;  %3845 = vmatprep.mubr.bf16.mxu1 %v7469_v8 }
  0xa6   : > { %3331 = vmatmul.mubr.bf16.vlgmr.msra.gmra.mrb[56].mxu0 %v7469_v8  ;;  %3846 = vmatmul.mubr.bf16.vlgmr.msra.gmra.mrb[56].mxu1 %v7469_v8 }
  0xa7   : > { %3402 = vmatpush1.bf16.msra.mxu0 %v6909_v6  ;;  %3917 = vmatpush1.bf16.msra.mxu1 %v6912_v7  ;;  %v7002_v6 = vld [vmem:[%s9638_s3 + $0x3e8] ss:$16 sps:$4 sm:$0xff]   ;;  %v350_v7 = vsub.s32 0, %v7998_v26 }
  0xa8   : > { %3403 = vmatprep.subr.bf16.mxu0 %v6917_v9  ;;  %3918 = vmatprep.subr.bf16.mxu1 %v6920_v10  ;;  %v358_v9 = vsub.s32 2, %v7998_v26  ;;  %v354_v10 = vsub.s32 1, %v7998_v26 }
  0xab   : > { %3404 = vmatpush1.bf16.msra.mxu0 %v6915_v11  ;;  %3919 = vmatpush1.bf16.msra.mxu1 %v6918_v12  ;;  %v362_v11 = vsub.s32 3, %v7998_v26  ;;  %v7007_v12 = vld [vmem:[%s9638_s3 + $0x404] ss:$16 sps:$4 sm:$0xff]  }
  0xac   : > { %3405 = vmatprep.subr.bf16.mxu0 %v6923_v13  ;;  %3920 = vmatprep.subr.bf16.mxu1 %v6926_v14  ;;  %v7010_v13 = vld [vmem:[%s9638_s3 + $0x40c] ss:$16 sps:$4 sm:$0xff]   ;;  %v346_v14 = vld [vmem:[%s9637_s2] sm:$0xf] }
  0xaf   : > { %3406 = vmatpush1.bf16.msra.mxu0 %v6921_v15  ;;  %3921 = vmatpush1.bf16.msra.mxu1 %v6924_v16  ;;  %v8147_v15 = vrot.slane %v346_v14, %v350_v7  ;;  %v8151_v16 = vrot.slane %v346_v14, %v358_v9 }
  0xb0   : > { %3407 = vmatprep.subr.bf16.mxu0 %v6929_v17  ;;  %3922 = vmatprep.subr.bf16.mxu1 %v6932_v18  ;;  %v8155_v17 = vrot.slane %v346_v14, %v354_v10  ;;  %v8159_v18 = vrot.slane %v346_v14, %v362_v11 }
  0xb3   : > { %3408 = vmatpush1.bf16.msra.mxu0 %v6927_v19  ;;  %3923 = vmatpush1.bf16.msra.mxu1 %v6930_v20 }
  0xb4   : > { %3409 = vmatprep.subr.bf16.mxu0 %v6935_v22  ;;  %3924 = vmatprep.subr.bf16.mxu1 %v6938_v23 }
  0xb7   : > { %3410 = vmatpush1.bf16.msra.mxu0 %v6933_v24  ;;  %3925 = vmatpush1.bf16.msra.mxu1 %v6936_v25 }
  0xb8   : > { %3411 = vmatprep.subr.bf16.mxu0 %v6941_v27  ;;  %3926 = vmatprep.subr.bf16.mxu1 %v6944_v28 }
  0xbb   : > { %3412 = vmatpush1.bf16.msra.mxu0 %v6939_v29  ;;  %3927 = vmatpush1.bf16.msra.mxu1 %v6942_v30 }
  0xbc   : > { %3413 = vmatprep.subr.bf16.mxu0 %v6947_v31  ;;  %3928 = vmatprep.subr.bf16.mxu1 %v6950_v32 }
  0xbf   : > { %3414 = vmatpush1.bf16.msra.mxu0 %v6945_v33  ;;  %3929 = vmatpush1.bf16.msra.mxu1 %v6948_v34 }
  0xc0   : > { %3415 = vmatprep.subr.bf16.mxu0 %v6953_v35  ;;  %3930 = vmatprep.subr.bf16.mxu1 %v6956_v36 }
  0xc3   : > { %3416 = vmatpush1.bf16.msra.mxu0 %v6951_v37  ;;  %3931 = vmatpush1.bf16.msra.mxu1 %v6954_v38 }
  0xc4   : > { %3417 = vmatprep.subr.bf16.mxu0 %v6959_v39  ;;  %3932 = vmatprep.subr.bf16.mxu1 %v6962_v40 }
  0xc7   : > { %3418 = vmatpush1.bf16.msra.mxu0 %v6957_v41  ;;  %3933 = vmatpush1.bf16.msra.mxu1 %v6960_v42 }
  0xc8   : > { %3419 = vmatprep.subr.bf16.mxu0 %v6965_v43  ;;  %3934 = vmatprep.subr.bf16.mxu1 %v6968_v44 }
  0xcb   : > { %3420 = vmatpush1.bf16.msra.mxu0 %v6963_v45  ;;  %3935 = vmatpush1.bf16.msra.mxu1 %v6966_v46 }
  0xcc   : > { %3421 = vmatprep.subr.bf16.mxu0 %v6971_v47  ;;  %3936 = vmatprep.subr.bf16.mxu1 %v6974_v48 }
  0xcf   : > { %3422 = vmatpush1.bf16.msra.mxu0 %v6969_v49  ;;  %3937 = vmatpush1.bf16.msra.mxu1 %v6972_v50 }
  0xd0   : > { %3423 = vmatprep.subr.bf16.mxu0 %v6977_v51  ;;  %3938 = vmatprep.subr.bf16.mxu1 %v6980_v52 }
  0xd3   : > { %3424 = vmatpush1.bf16.msra.mxu0 %v6975_v53  ;;  %3939 = vmatpush1.bf16.msra.mxu1 %v6978_v54 }
  0xd4   : > { %3425 = vmatprep.subr.bf16.mxu0 %v6983_v55  ;;  %3940 = vmatprep.subr.bf16.mxu1 %v6986_v56 }
  0xd7   : > { %3426 = vmatpush1.bf16.msra.mxu0 %v6981_v57  ;;  %3941 = vmatpush1.bf16.msra.mxu1 %v6984_v58 }
  0xd8   : > { %3427 = vmatprep.subr.bf16.mxu0 %v6989_v59  ;;  %3942 = vmatprep.subr.bf16.mxu1 %v6992_v60 }
  0xdb   : > { %3428 = vmatpush1.bf16.msra.mxu0 %v6987_v61  ;;  %3943 = vmatpush1.bf16.msra.mxu1 %v6990_v62 }
  0xdc   : > { %3429 = vmatprep.subr.bf16.mxu0 %v6995_v63  ;;  %3944 = vmatprep.subr.bf16.mxu1 %v6998_v0 }
  0xdf   : > { %3430 = vmatpush1.bf16.msra.mxu0 %v6993_v1  ;;  %3945 = vmatpush1.bf16.msra.mxu1 %v6996_v2 }
  0xe0   : > { %3431 = vmatprep.subr.bf16.mxu0 %v7001_v3  ;;  %3946 = vmatprep.subr.bf16.mxu1 %v7004_v4 }
  0xe3   : > { %3432 = vmatpush1.bf16.msra.mxu0 %v6999_v5  ;;  %3947 = vmatpush1.bf16.msra.mxu1 %v7002_v6 }
  0xe4   : > { %3504 = vmatprep.subr.bf16.mxu0 %v7007_v12  ;;  %4019 = vmatprep.subr.bf16.mxu1 %v7010_v13 }
 0x109   : > { %v771_v19 = vpop.f32.mrb[0].mxu0  ;;  %v944_v20 = vpop.f32.mrb[0].mxu1 }
 0x10a   : > { %v772_v21 = vadd.f32 %v771_v19, %v8147_v15  ;;  %v945_v22 = vadd.f32 %v944_v20, %v8151_v16  ;;  %v773_v23 = vpop.f32.mrb[1].mxu0  ;;  %v946_v24 = vpop.f32.mrb[1].mxu1 }
 0x10b   : > { %v774_v25 = vadd.f32 %v773_v23, %v8155_v17  ;;  %v947_v27 = vadd.f32 %v946_v24, %v8159_v18  ;;  %v775_v28 = vpop.f32.mrb[2].mxu0  ;;  %v948_v29 = vpop.f32.mrb[2].mxu1 }
 0x10c   : > { %v1083_v30 = vmax.f32 %v772_v21, 0.0  ;;  %v1085_v31 = vmax.f32 %v945_v22, 0.0  ;;  %v776_v32 = vadd.f32 %v775_v28, %v8147_v15  ;;  %v949_v33 = vadd.f32 %v948_v29, %v8151_v16  ;;  %v777_v34 = vpop.f32.mrb[3].mxu0  ;;  %v950_v35 = vpop.f32.mrb[3].mxu1 }
 0x10d   : > { %v1084_v36 = vmax.f32 %v774_v25, 0.0  ;;  %v1086_v37 = vmax.f32 %v947_v27, 0.0  ;;  %v778_v38 = vadd.f32 %v777_v34, %v8155_v17  ;;  %v951_v39 = vadd.f32 %v950_v35, %v8159_v18 }
 0x10e   : > { %v8169_v40 = vmax.f32 %v1083_v30, %v1085_v31  ;;  %v1087_v41 = vmax.f32 %v776_v32, 0.0  ;;  %v1089_v42 = vmax.f32 %v949_v33, 0.0 }
 0x10f   : > { %v8171_v43 = vmax.f32 %v1084_v36, %v1086_v37  ;;  %v1088_v44 = vmax.f32 %v778_v38, 0.0  ;;  %v1090_v45 = vmax.f32 %v951_v39, 0.0 }
 0x110   : > { %v8173_v46 = vmax.f32 %v1087_v41, %v1089_v42 }
 0x111   : > { %v8175_v47 = vmax.f32 %v1088_v44, %v1090_v45  ;;  %v781_v48 = vpop.f32.mrb[4].mxu0  ;;  %v954_v49 = vpop.f32.mrb[4].mxu1 }
 0x112   : > { %v782_v50 = vadd.f32 %v781_v48, %v8147_v15  ;;  %v955_v51 = vadd.f32 %v954_v49, %v8151_v16  ;;  %v783_v52 = vpop.f32.mrb[5].mxu0  ;;  %v956_v53 = vpop.f32.mrb[5].mxu1 }
 0x113   : > { %v784_v54 = vadd.f32 %v783_v52, %v8155_v17  ;;  %v957_v55 = vadd.f32 %v956_v53, %v8159_v18  ;;  %v785_v56 = vpop.f32.mrb[6].mxu0  ;;  %v958_v57 = vpop.f32.mrb[6].mxu1 }
 0x114   : > { %v1091_v58 = vmax.f32 %v782_v50, 0.0  ;;  %v1093_v59 = vmax.f32 %v955_v51, 0.0  ;;  %v786_v60 = vadd.f32 %v785_v56, %v8147_v15  ;;  %v959_v61 = vadd.f32 %v958_v57, %v8151_v16  ;;  %v787_v62 = vpop.f32.mrb[7].mxu0  ;;  %v960_v63 = vpop.f32.mrb[7].mxu1 }
 0x115   : > { %v1092_v0 = vmax.f32 %v784_v54, 0.0  ;;  %v1094_v1 = vmax.f32 %v957_v55, 0.0  ;;  %v788_v2 = vadd.f32 %v787_v62, %v8155_v17  ;;  %v961_v3 = vadd.f32 %v960_v63, %v8159_v18 }
 0x116   : > { %v8185_v4 = vmax.f32 %v1091_v58, %v1093_v59  ;;  %v1095_v5 = vmax.f32 %v786_v60, 0.0  ;;  %v1097_v6 = vmax.f32 %v959_v61, 0.0 }
 0x117   : > { %v8187_v12 = vmax.f32 %v1092_v0, %v1094_v1  ;;  %v1096_v13 = vmax.f32 %v788_v2, 0.0  ;;  %v1098_v14 = vmax.f32 %v961_v3, 0.0 }
 0x118   : > { %v8189_v19 = vmax.f32 %v1095_v5, %v1097_v6 }
 0x119   : > { %v8191_v20 = vmax.f32 %v1096_v13, %v1098_v14  ;;  %v791_v21 = vpop.f32.mrb[8].mxu0  ;;  %v964_v22 = vpop.f32.mrb[8].mxu1 }
 0x11a   : > { %v792_v23 = vadd.f32 %v791_v21, %v8147_v15  ;;  %v965_v24 = vadd.f32 %v964_v22, %v8151_v16  ;;  %v793_v25 = vpop.f32.mrb[9].mxu0  ;;  %v966_v27 = vpop.f32.mrb[9].mxu1 }
 0x11b   : > { %v794_v28 = vadd.f32 %v793_v25, %v8155_v17  ;;  %v967_v29 = vadd.f32 %v966_v27, %v8159_v18  ;;  %v795_v30 = vpop.f32.mrb[10].mxu0  ;;  %v968_v31 = vpop.f32.mrb[10].mxu1 }
 0x11c   : > { %v1099_v32 = vmax.f32 %v792_v23, 0.0  ;;  %v1101_v33 = vmax.f32 %v965_v24, 0.0  ;;  %v796_v34 = vadd.f32 %v795_v30, %v8147_v15  ;;  %v969_v35 = vadd.f32 %v968_v31, %v8151_v16  ;;  %v797_v36 = vpop.f32.mrb[11].mxu0  ;;  %v970_v37 = vpop.f32.mrb[11].mxu1 }
 0x11d   : > { %v1100_v38 = vmax.f32 %v794_v28, 0.0  ;;  %v1102_v39 = vmax.f32 %v967_v29, 0.0  ;;  %v798_v41 = vadd.f32 %v797_v36, %v8155_v17  ;;  %v971_v42 = vadd.f32 %v970_v37, %v8159_v18 }
 0x11e   : > { %v8201_v44 = vmax.f32 %v1099_v32, %v1101_v33  ;;  %v1103_v45 = vmax.f32 %v796_v34, 0.0  ;;  %v1105_v48 = vmax.f32 %v969_v35, 0.0 }
 0x11f   : > { %v8203_v49 = vmax.f32 %v1100_v38, %v1102_v39  ;;  %v1104_v50 = vmax.f32 %v798_v41, 0.0  ;;  %v1106_v51 = vmax.f32 %v971_v42, 0.0 }
 0x120   : > { %v8205_v52 = vmax.f32 %v1103_v45, %v1105_v48 }
 0x121   : > { %v8207_v53 = vmax.f32 %v1104_v50, %v1106_v51  ;;  %v801_v54 = vpop.f32.mrb[12].mxu0  ;;  %v974_v55 = vpop.f32.mrb[12].mxu1 }
 0x122   : > { %v802_v56 = vadd.f32 %v801_v54, %v8147_v15  ;;  %v975_v57 = vadd.f32 %v974_v55, %v8151_v16  ;;  %v803_v58 = vpop.f32.mrb[13].mxu0  ;;  %v976_v59 = vpop.f32.mrb[13].mxu1 }
 0x123   : > { %v804_v60 = vadd.f32 %v803_v58, %v8155_v17  ;;  %v977_v61 = vadd.f32 %v976_v59, %v8159_v18  ;;  %v805_v62 = vpop.f32.mrb[14].mxu0  ;;  %v978_v63 = vpop.f32.mrb[14].mxu1 }
 0x124   : > { %v1107_v0 = vmax.f32 %v802_v56, 0.0  ;;  %v1109_v1 = vmax.f32 %v975_v57, 0.0  ;;  %v806_v2 = vadd.f32 %v805_v62, %v8147_v15  ;;  %v979_v3 = vadd.f32 %v978_v63, %v8151_v16  ;;  %v807_v5 = vpop.f32.mrb[15].mxu0  ;;  %v980_v6 = vpop.f32.mrb[15].mxu1 }
 0x125   : > { %v1108_v13 = vmax.f32 %v804_v60, 0.0  ;;  %v1110_v14 = vmax.f32 %v977_v61, 0.0  ;;  %v808_v21 = vadd.f32 %v807_v5, %v8155_v17  ;;  %v981_v22 = vadd.f32 %v980_v6, %v8159_v18 }
 0x126   : > { %v8217_v23 = vmax.f32 %v1107_v0, %v1109_v1  ;;  %v1111_v24 = vmax.f32 %v806_v2, 0.0  ;;  %v1113_v25 = vmax.f32 %v979_v3, 0.0 }
 0x127   : > { %v8219_v27 = vmax.f32 %v1108_v13, %v1110_v14  ;;  %v1112_v28 = vmax.f32 %v808_v21, 0.0  ;;  %v1114_v29 = vmax.f32 %v981_v22, 0.0 }
 0x128   : > { %v8221_v30 = vmax.f32 %v1111_v24, %v1113_v25 }
 0x129   : > { %v8223_v31 = vmax.f32 %v1112_v28, %v1114_v29  ;;  %v811_v32 = vpop.f32.mrb[16].mxu0  ;;  %v984_v33 = vpop.f32.mrb[16].mxu1 }
 0x12a   : > { %v812_v34 = vadd.f32 %v811_v32, %v8147_v15  ;;  %v985_v35 = vadd.f32 %v984_v33, %v8151_v16  ;;  %v813_v36 = vpop.f32.mrb[17].mxu0  ;;  %v986_v37 = vpop.f32.mrb[17].mxu1 }
 0x12b   : > { %v814_v38 = vadd.f32 %v813_v36, %v8155_v17  ;;  %v987_v39 = vadd.f32 %v986_v37, %v8159_v18  ;;  %v815_v41 = vpop.f32.mrb[18].mxu0  ;;  %v988_v42 = vpop.f32.mrb[18].mxu1 }
 0x12c   : > { %v1115_v45 = vmax.f32 %v812_v34, 0.0  ;;  %v1117_v48 = vmax.f32 %v985_v35, 0.0  ;;  %v816_v50 = vadd.f32 %v815_v41, %v8147_v15  ;;  %v989_v51 = vadd.f32 %v988_v42, %v8151_v16  ;;  %v817_v54 = vpop.f32.mrb[19].mxu0  ;;  %v990_v55 = vpop.f32.mrb[19].mxu1 }
 0x12d   : > { %v1116_v56 = vmax.f32 %v814_v38, 0.0  ;;  %v1118_v57 = vmax.f32 %v987_v39, 0.0  ;;  %v818_v58 = vadd.f32 %v817_v54, %v8155_v17  ;;  %v991_v59 = vadd.f32 %v990_v55, %v8159_v18 }
 0x12e   : > { %v8233_v60 = vmax.f32 %v1115_v45, %v1117_v48  ;;  %v1119_v61 = vmax.f32 %v816_v50, 0.0  ;;  %v1121_v62 = vmax.f32 %v989_v51, 0.0 }
 0x12f   : > { %v8235_v63 = vmax.f32 %v1116_v56, %v1118_v57  ;;  %v1120_v0 = vmax.f32 %v818_v58, 0.0  ;;  %v1122_v1 = vmax.f32 %v991_v59, 0.0 }
 0x130   : > { %v8237_v2 = vmax.f32 %v1119_v61, %v1121_v62 }
 0x131   : > { %v8239_v3 = vmax.f32 %v1120_v0, %v1122_v1  ;;  %v821_v5 = vpop.f32.mrb[20].mxu0  ;;  %v994_v6 = vpop.f32.mrb[20].mxu1 }
 0x132   : > { %v822_v13 = vadd.f32 %v821_v5, %v8147_v15  ;;  %v995_v14 = vadd.f32 %v994_v6, %v8151_v16  ;;  %v823_v21 = vpop.f32.mrb[21].mxu0  ;;  %v996_v22 = vpop.f32.mrb[21].mxu1 }
 0x133   : > { %v824_v24 = vadd.f32 %v823_v21, %v8155_v17  ;;  %v997_v25 = vadd.f32 %v996_v22, %v8159_v18  ;;  %v825_v28 = vpop.f32.mrb[22].mxu0  ;;  %v998_v29 = vpop.f32.mrb[22].mxu1 }
 0x134   : > { %v1123_v32 = vmax.f32 %v822_v13, 0.0  ;;  %v1125_v33 = vmax.f32 %v995_v14, 0.0  ;;  %v826_v34 = vadd.f32 %v825_v28, %v8147_v15  ;;  %v999_v35 = vadd.f32 %v998_v29, %v8151_v16  ;;  %v827_v36 = vpop.f32.mrb[23].mxu0  ;;  %v1000_v37 = vpop.f32.mrb[23].mxu1 }
 0x135   : > { %v1124_v38 = vmax.f32 %v824_v24, 0.0  ;;  %v1126_v39 = vmax.f32 %v997_v25, 0.0  ;;  %v828_v41 = vadd.f32 %v827_v36, %v8155_v17  ;;  %v1001_v42 = vadd.f32 %v1000_v37, %v8159_v18 }
 0x136   : > { %v8249_v45 = vmax.f32 %v1123_v32, %v1125_v33  ;;  %v1127_v48 = vmax.f32 %v826_v34, 0.0  ;;  %v1129_v50 = vmax.f32 %v999_v35, 0.0 }
 0x137   : > { %v8251_v51 = vmax.f32 %v1124_v38, %v1126_v39  ;;  %v1128_v54 = vmax.f32 %v828_v41, 0.0  ;;  %v1130_v55 = vmax.f32 %v1001_v42, 0.0 }
 0x138   : > { %v8253_v56 = vmax.f32 %v1127_v48, %v1129_v50 }
 0x139   : > { %v8255_v57 = vmax.f32 %v1128_v54, %v1130_v55  ;;  %v831_v58 = vpop.f32.mrb[24].mxu0  ;;  %v1004_v59 = vpop.f32.mrb[24].mxu1 }
 0x13a   : > { %v832_v61 = vadd.f32 %v831_v58, %v8147_v15  ;;  %v1005_v62 = vadd.f32 %v1004_v59, %v8151_v16  ;;  %v833_v0 = vpop.f32.mrb[25].mxu0  ;;  %v1006_v1 = vpop.f32.mrb[25].mxu1 }
 0x13b   : > { %v834_v5 = vadd.f32 %v833_v0, %v8155_v17  ;;  %v1007_v6 = vadd.f32 %v1006_v1, %v8159_v18  ;;  %v835_v13 = vpop.f32.mrb[26].mxu0  ;;  %v1008_v14 = vpop.f32.mrb[26].mxu1 }
 0x13c   : > { %v1131_v21 = vmax.f32 %v832_v61, 0.0  ;;  %v1133_v22 = vmax.f32 %v1005_v62, 0.0  ;;  %v836_v24 = vadd.f32 %v835_v13, %v8147_v15  ;;  %v1009_v25 = vadd.f32 %v1008_v14, %v8151_v16  ;;  %v837_v28 = vpop.f32.mrb[27].mxu0  ;;  %v1010_v29 = vpop.f32.mrb[27].mxu1 }
 0x13d   : > { %v1132_v32 = vmax.f32 %v834_v5, 0.0  ;;  %v1134_v33 = vmax.f32 %v1007_v6, 0.0  ;;  %v838_v34 = vadd.f32 %v837_v28, %v8155_v17  ;;  %v1011_v35 = vadd.f32 %v1010_v29, %v8159_v18 }
 0x13e   : > { %v8265_v36 = vmax.f32 %v1131_v21, %v1133_v22  ;;  %v1135_v37 = vmax.f32 %v836_v24, 0.0  ;;  %v1137_v38 = vmax.f32 %v1009_v25, 0.0 }
 0x13f   : > { %v8267_v39 = vmax.f32 %v1132_v32, %v1134_v33  ;;  %v1136_v41 = vmax.f32 %v838_v34, 0.0  ;;  %v1138_v42 = vmax.f32 %v1011_v35, 0.0 }
 0x140   : > { %v8269_v48 = vmax.f32 %v1135_v37, %v1137_v38 }
 0x141   : > { %v8271_v50 = vmax.f32 %v1136_v41, %v1138_v42  ;;  %v841_v54 = vpop.f32.mrb[28].mxu0  ;;  %v1014_v55 = vpop.f32.mrb[28].mxu1 }
 0x142   : > { %v842_v58 = vadd.f32 %v841_v54, %v8147_v15  ;;  %v1015_v59 = vadd.f32 %v1014_v55, %v8151_v16  ;;  %v843_v61 = vpop.f32.mrb[29].mxu0  ;;  %v1016_v62 = vpop.f32.mrb[29].mxu1 }
 0x143   : > { %v844_v0 = vadd.f32 %v843_v61, %v8155_v17  ;;  %v1017_v1 = vadd.f32 %v1016_v62, %v8159_v18  ;;  %v845_v5 = vpop.f32.mrb[30].mxu0  ;;  %v1018_v6 = vpop.f32.mrb[30].mxu1 }
 0x144   : > { %v1139_v13 = vmax.f32 %v842_v58, 0.0  ;;  %v1141_v14 = vmax.f32 %v1015_v59, 0.0  ;;  %v846_v21 = vadd.f32 %v845_v5, %v8147_v15  ;;  %v1019_v22 = vadd.f32 %v1018_v6, %v8151_v16  ;;  %v847_v24 = vpop.f32.mrb[31].mxu0  ;;  %v1020_v25 = vpop.f32.mrb[31].mxu1 }
 0x145   : > { %v1140_v28 = vmax.f32 %v844_v0, 0.0  ;;  %v1142_v29 = vmax.f32 %v1017_v1, 0.0  ;;  %v848_v32 = vadd.f32 %v847_v24, %v8155_v17  ;;  %v1021_v33 = vadd.f32 %v1020_v25, %v8159_v18 }
 0x146   : > { %v1223_v34 = vmax.f32 %v1139_v13, %v1141_v14  ;;  %v1143_v35 = vmax.f32 %v846_v21, 0.0  ;;  %v1145_v37 = vmax.f32 %v1019_v22, 0.0 }
 0x147   : > { %v1224_v38 = vmax.f32 %v1140_v28, %v1142_v29  ;;  %v1144_v41 = vmax.f32 %v848_v32, 0.0  ;;  %v1146_v42 = vmax.f32 %v1021_v33, 0.0 }
 0x148   : > { %v1251_v54 = vmax.f32 %v8169_v40, %v1223_v34  ;;  %v1225_v55 = vmax.f32 %v1143_v35, %v1145_v37 }
 0x149   : > { %v1252_v58 = vmax.f32 %v8171_v43, %v1224_v38  ;;  %v1226_v59 = vmax.f32 %v1144_v41, %v1146_v42  ;;  %v851_v61 = vpop.f32.mrb[32].mxu0  ;;  %v1024_v62 = vpop.f32.mrb[32].mxu1 }
 0x14a   : > { %v1253_v0 = vmax.f32 %v8173_v46, %v1225_v55  ;;  %v852_v1 = vadd.f32 %v851_v61, %v8147_v15  ;;  %v1025_v5 = vadd.f32 %v1024_v62, %v8151_v16  ;;  %v853_v6 = vpop.f32.mrb[33].mxu0  ;;  %v1026_v13 = vpop.f32.mrb[33].mxu1 }
 0x14b   : > { %v1254_v14 = vmax.f32 %v8175_v47, %v1226_v59  ;;  %v854_v21 = vadd.f32 %v853_v6, %v8155_v17  ;;  %v1027_v40 = vadd.f32 %v1026_v13, %v8159_v18  ;;  %v855_v22 = vpop.f32.mrb[34].mxu0  ;;  %v1028_v24 = vpop.f32.mrb[34].mxu1 }
 0x14c   : > { %v8289_v43 = vpack.c.bf16 %v1253_v0, %v1251_v54  ;;  %v1147_v25 = vmax.f32 %v852_v1, 0.0  ;;  %v1149_v28 = vmax.f32 %v1025_v5, 0.0  ;;  %v856_v46 = vadd.f32 %v855_v22, %v8147_v15  ;;  %v857_v29 = vpop.f32.mrb[35].mxu0  ;;  %v1030_v32 = vpop.f32.mrb[35].mxu1 }
 0x14d   : > { %v8292_v33 = vpack.c.bf16 %v1254_v14, %v1252_v58  ;;  %v1148_v34 = vmax.f32 %v854_v21, 0.0  ;;  %v1150_v35 = vmax.f32 %v1027_v40, 0.0  ;;  %v1029_v47 = vadd.f32 %v1028_v24, %v8151_v16 }
 0x14e   : > { %v1227_v37 = vmax.f32 %v1147_v25, %v1149_v28  ;;  %v1151_v38 = vmax.f32 %v856_v46, 0.0  ;;  %v858_v41 = vadd.f32 %v857_v29, %v8155_v17  ;;  %v1031_v42 = vadd.f32 %v1030_v32, %v8159_v18 }
 0x14f   : > { %v1228_v54 = vmax.f32 %v1148_v34, %v1150_v35  ;;  %v1153_v55 = vmax.f32 %v1029_v47, 0.0  ;;  %3340 = vmatprep.mubr.bf16.mxu0 %v8292_v33  ;;  %3855 = vmatprep.mubr.bf16.mxu1 %v8292_v33 }
 0x150   : > { %v1255_v59 = vmax.f32 %v8185_v4, %v1227_v37  ;;  %v1152_v58 = vmax.f32 %v858_v41, 0.0  ;;  %v1154_v61 = vmax.f32 %v1031_v42, 0.0  ;;  %3341 = vmatmul.mubr.bf16.gmra.mrb[60].mxu0 %v8289_v43  ;;  %3856 = vmatmul.mubr.bf16.gmra.mrb[60].mxu1 %v8289_v43 }
 0x151   : > { %v1256_v62 = vmax.f32 %v8187_v12, %v1228_v54  ;;  %v1229_v0 = vmax.f32 %v1151_v38, %v1153_v55  ;;  %v861_v1 = vpop.f32.mrb[36].mxu0  ;;  %v1034_v5 = vpop.f32.mrb[36].mxu1 }
 0x152   : > { %v1230_v6 = vmax.f32 %v1152_v58, %v1154_v61  ;;  %v862_v13 = vadd.f32 %v861_v1, %v8147_v15  ;;  %v1035_v14 = vadd.f32 %v1034_v5, %v8151_v16  ;;  %v863_v21 = vpop.f32.mrb[37].mxu0  ;;  %v1036_v40 = vpop.f32.mrb[37].mxu1 }
 0x153   : > { %v1257_v4 = vmax.f32 %v8189_v19, %v1229_v0  ;;  %v864_v22 = vadd.f32 %v863_v21, %v8155_v17  ;;  %v1037_v24 = vadd.f32 %v1036_v40, %v8159_v18  ;;  %v865_v25 = vpop.f32.mrb[38].mxu0  ;;  %v1038_v28 = vpop.f32.mrb[38].mxu1 }
 0x154   : > { %v1258_v12 = vmax.f32 %v8191_v20, %v1230_v6  ;;  %v1155_v46 = vmax.f32 %v862_v13, 0.0  ;;  %v1157_v29 = vmax.f32 %v1035_v14, 0.0  ;;  %v866_v32 = vadd.f32 %v865_v25, %v8147_v15  ;;  %v867_v34 = vpop.f32.mrb[39].mxu0  ;;  %v1040_v35 = vpop.f32.mrb[39].mxu1 }
 0x155   : > { %v8310_v47 = vpack.c.bf16 %v1257_v4, %v1255_v59  ;;  %v1156_v37 = vmax.f32 %v864_v22, 0.0  ;;  %v1158_v38 = vmax.f32 %v1037_v24, 0.0  ;;  %v1039_v19 = vadd.f32 %v1038_v28, %v8151_v16 }
 0x156   : > { %v8313_v41 = vpack.c.bf16 %v1258_v12, %v1256_v62  ;;  %v1231_v42 = vmax.f32 %v1155_v46, %v1157_v29  ;;  %v1159_v54 = vmax.f32 %v866_v32, 0.0  ;;  %v868_v55 = vadd.f32 %v867_v34, %v8155_v17 }
 0x157   : > { %v1232_v58 = vmax.f32 %v1156_v37, %v1158_v38  ;;  %v1161_v20 = vmax.f32 %v1039_v19, 0.0  ;;  %v1041_v61 = vadd.f32 %v1040_v35, %v8159_v18 }
 0x158   : > { %v1259_v0 = vmax.f32 %v8201_v44, %v1231_v42  ;;  %v1160_v1 = vmax.f32 %v868_v55, 0.0  ;;  %3350 = vmatprep.mubr.bf16.mxu0 %v8313_v41  ;;  %3865 = vmatprep.mubr.bf16.mxu1 %v8313_v41 }
 0x159   : > { %v1260_v59 = vmax.f32 %v8203_v49, %v1232_v58  ;;  %v1233_v5 = vmax.f32 %v1159_v54, %v1161_v20  ;;  %v1162_v62 = vmax.f32 %v1041_v61, 0.0  ;;  %3351 = vmatmul.mubr.bf16.gmra.mrb[64].mxu0 %v8310_v47  ;;  %3866 = vmatmul.mubr.bf16.gmra.mrb[64].mxu1 %v8310_v47  ;;  %v871_v6 = vpop.f32.mrb[40].mxu0  ;;  %v1044_v13 = vpop.f32.mrb[40].mxu1 }
 0x15a   : > { %v872_v14 = vadd.f32 %v871_v6, %v8147_v15  ;;  %v1045_v21 = vadd.f32 %v1044_v13, %v8151_v16  ;;  %v873_v44 = vpop.f32.mrb[41].mxu0  ;;  %v1046_v40 = vpop.f32.mrb[41].mxu1 }
 0x15b   : > { %v1261_v4 = vmax.f32 %v8205_v52, %v1233_v5  ;;  %v1234_v22 = vmax.f32 %v1160_v1, %v1162_v62  ;;  %v874_v24 = vadd.f32 %v873_v44, %v8155_v17  ;;  %v1047_v49 = vadd.f32 %v1046_v40, %v8159_v18  ;;  %v875_v25 = vpop.f32.mrb[42].mxu0  ;;  %v1048_v28 = vpop.f32.mrb[42].mxu1 }
 0x15c   : > { %v1163_v12 = vmax.f32 %v872_v14, 0.0  ;;  %v1165_v46 = vmax.f32 %v1045_v21, 0.0  ;;  %v876_v29 = vadd.f32 %v875_v25, %v8147_v15  ;;  %v1049_v32 = vadd.f32 %v1048_v28, %v8151_v16  ;;  %v877_v34 = vpop.f32.mrb[43].mxu0  ;;  %v1050_v35 = vpop.f32.mrb[43].mxu1 }
 0x15d   : > { %v8330_v37 = vpack.c.bf16 %v1261_v4, %v1259_v0  ;;  %v1262_v38 = vmax.f32 %v8207_v53, %v1234_v22  ;;  %v1164_v52 = vmax.f32 %v874_v24, 0.0  ;;  %v1166_v19 = vmax.f32 %v1047_v49, 0.0 }
 0x15e   : > { %v1235_v42 = vmax.f32 %v1163_v12, %v1165_v46  ;;  %v1167_v54 = vmax.f32 %v876_v29, 0.0  ;;  %v1169_v55 = vmax.f32 %v1049_v32, 0.0  ;;  %v878_v58 = vadd.f32 %v877_v34, %v8155_v17 }
 0x15f   : > { %v8334_v20 = vpack.c.bf16 %v1262_v38, %v1260_v59  ;;  %v1236_v61 = vmax.f32 %v1164_v52, %v1166_v19  ;;  %v1051_v1 = vadd.f32 %v1050_v35, %v8159_v18 }
 0x160   : > { %v1263_v5 = vmax.f32 %v8217_v23, %v1235_v42  ;;  %v1237_v62 = vmax.f32 %v1167_v54, %v1169_v55  ;;  %v1168_v6 = vmax.f32 %v878_v58, 0.0 }
 0x161   : > { %v1264_v0 = vmax.f32 %v8219_v27, %v1236_v61  ;;  %v1170_v13 = vmax.f32 %v1051_v1, 0.0  ;;  %3360 = vmatprep.mubr.bf16.mxu0 %v8334_v20  ;;  %3875 = vmatprep.mubr.bf16.mxu1 %v8334_v20  ;;  %v881_v53 = vpop.f32.mrb[44].mxu0  ;;  %v1054_v14 = vpop.f32.mrb[44].mxu1 }
 0x162   : > { %v1265_v21 = vmax.f32 %v8221_v30, %v1237_v62  ;;  %3361 = vmatmul.mubr.bf16.gmra.mrb[68].mxu0 %v8330_v37  ;;  %3876 = vmatmul.mubr.bf16.gmra.mrb[68].mxu1 %v8330_v37  ;;  %v882_v59 = vadd.f32 %v881_v53, %v8147_v15  ;;  %v1055_v23 = vadd.f32 %v1054_v14, %v8151_v16  ;;  %v883_v44 = vpop.f32.mrb[45].mxu0  ;;  %v1056_v40 = vpop.f32.mrb[45].mxu1 }
 0x163   : > { %v1238_v27 = vmax.f32 %v1168_v6, %v1170_v13  ;;  %v884_v4 = vadd.f32 %v883_v44, %v8155_v17  ;;  %v1057_v22 = vadd.f32 %v1056_v40, %v8159_v18  ;;  %v885_v24 = vpop.f32.mrb[46].mxu0  ;;  %v1058_v49 = vpop.f32.mrb[46].mxu1 }
 0x164   : > { %v8348_v25 = vpack.c.bf16 %v1265_v21, %v1263_v5  ;;  %v1171_v30 = vmax.f32 %v882_v59, 0.0  ;;  %v1173_v28 = vmax.f32 %v1055_v23, 0.0  ;;  %v886_v12 = vadd.f32 %v885_v24, %v8147_v15  ;;  %v887_v46 = vpop.f32.mrb[47].mxu0  ;;  %v1060_v29 = vpop.f32.mrb[47].mxu1 }
 0x165   : > { %v1266_v32 = vmax.f32 %v8223_v31, %v1238_v27  ;;  %v1172_v34 = vmax.f32 %v884_v4, 0.0  ;;  %v1174_v35 = vmax.f32 %v1057_v22, 0.0  ;;  %v1059_v38 = vadd.f32 %v1058_v49, %v8151_v16 }
 0x166   : > { %v1239_v52 = vmax.f32 %v1171_v30, %v1173_v28  ;;  %v1175_v19 = vmax.f32 %v886_v12, 0.0  ;;  %v888_v42 = vadd.f32 %v887_v46, %v8155_v17  ;;  %v1061_v54 = vadd.f32 %v1060_v29, %v8159_v18 }
 0x167   : > { %v8355_v55 = vpack.c.bf16 %v1266_v32, %v1264_v0  ;;  %v1240_v58 = vmax.f32 %v1172_v34, %v1174_v35  ;;  %v1177_v61 = vmax.f32 %v1059_v38, 0.0 }
 0x168   : > { %v1267_v1 = vmax.f32 %v8233_v60, %v1239_v52  ;;  %v1176_v5 = vmax.f32 %v888_v42, 0.0  ;;  %v1178_v62 = vmax.f32 %v1061_v54, 0.0 }
 0x169   : > { %v1268_v31 = vmax.f32 %v8235_v63, %v1240_v58  ;;  %v1241_v6 = vmax.f32 %v1175_v19, %v1177_v61  ;;  %3370 = vmatprep.mubr.bf16.mxu0 %v8355_v55  ;;  %3885 = vmatprep.mubr.bf16.mxu1 %v8355_v55  ;;  %v891_v13 = vpop.f32.mrb[48].mxu0  ;;  %v1064_v53 = vpop.f32.mrb[48].mxu1 }
 0x16a   : > { %v1242_v14 = vmax.f32 %v1176_v5, %v1178_v62  ;;  %3371 = vmatmul.mubr.bf16.gmra.mrb[72].mxu0 %v8348_v25  ;;  %3886 = vmatmul.mubr.bf16.gmra.mrb[72].mxu1 %v8348_v25  ;;  %v892_v0 = vadd.f32 %v891_v13, %v8147_v15  ;;  %v1065_v60 = vadd.f32 %v1064_v53, %v8151_v16  ;;  %v893_v21 = vpop.f32.mrb[49].mxu0  ;;  %v1066_v59 = vpop.f32.mrb[49].mxu1  ;;  %v1309_v53 = vrot.slane %v7469_v8, 4 }
 0x16b   : > { %v1269_v63 = vmax.f32 %v8237_v2, %v1241_v6  ;;  %v894_v23 = vadd.f32 %v893_v21, %v8155_v17  ;;  %v1067_v44 = vadd.f32 %v1066_v59, %v8159_v18  ;;  %v895_v40 = vpop.f32.mrb[50].mxu0  ;;  %v1068_v27 = vpop.f32.mrb[50].mxu1 }
 0x16c   : > { %v1270_v4 = vmax.f32 %v8239_v3, %v1242_v14  ;;  %v1179_v22 = vmax.f32 %v892_v0, 0.0  ;;  %v1181_v24 = vmax.f32 %v1065_v60, 0.0  ;;  %v896_v49 = vadd.f32 %v895_v40, %v8147_v15  ;;  %v897_v30 = vpop.f32.mrb[51].mxu0  ;;  %v1070_v28 = vpop.f32.mrb[51].mxu1 }
 0x16d   : > { %v8370_v12 = vpack.c.bf16 %v1269_v63, %v1267_v1  ;;  %v1180_v46 = vmax.f32 %v894_v23, 0.0  ;;  %v1182_v29 = vmax.f32 %v1067_v44, 0.0  ;;  %v1069_v2 = vadd.f32 %v1068_v27, %v8151_v16 }
 0x16e   : > { %v8373_v32 = vpack.c.bf16 %v1270_v4, %v1268_v31  ;;  %v1243_v34 = vmax.f32 %v1179_v22, %v1181_v24  ;;  %v1183_v35 = vmax.f32 %v896_v49, 0.0  ;;  %v898_v38 = vadd.f32 %v897_v30, %v8155_v17 }
 0x16f   : > { %v1244_v52 = vmax.f32 %v1180_v46, %v1182_v29  ;;  %v1185_v3 = vmax.f32 %v1069_v2, 0.0  ;;  %v1071_v19 = vadd.f32 %v1070_v28, %v8159_v18  ;;  %v1312_v14 = vrot.slane %v8292_v33, 4 }
 0x170   : > { %v1271_v42 = vmax.f32 %v8249_v45, %v1243_v34  ;;  %v1184_v54 = vmax.f32 %v898_v38, 0.0  ;;  %3380 = vmatprep.mubr.bf16.mxu0 %v8373_v32  ;;  %3895 = vmatprep.mubr.bf16.mxu1 %v8373_v32 }
 0x171   : > { %v1272_v58 = vmax.f32 %v8251_v51, %v1244_v52  ;;  %v1245_v61 = vmax.f32 %v1183_v35, %v1185_v3  ;;  %v1186_v1 = vmax.f32 %v1071_v19, 0.0  ;;  %v901_v5 = vpop.f32.mrb[52].mxu0  ;;  %v1074_v62 = vpop.f32.mrb[52].mxu1 }
 0x172   : > { %3381 = vmatmul.mubr.bf16.gmra.mrb[76].mxu0 %v8370_v12  ;;  %3896 = vmatmul.mubr.bf16.gmra.mrb[76].mxu1 %v8370_v12  ;;  %v902_v31 = vadd.f32 %v901_v5, %v8147_v15  ;;  %v1075_v6 = vadd.f32 %v1074_v62, %v8151_v16  ;;  %v903_v45 = vpop.f32.mrb[53].mxu0  ;;  %v1076_v13 = vpop.f32.mrb[53].mxu1  ;;  %v7013_v62 = vld [vmem:[%s9638_s3 + $0x424] ss:$16 sps:$4 sm:$0xff]  }
 0x173   : > { %v1273_v51 = vmax.f32 %v8253_v56, %v1245_v61  ;;  %v1246_v0 = vmax.f32 %v1184_v54, %v1186_v1  ;;  %v904_v60 = vadd.f32 %v903_v45, %v8155_v17  ;;  %v1077_v21 = vadd.f32 %v1076_v13, %v8159_v18  ;;  %v905_v59 = vpop.f32.mrb[54].mxu0  ;;  %v1078_v63 = vpop.f32.mrb[54].mxu1  ;;  %v7008_v61 = vld [vmem:[%s9638_s3 + $0x408] ss:$16 sps:$4 sm:$0xff]   ;;  %v7011_v13 = vld [vmem:[%s9638_s3 + $0x420] ss:$16 sps:$4 sm:$0xff]  }
 0x174   : > { %v1187_v23 = vmax.f32 %v902_v31, 0.0  ;;  %v1189_v44 = vmax.f32 %v1075_v6, 0.0  ;;  %v906_v40 = vadd.f32 %v905_v59, %v8147_v15  ;;  %v1079_v27 = vadd.f32 %v1078_v63, %v8151_v16  ;;  %v907_v4 = vpop.f32.mrb[55].mxu0  ;;  %v1080_v22 = vpop.f32.mrb[55].mxu1  ;;  %v7016_v31 = vld [vmem:[%s9638_s3 + $0x42c] ss:$16 sps:$4 sm:$0xff]  }
 0x175   : > { %v8392_v24 = vpack.c.bf16 %v1273_v51, %v1271_v42  ;;  %v1274_v49 = vmax.f32 %v8255_v57, %v1246_v0  ;;  %v1188_v56 = vmax.f32 %v904_v60, 0.0  ;;  %v1190_v30 = vmax.f32 %v1077_v21, 0.0  ;;  %v7014_v51 = vld [vmem:[%s9638_s3 + $0x428] ss:$16 sps:$4 sm:$0xff]   ;;  %v7022_v60 = vld [vmem:[%s9638_s3 + $0x44c] ss:$16 sps:$4 sm:$0xff]  }
 0x176   : > { %v1247_v28 = vmax.f32 %v1187_v23, %v1189_v44  ;;  %v1191_v46 = vmax.f32 %v906_v40, 0.0  ;;  %v1193_v29 = vmax.f32 %v1079_v27, 0.0  ;;  %v908_v2 = vadd.f32 %v907_v4, %v8155_v17  ;;  %v7020_v59 = vld [vmem:[%s9638_s3 + $0x448] ss:$16 sps:$4 sm:$0xff]   ;;  %v7025_v44 = vld [vmem:[%s9638_s3 + $0x464] ss:$16 sps:$4 sm:$0xff]  }
 0x177   : > { %v8396_v34 = vpack.c.bf16 %v1274_v49, %v1272_v58  ;;  %v1248_v35 = vmax.f32 %v1188_v56, %v1190_v30  ;;  %v1081_v15 = vadd.f32 %v1080_v22, %v8159_v18  ;;  %v1313_v17 = vsel %vm1308_vm1, %v1309_v53, %v1312_v14  ;;  %v7028_v40 = vld [vmem:[%s9638_s3 + $0x46c] ss:$16 sps:$4 sm:$0xff]   ;;  %v7023_v4 = vld [vmem:[%s9638_s3 + $0x460] ss:$16 sps:$4 sm:$0xff]   ;;  %v7026_v22 = vld [vmem:[%s9638_s3 + $0x468] ss:$16 sps:$4 sm:$0xff]  }
 0x178   : > { %v1275_v16 = vmax.f32 %v8265_v36, %v1247_v28  ;;  %v1249_v38 = vmax.f32 %v1191_v46, %v1193_v29  ;;  %v1192_v52 = vmax.f32 %v908_v2, 0.0  ;;  %v1310_v42 = vrot.slane %v8289_v43, 4  ;;  %v7031_v49 = vld [vmem:[%s9638_s3 + $0x484] ss:$16 sps:$4 sm:$0xff]   ;;  %v7034_v56 = vld [vmem:[%s9638_s3 + $0x48c] ss:$16 sps:$4 sm:$0xff]  }
 0x179   : > { %v1276_v3 = vmax.f32 %v8267_v39, %v1248_v35  ;;  %v1194_v57 = vmax.f32 %v1081_v15, 0.0  ;;  %3390 = vmatprep.mubr.bf16.mxu0 %v8396_v34  ;;  %3905 = vmatprep.mubr.bf16.mxu1 %v8396_v34  ;;  %v1316_v1 = vrot.slane %v8313_v41, 4  ;;  %v1314_v21 = vrot.slane %v8310_v47, 4  ;;  %v7029_v28 = vld [vmem:[%s9638_s3 + $0x480] ss:$16 sps:$4 sm:$0xff]  }
 0x17a   : > { %v1277_v19 = vmax.f32 %v8269_v48, %v1249_v38  ;;  %3391 = vmatmul.mubr.bf16.gmra.mrb[80].mxu0 %v8392_v24  ;;  %3906 = vmatmul.mubr.bf16.gmra.mrb[80].mxu1 %v8392_v24  ;;  %v7005_v48 = vld [vmem:[%s9638_s3 + $0x400] ss:$16 sps:$4 sm:$0xff]   ;;  %v1311_v5 = vsel %vm1308_vm1, %v1309_v53, %v1310_v42  ;;  %v1320_v63 = vrot.slane %v8334_v20, 4  ;;  %v1318_v30 = vrot.slane %v8330_v37, 4  ;;  %v7032_v46 = vld [vmem:[%s9638_s3 + $0x488] ss:$16 sps:$4 sm:$0xff]  }
 0x17b   : > { %v1250_v18 = vmax.f32 %v1192_v52, %v1194_v57  ;;  %3433 = vmatprep.mubr.bf16.mxu0 %v1313_v17  ;;  %3948 = vmatprep.mubr.bf16.mxu1 %v1313_v17  ;;  %v8435_v45 = vsel %vm1308_vm1, %v1312_v14, %v1316_v1  ;;  %v7019_v14 = vld [vmem:[%s9638_s3 + $0x444] ss:$16 sps:$4 sm:$0xff]   ;;  %v8465_v23 = vsel %vm1308_vm1, %v1310_v42, %v1314_v21  ;;  %v1324_v29 = vrot.slane %v8355_v55, 4  ;;  %v7040_v15 = vld [vmem:[%s9638_s3 + $0x4ac] ss:$16 sps:$4 sm:$0xff]  }
 0x17c   : > { %v8407_v36 = vpack.c.bf16 %v1277_v19, %v1275_v16  ;;  %v8476_v27 = vsel %vm1308_vm1, %v1316_v1, %v1320_v63  ;;  %v8501_v2 = vsel %vm1308_vm1, %v1314_v21, %v1318_v30  ;;  %v7037_v35 = vld [vmem:[%s9638_s3 + $0x4a4] ss:$16 sps:$4 sm:$0xff]   ;;  %v7035_v38 = vld [vmem:[%s9638_s3 + $0x4a0] ss:$16 sps:$4 sm:$0xff]   ;;  %v7038_v52 = vld [vmem:[%s9638_s3 + $0x4a8] ss:$16 sps:$4 sm:$0xff]  }
 0x17d   : > { %v1278_v39 = vmax.f32 %v8271_v50, %v1250_v18  ;;  %v8512_v16 = vsel %vm1308_vm1, %v1320_v63, %v1324_v29  ;;  %v7046_v57 = vld [vmem:[%s9638_s3 + $0x4cc] ss:$16 sps:$4 sm:$0xff]   ;;  %v1322_v19 = vrot.slane %v8348_v25, 4  ;;  %v7041_v17 = vld [vmem:[%s9638_s3 + $0x4c0] ss:$16 sps:$4 sm:$0xff]   ;;  %v1332_v21 = vrot.slane %v8396_v34, 4 }
 0x17e   : > { %v1334_v54 = vrot.slane %v8407_v36, 4  ;;  %v7044_v18 = vld [vmem:[%s9638_s3 + $0x4c8] ss:$16 sps:$4 sm:$0xff]   ;;  %v7064_v63 = vld [vmem:[%s9638_s3 + $0x52c] ss:$16 sps:$4 sm:$0xff]  }
 0x17f   : > { %v8412_v58 = vpack.c.bf16 %v1278_v39, %v1276_v3  ;;  %v7043_v3 = vld [vmem:[%s9638_s3 + $0x4c4] ss:$16 sps:$4 sm:$0xff]   ;;  %v1328_v39 = vrot.slane %v8373_v32, 4  ;;  %v8537_v42 = vsel %vm1308_vm1, %v1318_v30, %v1322_v19  ;;  %v7065_v30 = vld [vmem:[%s9638_s3 + $0x540] ss:$16 sps:$4 sm:$0xff]  }
 0x180   : > { %v8424_v50 = vsel %vm1308_vm1, %v1334_v54, %v1309_v53 }
 0x181   : > { %v1336_v6 = vrot.slane %v8412_v58, 4  ;;  %v8548_v1 = vsel %vm1308_vm1, %v1324_v29, %v1328_v39  ;;  %v7073_v29 = vld [vmem:[%s9638_s3 + $0x564] ss:$16 sps:$4 sm:$0xff]  }
 0x182   : > { %3434 = vmatmul.mubr.bf16.vlgmr.msra.gmra.mrb[56].mxu0 %v1311_v5  ;;  %3949 = vmatmul.mubr.bf16.vlgmr.msra.gmra.mrb[56].mxu1 %v1311_v5  ;;  %v7047_v5 = vld [vmem:[%s9638_s3 + $0x4e0] ss:$16 sps:$4 sm:$0xff]  }
 0x183   : > { %3505 = vmatpush1.bf16.msra.mxu0 %v7005_v48  ;;  %4020 = vmatpush1.bf16.msra.mxu1 %v7008_v61  ;;  %v8446_v0 = vsel %vm1308_vm1, %v1336_v6, %v1309_v53  ;;  %v7017_v53 = vld [vmem:[%s9638_s3 + $0x440] ss:$16 sps:$4 sm:$0xff]   ;;  %v7049_v48 = vld [vmem:[%s9638_s3 + $0x4e4] ss:$16 sps:$4 sm:$0xff]   ;;  %v7052_v61 = vld [vmem:[%s9638_s3 + $0x4ec] ss:$16 sps:$4 sm:$0xff]  }
 0x184   : > { %3443 = vmatprep.mubr.bf16.mxu0 %v8435_v45  ;;  %3958 = vmatprep.mubr.bf16.mxu1 %v8435_v45 }
 0x185   : > { %3506 = vmatprep.subr.bf16.mxu0 %v7013_v62  ;;  %4021 = vmatprep.subr.bf16.mxu1 %v7016_v31  ;;  %v7050_v62 = vld [vmem:[%s9638_s3 + $0x4e8] ss:$16 sps:$4 sm:$0xff]   ;;  %v7055_v31 = vld [vmem:[%s9638_s3 + $0x504] ss:$16 sps:$4 sm:$0xff]  }
 0x187   : > { %3507 = vmatpush1.bf16.msra.mxu0 %v7011_v13  ;;  %4022 = vmatpush1.bf16.msra.mxu1 %v7014_v51  ;;  %v7058_v13 = vld [vmem:[%s9638_s3 + $0x50c] ss:$16 sps:$4 sm:$0xff]   ;;  %v1326_v51 = vrot.slane %v8370_v12, 4 }
 0x188   : > { %3508 = vmatprep.subr.bf16.mxu0 %v7019_v14  ;;  %4023 = vmatprep.subr.bf16.mxu1 %v7022_v60  ;;  %v7053_v14 = vld [vmem:[%s9638_s3 + $0x500] ss:$16 sps:$4 sm:$0xff]   ;;  %v7056_v60 = vld [vmem:[%s9638_s3 + $0x508] ss:$16 sps:$4 sm:$0xff]  }
 0x18a   : > { %3444 = vmatmul.mubr.bf16.gmra.mrb[60].mxu0 %v8465_v23  ;;  %3959 = vmatmul.mubr.bf16.gmra.mrb[60].mxu1 %v8465_v23 }
 0x18b   : > { %3509 = vmatpush1.bf16.msra.mxu0 %v7017_v53  ;;  %4024 = vmatpush1.bf16.msra.mxu1 %v7020_v59  ;;  %v8573_v53 = vsel %vm1308_vm1, %v1322_v19, %v1326_v51  ;;  %v7061_v59 = vld [vmem:[%s9638_s3 + $0x524] ss:$16 sps:$4 sm:$0xff]   ;;  %v7080_v19 = vld [vmem:[%s9638_s3 + $0x588] ss:$16 sps:$4 sm:$0xff]  }
 0x18c   : > { %3453 = vmatprep.mubr.bf16.mxu0 %v8476_v27  ;;  %3968 = vmatprep.mubr.bf16.mxu1 %v8476_v27 }
 0x18d   : > { %3510 = vmatprep.subr.bf16.mxu0 %v7025_v44  ;;  %4025 = vmatprep.subr.bf16.mxu1 %v7028_v40  ;;  %v8584_v44 = vsel %vm1308_vm1, %v1328_v39, %v1332_v21  ;;  %v7059_v40 = vld [vmem:[%s9638_s3 + $0x520] ss:$16 sps:$4 sm:$0xff]   ;;  %v7088_v39 = vld [vmem:[%s9638_s3 + $0x5ac] ss:$16 sps:$4 sm:$0xff]  }
 0x18f   : > { %3511 = vmatpush1.bf16.msra.mxu0 %v7023_v4  ;;  %4026 = vmatpush1.bf16.msra.mxu1 %v7026_v22  ;;  %v7062_v4 = vld [vmem:[%s9638_s3 + $0x528] ss:$16 sps:$4 sm:$0xff]   ;;  %v7067_v22 = vld [vmem:[%s9638_s3 + $0x544] ss:$16 sps:$4 sm:$0xff]  }
 0x190   : > { %3512 = vmatprep.subr.bf16.mxu0 %v7031_v49  ;;  %4027 = vmatprep.subr.bf16.mxu1 %v7034_v56  ;;  %v7070_v49 = vld [vmem:[%s9638_s3 + $0x54c] ss:$16 sps:$4 sm:$0xff]   ;;  %v1330_v56 = vrot.slane %v8392_v24, 4 }
 0x192   : > { %3454 = vmatmul.mubr.bf16.gmra.mrb[64].mxu0 %v8501_v2  ;;  %3969 = vmatmul.mubr.bf16.gmra.mrb[64].mxu1 %v8501_v2 }
 0x193   : > { %3513 = vmatpush1.bf16.msra.mxu0 %v7029_v28  ;;  %4028 = vmatpush1.bf16.msra.mxu1 %v7032_v46  ;;  %v7068_v28 = vld [vmem:[%s9638_s3 + $0x548] ss:$16 sps:$4 sm:$0xff]   ;;  %v8608_v46 = vsel %vm1308_vm1, %v1326_v51, %v1330_v56  ;;  %v7095_v51 = vld [vmem:[%s9638_s3 + $0x5e0] ss:$16 sps:$4 sm:$0xff]  }
 0x194   : > { %3463 = vmatprep.mubr.bf16.mxu0 %v8512_v16  ;;  %3978 = vmatprep.mubr.bf16.mxu1 %v8512_v16 }
 0x195   : > { %3514 = vmatprep.subr.bf16.mxu0 %v7037_v35  ;;  %4029 = vmatprep.subr.bf16.mxu1 %v7040_v15  ;;  %v7076_v35 = vld [vmem:[%s9638_s3 + $0x56c] ss:$16 sps:$4 sm:$0xff]   ;;  %v8621_v15 = vsel %vm1308_vm1, %v1332_v21, %v1336_v6 }
 0x196   : > { %v7082_v6 = vld [vmem:[%s9638_s3 + $0x58c] ss:$16 sps:$4 sm:$0xff]  }
 0x197   : > { %3515 = vmatpush1.bf16.msra.mxu0 %v7035_v38  ;;  %4030 = vmatpush1.bf16.msra.mxu1 %v7038_v52  ;;  %v7071_v38 = vld [vmem:[%s9638_s3 + $0x560] ss:$16 sps:$4 sm:$0xff]   ;;  %v7074_v52 = vld [vmem:[%s9638_s3 + $0x568] ss:$16 sps:$4 sm:$0xff]   ;;  %v7106_v21 = vld [vmem:[%s9638_s3 + $0x60c] ss:$16 sps:$4 sm:$0xff]  }
 0x198   : > { %3516 = vmatprep.subr.bf16.mxu0 %v7043_v3  ;;  %4031 = vmatprep.subr.bf16.mxu1 %v7046_v57  ;;  %v7079_v3 = vld [vmem:[%s9638_s3 + $0x584] ss:$16 sps:$4 sm:$0xff]   ;;  %v7077_v57 = vld [vmem:[%s9638_s3 + $0x580] ss:$16 sps:$4 sm:$0xff]  }
 0x19a   : > { %3464 = vmatmul.mubr.bf16.gmra.mrb[68].mxu0 %v8537_v42  ;;  %3979 = vmatmul.mubr.bf16.gmra.mrb[68].mxu1 %v8537_v42 }
 0x19b   : > { %3517 = vmatpush1.bf16.msra.mxu0 %v7041_v17  ;;  %4032 = vmatpush1.bf16.msra.mxu1 %v7044_v18  ;;  %v8646_v17 = vsel %vm1308_vm1, %v1330_v56, %v1334_v54  ;;  %v7085_v18 = vld [vmem:[%s9638_s3 + $0x5a4] ss:$16 sps:$4 sm:$0xff]   ;;  %v7086_v54 = vld [vmem:[%s9638_s3 + $0x5a8] ss:$16 sps:$4 sm:$0xff]  }
 0x19c   : > { %3473 = vmatprep.mubr.bf16.mxu0 %v8548_v1  ;;  %3988 = vmatprep.mubr.bf16.mxu1 %v8548_v1  ;;  %v7115_v56 = vld [vmem:[%s9638_s3 + $0x644] ss:$16 sps:$4 sm:$0xff]  }
 0x19d   : > { %3518 = vmatprep.subr.bf16.mxu0 %v7049_v48  ;;  %4033 = vmatprep.subr.bf16.mxu1 %v7052_v61  ;;  %v7083_v48 = vld [vmem:[%s9638_s3 + $0x5a0] ss:$16 sps:$4 sm:$0xff]   ;;  %v7091_v61 = vld [vmem:[%s9638_s3 + $0x5c4] ss:$16 sps:$4 sm:$0xff]  }
 0x19f   : > { %3519 = vmatpush1.bf16.msra.mxu0 %v7047_v5  ;;  %4034 = vmatpush1.bf16.msra.mxu1 %v7050_v62  ;;  %v7094_v5 = vld [vmem:[%s9638_s3 + $0x5cc] ss:$16 sps:$4 sm:$0xff]   ;;  %v7089_v62 = vld [vmem:[%s9638_s3 + $0x5c0] ss:$16 sps:$4 sm:$0xff]  }
 0x1a0   : > { %3520 = vmatprep.subr.bf16.mxu0 %v7055_v31  ;;  %4035 = vmatprep.subr.bf16.mxu1 %v7058_v13  ;;  %v7097_v31 = vld [vmem:[%s9638_s3 + $0x5e4] ss:$16 sps:$4 sm:$0xff]   ;;  %v7100_v13 = vld [vmem:[%s9638_s3 + $0x5ec] ss:$16 sps:$4 sm:$0xff]  }
 0x1a2   : > { %3474 = vmatmul.mubr.bf16.gmra.mrb[72].mxu0 %v8573_v53  ;;  %3989 = vmatmul.mubr.bf16.gmra.mrb[72].mxu1 %v8573_v53 }
 0x1a3   : > { %3521 = vmatpush1.bf16.msra.mxu0 %v7053_v14  ;;  %4036 = vmatpush1.bf16.msra.mxu1 %v7056_v60  ;;  %v7098_v14 = vld [vmem:[%s9638_s3 + $0x5e8] ss:$16 sps:$4 sm:$0xff]   ;;  %v7103_v60 = vld [vmem:[%s9638_s3 + $0x604] ss:$16 sps:$4 sm:$0xff]  }
 0x1a4   : > { %3483 = vmatprep.mubr.bf16.mxu0 %v8584_v44  ;;  %3998 = vmatprep.mubr.bf16.mxu1 %v8584_v44 }
 0x1a5   : > { %3522 = vmatprep.subr.bf16.mxu0 %v7061_v59  ;;  %4037 = vmatprep.subr.bf16.mxu1 %v7064_v63  ;;  %v7101_v59 = vld [vmem:[%s9638_s3 + $0x600] ss:$16 sps:$4 sm:$0xff]   ;;  %v7104_v63 = vld [vmem:[%s9638_s3 + $0x608] ss:$16 sps:$4 sm:$0xff]  }
 0x1a7   : > { %3523 = vmatpush1.bf16.msra.mxu0 %v7059_v40  ;;  %4038 = vmatpush1.bf16.msra.mxu1 %v7062_v4  ;;  %v7109_v40 = vld [vmem:[%s9638_s3 + $0x624] ss:$16 sps:$4 sm:$0xff]   ;;  %v7112_v4 = vld [vmem:[%s9638_s3 + $0x62c] ss:$16 sps:$4 sm:$0xff]  }
 0x1a8   : > { %3524 = vmatprep.subr.bf16.mxu0 %v7067_v22  ;;  %4039 = vmatprep.subr.bf16.mxu1 %v7070_v49  ;;  %v7107_v22 = vld [vmem:[%s9638_s3 + $0x620] ss:$16 sps:$4 sm:$0xff]   ;;  %v7110_v49 = vld [vmem:[%s9638_s3 + $0x628] ss:$16 sps:$4 sm:$0xff]  }
 0x1aa   : > { %3484 = vmatmul.mubr.bf16.gmra.mrb[76].mxu0 %v8608_v46  ;;  %3999 = vmatmul.mubr.bf16.gmra.mrb[76].mxu1 %v8608_v46 }
 0x1ab   : > { %3525 = vmatpush1.bf16.msra.mxu0 %v7065_v30  ;;  %4040 = vmatpush1.bf16.msra.mxu1 %v7068_v28  ;;  %v7113_v30 = vld [vmem:[%s9638_s3 + $0x640] ss:$16 sps:$4 sm:$0xff]   ;;  %v7116_v28 = vld [vmem:[%s9638_s3 + $0x648] ss:$16 sps:$4 sm:$0xff]  }
 0x1ac   : > { %3493 = vmatprep.mubr.bf16.mxu0 %v8621_v15  ;;  %4008 = vmatprep.mubr.bf16.mxu1 %v8621_v15 }
 0x1ad   : > { %3526 = vmatprep.subr.bf16.mxu0 %v7073_v29  ;;  %4041 = vmatprep.subr.bf16.mxu1 %v7076_v35  ;;  %v7121_v29 = vld [vmem:[%s9638_s3 + $0x664] ss:$16 sps:$4 sm:$0xff]   ;;  %v7124_v35 = vld [vmem:[%s9638_s3 + $0x66c] ss:$16 sps:$4 sm:$0xff]  }
 0x1af   : > { %3527 = vmatpush1.bf16.msra.mxu0 %v7071_v38  ;;  %4042 = vmatpush1.bf16.msra.mxu1 %v7074_v52  ;;  %v7119_v38 = vld [vmem:[%s9638_s3 + $0x660] ss:$16 sps:$4 sm:$0xff]   ;;  %v7122_v52 = vld [vmem:[%s9638_s3 + $0x668] ss:$16 sps:$4 sm:$0xff]  }
 0x1b0   : > { %3528 = vmatprep.subr.bf16.mxu0 %v7079_v3  ;;  %4043 = vmatprep.subr.bf16.mxu1 %v7082_v6  ;;  %v7127_v3 = vld [vmem:[%s9638_s3 + $0x684] ss:$16 sps:$4 sm:$0xff]   ;;  %v7130_v6 = vld [vmem:[%s9638_s3 + $0x68c] ss:$16 sps:$4 sm:$0xff]  }
 0x1b2   : > { %3494 = vmatmul.mubr.bf16.gmra.mrb[80].mxu0 %v8646_v17  ;;  %4009 = vmatmul.mubr.bf16.gmra.mrb[80].mxu1 %v8646_v17 }
 0x1b3   : > { %3529 = vmatpush1.bf16.msra.mxu0 %v7077_v57  ;;  %4044 = vmatpush1.bf16.msra.mxu1 %v7080_v19  ;;  %v7125_v57 = vld [vmem:[%s9638_s3 + $0x680] ss:$16 sps:$4 sm:$0xff]   ;;  %v7128_v19 = vld [vmem:[%s9638_s3 + $0x688] ss:$16 sps:$4 sm:$0xff]  }
 0x1b4   : > { %3536 = vmatprep.mubr.bf16.mxu0 %v8292_v33  ;;  %4051 = vmatprep.mubr.bf16.mxu1 %v8292_v33  ;;  %v7092_v33 = vld [vmem:[%s9638_s3 + $0x5c8] ss:$16 sps:$4 sm:$0xff]  }
 0x1b5   : > { %3530 = vmatprep.subr.bf16.mxu0 %v7085_v18  ;;  %4045 = vmatprep.subr.bf16.mxu1 %v7088_v39  ;;  %v7133_v18 = vld [vmem:[%s9638_s3 + $0x6a4] ss:$16 sps:$4 sm:$0xff]   ;;  %v7136_v39 = vld [vmem:[%s9638_s3 + $0x6ac] ss:$16 sps:$4 sm:$0xff]  }
 0x1b7   : > { %3531 = vmatpush1.bf16.msra.mxu0 %v7083_v48  ;;  %4046 = vmatpush1.bf16.msra.mxu1 %v7086_v54  ;;  %v7131_v48 = vld [vmem:[%s9638_s3 + $0x6a0] ss:$16 sps:$4 sm:$0xff]   ;;  %v7134_v54 = vld [vmem:[%s9638_s3 + $0x6a8] ss:$16 sps:$4 sm:$0xff]  }
 0x1b8   : > { %3532 = vmatprep.subr.bf16.mxu0 %v7091_v61  ;;  %4047 = vmatprep.subr.bf16.mxu1 %v7094_v5  ;;  %v7139_v61 = vld [vmem:[%s9638_s3 + $0x6c4] ss:$16 sps:$4 sm:$0xff]   ;;  %v7142_v5 = vld [vmem:[%s9638_s3 + $0x6cc] ss:$16 sps:$4 sm:$0xff]  }
 0x1bb   : > { %3533 = vmatpush1.bf16.msra.mxu0 %v7089_v62  ;;  %4048 = vmatpush1.bf16.msra.mxu1 %v7092_v33  ;;  %v7137_v62 = vld [vmem:[%s9638_s3 + $0x6c0] ss:$16 sps:$4 sm:$0xff]   ;;  %v7140_v33 = vld [vmem:[%s9638_s3 + $0x6c8] ss:$16 sps:$4 sm:$0xff]  }
 0x1bc   : > { %3534 = vmatprep.subr.bf16.mxu0 %v7097_v31  ;;  %4049 = vmatprep.subr.bf16.mxu1 %v7100_v13  ;;  %v7145_v31 = vld [vmem:[%s9638_s3 + $0x6e4] ss:$16 sps:$4 sm:$0xff]   ;;  %v7148_v13 = vld [vmem:[%s9638_s3 + $0x6ec] ss:$16 sps:$4 sm:$0xff]  }
 0x1bf   : > { %3535 = vmatpush1.bf16.msra.mxu0 %v7095_v51  ;;  %4050 = vmatpush1.bf16.msra.mxu1 %v7098_v14  ;;  %v7143_v51 = vld [vmem:[%s9638_s3 + $0x6e0] ss:$16 sps:$4 sm:$0xff]   ;;  %v7146_v14 = vld [vmem:[%s9638_s3 + $0x6e8] ss:$16 sps:$4 sm:$0xff]  }
 0x1c0   : > { %3607 = vmatprep.subr.bf16.mxu0 %v7103_v60  ;;  %4122 = vmatprep.subr.bf16.mxu1 %v7106_v21  ;;  %v7151_v60 = vld [vmem:[%s9638_s3 + $0x704] ss:$16 sps:$4 sm:$0xff]   ;;  %v7154_v21 = vld [vmem:[%s9638_s3 + $0x70c] ss:$16 sps:$4 sm:$0xff]  }
 0x1c2   : > { %3537 = vmatmul.mubr.bf16.vlgmr.msra.gmra.mrb[56].mxu0 %v8289_v43  ;;  %4052 = vmatmul.mubr.bf16.vlgmr.msra.gmra.mrb[56].mxu1 %v8289_v43  ;;  %v7118_v43 = vld [vmem:[%s9638_s3 + $0x64c] ss:$16 sps:$4 sm:$0xff]  }
 0x1c3   : > { %3546 = vmatprep.mubr.bf16.mxu0 %v8313_v41  ;;  %3608 = vmatpush1.bf16.msra.mxu0 %v7101_v59  ;;  %v7149_v59 = vld [vmem:[%s9638_s3 + $0x700] ss:$16 sps:$4 sm:$0xff]  }
 0x1c4   : > { %4061 = vmatprep.mubr.bf16.mxu1 %v8313_v41  ;;  %4123 = vmatpush1.bf16.msra.mxu1 %v7104_v63  ;;  %v7152_v63 = vld [vmem:[%s9638_s3 + $0x708] ss:$16 sps:$4 sm:$0xff]  }
 0x1c5   : > { %3609 = vmatprep.subr.bf16.mxu0 %v7109_v40  ;;  %4124 = vmatprep.subr.bf16.mxu1 %v7112_v4  ;;  %v7157_v40 = vld [vmem:[%s9638_s3 + $0x724] ss:$16 sps:$4 sm:$0xff]   ;;  %v7160_v4 = vld [vmem:[%s9638_s3 + $0x72c] ss:$16 sps:$4 sm:$0xff]  }
 0x1c7   : > { %3610 = vmatpush1.bf16.msra.mxu0 %v7107_v22  ;;  %v7155_v22 = vld [vmem:[%s9638_s3 + $0x720] ss:$16 sps:$4 sm:$0xff]  }
 0x1c8   : > { %4125 = vmatpush1.bf16.msra.mxu1 %v7110_v49  ;;  %3611 = vmatprep.subr.bf16.mxu0 %v7115_v56  ;;  %v7158_v49 = vld [vmem:[%s9638_s3 + $0x728] ss:$16 sps:$4 sm:$0xff]   ;;  %v7163_v56 = vld [vmem:[%s9638_s3 + $0x744] ss:$16 sps:$4 sm:$0xff]  }
 0x1c9   : > { %4126 = vmatprep.subr.bf16.mxu1 %v7118_v43  ;;  %v7166_v43 = vld [vmem:[%s9638_s3 + $0x74c] ss:$16 sps:$4 sm:$0xff]  }
 0x1ca   : > { %3547 = vmatmul.mubr.bf16.gmra.mrb[60].mxu0 %v8310_v47  ;;  %4062 = vmatmul.mubr.bf16.gmra.mrb[60].mxu1 %v8310_v47 }
 0x1cb   : > { %3556 = vmatprep.mubr.bf16.mxu0 %v8334_v20  ;;  %3612 = vmatpush1.bf16.msra.mxu0 %v7113_v30  ;;  %v7161_v30 = vld [vmem:[%s9638_s3 + $0x740] ss:$16 sps:$4 sm:$0xff]  }
 0x1cc   : > { %4071 = vmatprep.mubr.bf16.mxu1 %v8334_v20  ;;  %4127 = vmatpush1.bf16.msra.mxu1 %v7116_v28  ;;  %v7164_v28 = vld [vmem:[%s9638_s3 + $0x748] ss:$16 sps:$4 sm:$0xff]  }
 0x1cd   : > { %3613 = vmatprep.subr.bf16.mxu0 %v7121_v29  ;;  %4128 = vmatprep.subr.bf16.mxu1 %v7124_v35  ;;  %v7169_v29 = vld [vmem:[%s9638_s3 + $0x764] ss:$16 sps:$4 sm:$0xff]   ;;  %v7172_v35 = vld [vmem:[%s9638_s3 + $0x76c] ss:$16 sps:$4 sm:$0xff]  }
 0x1cf   : > { %3614 = vmatpush1.bf16.msra.mxu0 %v7119_v38  ;;  %v7167_v38 = vld [vmem:[%s9638_s3 + $0x760] ss:$16 sps:$4 sm:$0xff]  }
 0x1d0   : > { %4129 = vmatpush1.bf16.msra.mxu1 %v7122_v52  ;;  %3615 = vmatprep.subr.bf16.mxu0 %v7127_v3  ;;  %v7170_v52 = vld [vmem:[%s9638_s3 + $0x768] ss:$16 sps:$4 sm:$0xff]   ;;  %v7175_v3 = vld [vmem:[%s9638_s3 + $0x784] ss:$16 sps:$4 sm:$0xff]  }
 0x1d1   : > { %4130 = vmatprep.subr.bf16.mxu1 %v7130_v6  ;;  %v7178_v6 = vld [vmem:[%s9638_s3 + $0x78c] ss:$16 sps:$4 sm:$0xff]  }
 0x1d2   : > { %3557 = vmatmul.mubr.bf16.gmra.mrb[64].mxu0 %v8330_v37  ;;  %4072 = vmatmul.mubr.bf16.gmra.mrb[64].mxu1 %v8330_v37 }
 0x1d3   : > { %3566 = vmatprep.mubr.bf16.mxu0 %v8355_v55  ;;  %3616 = vmatpush1.bf16.msra.mxu0 %v7125_v57  ;;  %v7173_v57 = vld [vmem:[%s9638_s3 + $0x780] ss:$16 sps:$4 sm:$0xff]  }
 0x1d4   : > { %4081 = vmatprep.mubr.bf16.mxu1 %v8355_v55  ;;  %4131 = vmatpush1.bf16.msra.mxu1 %v7128_v19  ;;  %v7176_v19 = vld [vmem:[%s9638_s3 + $0x788] ss:$16 sps:$4 sm:$0xff]  }
 0x1d5   : > { %3617 = vmatprep.subr.bf16.mxu0 %v7133_v18  ;;  %4132 = vmatprep.subr.bf16.mxu1 %v7136_v39  ;;  %v7181_v18 = vld [vmem:[%s9638_s3 + $0x7a4] ss:$16 sps:$4 sm:$0xff]   ;;  %v7184_v39 = vld [vmem:[%s9638_s3 + $0x7ac] ss:$16 sps:$4 sm:$0xff]  }
 0x1d7   : > { %3618 = vmatpush1.bf16.msra.mxu0 %v7131_v48  ;;  %v7179_v48 = vld [vmem:[%s9638_s3 + $0x7a0] ss:$16 sps:$4 sm:$0xff]  }
 0x1d8   : > { %4133 = vmatpush1.bf16.msra.mxu1 %v7134_v54  ;;  %3619 = vmatprep.subr.bf16.mxu0 %v7139_v61  ;;  %v7182_v54 = vld [vmem:[%s9638_s3 + $0x7a8] ss:$16 sps:$4 sm:$0xff]   ;;  %v7187_v61 = vld [vmem:[%s9638_s3 + $0x7c4] ss:$16 sps:$4 sm:$0xff]  }
 0x1d9   : > { %4134 = vmatprep.subr.bf16.mxu1 %v7142_v5  ;;  %v7190_v5 = vld [vmem:[%s9638_s3 + $0x7cc] ss:$16 sps:$4 sm:$0xff]  }
 0x1da   : > { %3567 = vmatmul.mubr.bf16.gmra.mrb[68].mxu0 %v8348_v25  ;;  %4082 = vmatmul.mubr.bf16.gmra.mrb[68].mxu1 %v8348_v25 }
 0x1db   : > { %3576 = vmatprep.mubr.bf16.mxu0 %v8373_v32  ;;  %3620 = vmatpush1.bf16.msra.mxu0 %v7137_v62  ;;  %v7185_v62 = vld [vmem:[%s9638_s3 + $0x7c0] ss:$16 sps:$4 sm:$0xff]  }
 0x1dc   : > { %4091 = vmatprep.mubr.bf16.mxu1 %v8373_v32  ;;  %4135 = vmatpush1.bf16.msra.mxu1 %v7140_v33  ;;  %v7193_v33 = vld [vmem:[%s9638_s3 + $0x7e4] ss:$16 sps:$4 sm:$0xff]  }
 0x1dd   : > { %3621 = vmatprep.subr.bf16.mxu0 %v7145_v31  ;;  %4136 = vmatprep.subr.bf16.mxu1 %v7148_v13  ;;  %v7196_v31 = vld [vmem:[%s9638_s3 + $0x7ec] ss:$16 sps:$4 sm:$0xff]   ;;  %v7191_v13 = vld [vmem:[%s9638_s3 + $0x7e0] ss:$16 sps:$4 sm:$0xff]  }
 0x1df   : > { %3622 = vmatpush1.bf16.msra.mxu0 %v7143_v51  ;;  %v7194_v51 = vld [vmem:[%s9638_s3 + $0x7e8] ss:$16 sps:$4 sm:$0xff]  }
 0x1e0   : > { %4137 = vmatpush1.bf16.msra.mxu1 %v7146_v14  ;;  %3623 = vmatprep.subr.bf16.mxu0 %v7151_v60  ;;  %v7199_v14 = vld [vmem:[%s9638_s3 + $0x804] ss:$16 sps:$4 sm:$0xff]   ;;  %v7202_v60 = vld [vmem:[%s9638_s3 + $0x80c] ss:$16 sps:$4 sm:$0xff]  }
 0x1e1   : > { %4138 = vmatprep.subr.bf16.mxu1 %v7154_v21  ;;  %v7197_v21 = vld [vmem:[%s9638_s3 + $0x800] ss:$16 sps:$4 sm:$0xff]  }
 0x1e2   : > { %3577 = vmatmul.mubr.bf16.gmra.mrb[72].mxu0 %v8370_v12  ;;  %4092 = vmatmul.mubr.bf16.gmra.mrb[72].mxu1 %v8370_v12 }
 0x1e3   : > { %3586 = vmatprep.mubr.bf16.mxu0 %v8396_v34  ;;  %3624 = vmatpush1.bf16.msra.mxu0 %v7149_v59  ;;  %v7200_v59 = vld [vmem:[%s9638_s3 + $0x808] ss:$16 sps:$4 sm:$0xff]  }
 0x1e4   : > { %4101 = vmatprep.mubr.bf16.mxu1 %v8396_v34  ;;  %4139 = vmatpush1.bf16.msra.mxu1 %v7152_v63  ;;  %v7205_v63 = vld [vmem:[%s9638_s3 + $0x824] ss:$16 sps:$4 sm:$0xff]  }
 0x1e5   : > { %3625 = vmatprep.subr.bf16.mxu0 %v7157_v40  ;;  %4140 = vmatprep.subr.bf16.mxu1 %v7160_v4  ;;  %v7208_v40 = vld [vmem:[%s9638_s3 + $0x82c] ss:$16 sps:$4 sm:$0xff]   ;;  %v7203_v4 = vld [vmem:[%s9638_s3 + $0x820] ss:$16 sps:$4 sm:$0xff]  }
 0x1e7   : > { %3626 = vmatpush1.bf16.msra.mxu0 %v7155_v22  ;;  %v7206_v22 = vld [vmem:[%s9638_s3 + $0x828] ss:$16 sps:$4 sm:$0xff]  }
 0x1e8   : > { %4141 = vmatpush1.bf16.msra.mxu1 %v7158_v49  ;;  %3627 = vmatprep.subr.bf16.mxu0 %v7163_v56  ;;  %v7211_v49 = vld [vmem:[%s9638_s3 + $0x844] ss:$16 sps:$4 sm:$0xff]   ;;  %v7212_v56 = vld [vmem:[%s9638_s3 + $0x848] ss:$16 sps:$4 sm:$0xff]  }
 0x1e9   : > { %4142 = vmatprep.subr.bf16.mxu1 %v7166_v43  ;;  %v7217_v43 = vld [vmem:[%s9638_s3 + $0x864] ss:$16 sps:$4 sm:$0xff]  }
 0x1ea   : > { %3587 = vmatmul.mubr.bf16.gmra.mrb[76].mxu0 %v8392_v24  ;;  %4102 = vmatmul.mubr.bf16.gmra.mrb[76].mxu1 %v8392_v24 }
 0x1eb   : > { %3596 = vmatprep.mubr.bf16.mxu0 %v8412_v58  ;;  %3628 = vmatpush1.bf16.msra.mxu0 %v7161_v30  ;;  %v7220_v30 = vld [vmem:[%s9638_s3 + $0x86c] ss:$16 sps:$4 sm:$0xff]  }
 0x1ec   : > { %4111 = vmatprep.mubr.bf16.mxu1 %v8412_v58  ;;  %4143 = vmatpush1.bf16.msra.mxu1 %v7164_v28  ;;  %v7215_v28 = vld [vmem:[%s9638_s3 + $0x860] ss:$16 sps:$4 sm:$0xff]  }
 0x1ed   : > { %3629 = vmatprep.subr.bf16.mxu0 %v7169_v29  ;;  %4144 = vmatprep.subr.bf16.mxu1 %v7172_v35  ;;  %v7218_v29 = vld [vmem:[%s9638_s3 + $0x868] ss:$16 sps:$4 sm:$0xff]   ;;  %v7223_v35 = vld [vmem:[%s9638_s3 + $0x884] ss:$16 sps:$4 sm:$0xff]  }
 0x1ef   : > { %3630 = vmatpush1.bf16.msra.mxu0 %v7167_v38  ;;  %v7224_v38 = vld [vmem:[%s9638_s3 + $0x888] ss:$16 sps:$4 sm:$0xff]  }
 0x1f0   : > { %4145 = vmatpush1.bf16.msra.mxu1 %v7170_v52  ;;  %3631 = vmatprep.subr.bf16.mxu0 %v7175_v3  ;;  %v7229_v52 = vld [vmem:[%s9638_s3 + $0x8a4] ss:$16 sps:$4 sm:$0xff]   ;;  %v7232_v3 = vld [vmem:[%s9638_s3 + $0x8ac] ss:$16 sps:$4 sm:$0xff]  }
 0x1f1   : > { %4146 = vmatprep.subr.bf16.mxu1 %v7178_v6  ;;  %v7227_v6 = vld [vmem:[%s9638_s3 + $0x8a0] ss:$16 sps:$4 sm:$0xff]  }
 0x1f2   : > { %3597 = vmatmul.mubr.bf16.gmra.mrb[80].mxu0 %v8407_v36  ;;  %4112 = vmatmul.mubr.bf16.gmra.mrb[80].mxu1 %v8407_v36 }
 0x1f3   : > { %3632 = vmatpush1.bf16.msra.mxu0 %v7173_v57  ;;  %3639 = vmatprep.mubr.bf16.mxu0 %v8435_v45  ;;  %v7230_v57 = vld [vmem:[%s9638_s3 + $0x8a8] ss:$16 sps:$4 sm:$0xff]  }
 0x1f4   : > { %4147 = vmatpush1.bf16.msra.mxu1 %v7176_v19  ;;  %4154 = vmatprep.mubr.bf16.mxu1 %v8435_v45  ;;  %v7188_v45 = vld [vmem:[%s9638_s3 + $0x7c8] ss:$16 sps:$4 sm:$0xff]   ;;  %v7235_v19 = vld [vmem:[%s9638_s3 + $0x8c4] ss:$16 sps:$4 sm:$0xff]  }
 0x1f5   : > { %3633 = vmatprep.subr.bf16.mxu0 %v7181_v18  ;;  %4148 = vmatprep.subr.bf16.mxu1 %v7184_v39  ;;  %v7236_v18 = vld [vmem:[%s9638_s3 + $0x8c8] ss:$16 sps:$4 sm:$0xff]   ;;  %v7241_v39 = vld [vmem:[%s9638_s3 + $0x8e4] ss:$16 sps:$4 sm:$0xff]  }
 0x1f7   : > { %3634 = vmatpush1.bf16.msra.mxu0 %v7179_v48  ;;  %v7244_v48 = vld [vmem:[%s9638_s3 + $0x8ec] ss:$16 sps:$4 sm:$0xff]  }
 0x1f8   : > { %4149 = vmatpush1.bf16.msra.mxu1 %v7182_v54  ;;  %3635 = vmatprep.subr.bf16.mxu0 %v7187_v61  ;;  %v7239_v54 = vld [vmem:[%s9638_s3 + $0x8e0] ss:$16 sps:$4 sm:$0xff]   ;;  %v7242_v61 = vld [vmem:[%s9638_s3 + $0x8e8] ss:$16 sps:$4 sm:$0xff]  }
 0x1f9   : > { %4150 = vmatprep.subr.bf16.mxu1 %v7190_v5  ;;  %v7247_v5 = vld [vmem:[%s9638_s3 + $0x904] ss:$16 sps:$4 sm:$0xff]  }
 0x1fb   : > { %3636 = vmatpush1.bf16.msra.mxu0 %v7185_v62  ;;  %v7248_v62 = vld [vmem:[%s9638_s3 + $0x908] ss:$16 sps:$4 sm:$0xff]  }
 0x1fc   : > { %4151 = vmatpush1.bf16.msra.mxu1 %v7188_v45  ;;  %3637 = vmatprep.subr.bf16.mxu0 %v7193_v33  ;;  %v7253_v45 = vld [vmem:[%s9638_s3 + $0x924] ss:$16 sps:$4 sm:$0xff]   ;;  %v7256_v33 = vld [vmem:[%s9638_s3 + $0x92c] ss:$16 sps:$4 sm:$0xff]  }
 0x1fd   : > { %4152 = vmatprep.subr.bf16.mxu1 %v7196_v31  ;;  %v7251_v31 = vld [vmem:[%s9638_s3 + $0x920] ss:$16 sps:$4 sm:$0xff]  }
 0x1ff   : > { %3638 = vmatpush1.bf16.msra.mxu0 %v7191_v13  ;;  %v7254_v13 = vld [vmem:[%s9638_s3 + $0x928] ss:$16 sps:$4 sm:$0xff]  }
 0x200   : > { %4153 = vmatpush1.bf16.msra.mxu1 %v7194_v51  ;;  %3710 = vmatprep.subr.bf16.mxu0 %v7199_v14  ;;  %v7259_v51 = vld [vmem:[%s9638_s3 + $0x944] ss:$16 sps:$4 sm:$0xff]   ;;  %v7260_v14 = vld [vmem:[%s9638_s3 + $0x948] ss:$16 sps:$4 sm:$0xff]  }
 0x201   : > { %4225 = vmatprep.subr.bf16.mxu1 %v7202_v60  ;;  %v7265_v60 = vld [vmem:[%s9638_s3 + $0x964] ss:$16 sps:$4 sm:$0xff]  }
 0x202   : > { %3640 = vmatmul.mubr.bf16.vlgmr.msra.gmra.mrb[56].mxu0 %v8465_v23 }
 0x203   : > { %4155 = vmatmul.mubr.bf16.vlgmr.msra.gmra.mrb[56].mxu1 %v8465_v23  ;;  %3649 = vmatprep.mubr.bf16.mxu0 %v8476_v27  ;;  %v7214_v23 = vld [vmem:[%s9638_s3 + $0x84c] ss:$16 sps:$4 sm:$0xff]  }
 0x204   : > { %3711 = vmatpush1.bf16.msra.mxu0 %v7197_v21  ;;  %4164 = vmatprep.mubr.bf16.mxu1 %v8476_v27  ;;  %v7209_v27 = vld [vmem:[%s9638_s3 + $0x840] ss:$16 sps:$4 sm:$0xff]   ;;  %v7268_v21 = vld [vmem:[%s9638_s3 + $0x96c] ss:$16 sps:$4 sm:$0xff]  }
 0x205   : > { %4226 = vmatpush1.bf16.msra.mxu1 %v7200_v59  ;;  %3712 = vmatprep.subr.bf16.mxu0 %v7205_v63  ;;  %v7263_v59 = vld [vmem:[%s9638_s3 + $0x960] ss:$16 sps:$4 sm:$0xff]   ;;  %v7266_v63 = vld [vmem:[%s9638_s3 + $0x968] ss:$16 sps:$4 sm:$0xff]  }
 0x206   : > { %4227 = vmatprep.subr.bf16.mxu1 %v7208_v40  ;;  %v7271_v40 = vld [vmem:[%s9638_s3 + $0x984] ss:$16 sps:$4 sm:$0xff]  }
 0x208   : > { %3713 = vmatpush1.bf16.msra.mxu0 %v7203_v4  ;;  %v7272_v4 = vld [vmem:[%s9638_s3 + $0x988] ss:$16 sps:$4 sm:$0xff]  }
 0x209   : > { %4228 = vmatpush1.bf16.msra.mxu1 %v7206_v22  ;;  %3714 = vmatprep.subr.bf16.mxu0 %v7211_v49  ;;  %v7277_v22 = vld [vmem:[%s9638_s3 + $0x9a4] ss:$16 sps:$4 sm:$0xff]   ;;  %v7280_v49 = vld [vmem:[%s9638_s3 + $0x9ac] ss:$16 sps:$4 sm:$0xff]  }
 0x20a   : > { %3650 = vmatmul.mubr.bf16.gmra.mrb[60].mxu0 %v8501_v2  ;;  %4229 = vmatprep.subr.bf16.mxu1 %v7214_v23  ;;  %v7275_v23 = vld [vmem:[%s9638_s3 + $0x9a0] ss:$16 sps:$4 sm:$0xff]  }
 0x20b   : > { %4165 = vmatmul.mubr.bf16.gmra.mrb[60].mxu1 %v8501_v2  ;;  %3659 = vmatprep.mubr.bf16.mxu0 %v8512_v16  ;;  %v7226_v2 = vld [vmem:[%s9638_s3 + $0x88c] ss:$16 sps:$4 sm:$0xff]  }
 0x20c   : > { %3715 = vmatpush1.bf16.msra.mxu0 %v7209_v27  ;;  %4174 = vmatprep.mubr.bf16.mxu1 %v8512_v16  ;;  %v7221_v16 = vld [vmem:[%s9638_s3 + $0x880] ss:$16 sps:$4 sm:$0xff]   ;;  %v7278_v27 = vld [vmem:[%s9638_s3 + $0x9a8] ss:$16 sps:$4 sm:$0xff]  }
 0x20d   : > { %4230 = vmatpush1.bf16.msra.mxu1 %v7212_v56  ;;  %3716 = vmatprep.subr.bf16.mxu0 %v7217_v43  ;;  %v7283_v56 = vld [vmem:[%s9638_s3 + $0x9c4] ss:$16 sps:$4 sm:$0xff]   ;;  %v7284_v43 = vld [vmem:[%s9638_s3 + $0x9c8] ss:$16 sps:$4 sm:$0xff]  }
 0x20e   : > { %4231 = vmatprep.subr.bf16.mxu1 %v7220_v30  ;;  %v7289_v30 = vld [vmem:[%s9638_s3 + $0x9e4] ss:$16 sps:$4 sm:$0xff]  }
 0x210   : > { %3717 = vmatpush1.bf16.msra.mxu0 %v7215_v28  ;;  %v7292_v28 = vld [vmem:[%s9638_s3 + $0x9ec] ss:$16 sps:$4 sm:$0xff]  }
 0x211   : > { %4232 = vmatpush1.bf16.msra.mxu1 %v7218_v29  ;;  %3718 = vmatprep.subr.bf16.mxu0 %v7223_v35  ;;  %v7287_v29 = vld [vmem:[%s9638_s3 + $0x9e0] ss:$16 sps:$4 sm:$0xff]   ;;  %v7290_v35 = vld [vmem:[%s9638_s3 + $0x9e8] ss:$16 sps:$4 sm:$0xff]  }
 0x212   : > { %3660 = vmatmul.mubr.bf16.gmra.mrb[64].mxu0 %v8537_v42  ;;  %4233 = vmatprep.subr.bf16.mxu1 %v7226_v2  ;;  %v7293_v2 = vld [vmem:[%s9640_s5 + $0x40] sm:$0xff]  }
 0x213   : > { %4175 = vmatmul.mubr.bf16.gmra.mrb[64].mxu1 %v8537_v42  ;;  %3669 = vmatprep.mubr.bf16.mxu0 %v8548_v1  ;;  %v7238_v42 = vld [vmem:[%s9638_s3 + $0x8cc] ss:$16 sps:$4 sm:$0xff]  }
 0x214   : > { %3719 = vmatpush1.bf16.msra.mxu0 %v7221_v16  ;;  %4184 = vmatprep.mubr.bf16.mxu1 %v8548_v1  ;;  %v7233_v1 = vld [vmem:[%s9638_s3 + $0x8c0] ss:$16 sps:$4 sm:$0xff]  }
 0x215   : > { %4234 = vmatpush1.bf16.msra.mxu1 %v7224_v38  ;;  %3720 = vmatprep.subr.bf16.mxu0 %v7229_v52  ;;  %v7303_v16 = vld [vmem:[%s9640_s5 + $0xc0] sm:$0xff]   ;;  %v7295_v52 = vld [vmem:[%s9640_s5 + $0x48] sm:$0xff]  }
 0x216   : > { %4235 = vmatprep.subr.bf16.mxu1 %v7232_v3  ;;  %v7294_v38 = vld [vmem:[%s9640_s5] sm:$0xff]  }
 0x217   : > { %v7304_v3 = vld [vmem:[%s9640_s5 + $0x80] sm:$0xff]  }
 0x218   : > { %3721 = vmatpush1.bf16.msra.mxu0 %v7227_v6  ;;  %v7307_v6 = vld [vmem:[%s9640_s5 + $0xc8] sm:$0xff]  }
 0x219   : > { %4236 = vmatpush1.bf16.msra.mxu1 %v7230_v57  ;;  %3722 = vmatprep.subr.bf16.mxu0 %v7235_v19  ;;  %v7296_v57 = vld [vmem:[%s9640_s5 + $0x8] sm:$0xff]   ;;  %v7297_v19 = vld [vmem:[%s9640_s5 + $0x50] sm:$0xff]  }
 0x21a   : > { %3670 = vmatmul.mubr.bf16.gmra.mrb[68].mxu0 %v8573_v53  ;;  %4237 = vmatprep.subr.bf16.mxu1 %v7238_v42  ;;  %v7308_v42 = vld [vmem:[%s9640_s5 + $0x88] sm:$0xff]  }
 0x21b   : > { %4185 = vmatmul.mubr.bf16.gmra.mrb[68].mxu1 %v8573_v53  ;;  %3679 = vmatprep.mubr.bf16.mxu0 %v8584_v44  ;;  %v7250_v53 = vld [vmem:[%s9638_s3 + $0x90c] ss:$16 sps:$4 sm:$0xff]  }
 0x21c   : > { %3723 = vmatpush1.bf16.msra.mxu0 %v7233_v1  ;;  %4194 = vmatprep.mubr.bf16.mxu1 %v8584_v44  ;;  %v7245_v44 = vld [vmem:[%s9638_s3 + $0x900] ss:$16 sps:$4 sm:$0xff]   ;;  %v7299_v1 = vld [vmem:[%s9640_s5 + $0x58] sm:$0xff]  }
 0x21d   : > { %4238 = vmatpush1.bf16.msra.mxu1 %v7236_v18  ;;  %3724 = vmatprep.subr.bf16.mxu0 %v7241_v39  ;;  %v7310_v18 = vld [vmem:[%s9640_s5 + $0x90] sm:$0xff]   ;;  %v7300_v39 = vld [vmem:[%s9640_s5 + $0x18] sm:$0xff]  }
 0x21e   : > { %4239 = vmatprep.subr.bf16.mxu1 %v7244_v48  ;;  %v7301_v48 = vld [vmem:[%s9640_s5 + $0x60] sm:$0xff]  }
 0x220   : > { %3725 = vmatpush1.bf16.msra.mxu0 %v7239_v54  ;;  %v7306_v54 = vld [vmem:[%s9640_s5 + $0x28] sm:$0xff]  }
 0x221   : > { %4240 = vmatpush1.bf16.msra.mxu1 %v7242_v61  ;;  %3726 = vmatprep.subr.bf16.mxu0 %v7247_v5  ;;  %v7318_v61 = vld [vmem:[%s9640_s5 + $0x38] sm:$0xff]   ;;  %v7320_v5 = vld [vmem:[%s9640_s5 + $0xa8] sm:$0xff]  }
 0x222   : > { %3680 = vmatmul.mubr.bf16.gmra.mrb[72].mxu0 %v8608_v46  ;;  %4241 = vmatprep.subr.bf16.mxu1 %v7250_v53  ;;  %v7321_v53 = vld [vmem:[%s9640_s5 + $0xf0] sm:$0xff]  }
 0x223   : > { %4195 = vmatmul.mubr.bf16.gmra.mrb[72].mxu1 %v8608_v46  ;;  %3689 = vmatprep.mubr.bf16.mxu0 %v8621_v15  ;;  %v7262_v46 = vld [vmem:[%s9638_s3 + $0x94c] ss:$16 sps:$4 sm:$0xff]  }
 0x224   : > { %3727 = vmatpush1.bf16.msra.mxu0 %v7245_v44  ;;  %4204 = vmatprep.mubr.bf16.mxu1 %v8621_v15  ;;  %v7257_v15 = vld [vmem:[%s9638_s3 + $0x940] ss:$16 sps:$4 sm:$0xff]  }
 0x225   : > { %4242 = vmatpush1.bf16.msra.mxu1 %v7248_v62  ;;  %3728 = vmatprep.subr.bf16.mxu0 %v7253_v45  ;;  %v7322_v44 = vld [vmem:[%s9640_s5 + $0x140] sm:$0xff]   ;;  %v7323_v62 = vld [vmem:[%s9640_s5 + $0xb0] sm:$0xff]   ;;  %v7325_v45 = vld [vmem:[%s9640_s5 + $0xf8] sm:$0xff]  }
 0x226   : > { %4243 = vmatprep.subr.bf16.mxu1 %v7256_v33  ;;  %v7327_v33 = vld [vmem:[%s9640_s5 + $0xb8] sm:$0xff]  }
 0x228   : > { %3729 = vmatpush1.bf16.msra.mxu0 %v7251_v31  ;;  %v7330_v31 = vld [vmem:[%s9640_s5 + $0x1c0] sm:$0xff]  }
 0x229   : > { %4244 = vmatpush1.bf16.msra.mxu1 %v7254_v13  ;;  %3730 = vmatprep.subr.bf16.mxu0 %v7259_v51  ;;  %v1676_v13 = vld [vmem:[%s9639_s4] sm:$0xf] }
 0x22a   : > { %3690 = vmatmul.mubr.bf16.gmra.mrb[76].mxu0 %v8646_v17  ;;  %4245 = vmatprep.subr.bf16.mxu1 %v7262_v46  ;;  %v9261_v51 = vrot.slane %v1676_v13, %v350_v7  ;;  %v9265_v46 = vrot.slane %v1676_v13, %v358_v9 }
 0x22b   : > { %4205 = vmatmul.mubr.bf16.gmra.mrb[76].mxu1 %v8646_v17  ;;  %3699 = vmatprep.mubr.bf16.mxu0 %v8446_v0  ;;  %v7274_v17 = vld [vmem:[%s9638_s3 + $0x98c] ss:$16 sps:$4 sm:$0xff]  }
 0x22c   : > { %3731 = vmatpush1.bf16.msra.mxu0 %v7257_v15  ;;  %4214 = vmatprep.mubr.bf16.mxu1 %v8446_v0  ;;  %v7269_v0 = vld [vmem:[%s9638_s3 + $0x980] ss:$16 sps:$4 sm:$0xff]   ;;  %v9269_v15 = vrot.slane %v1676_v13, %v354_v10 }
 0x22d   : > { %4246 = vmatpush1.bf16.msra.mxu1 %v7260_v14  ;;  %3732 = vmatprep.subr.bf16.mxu0 %v7265_v60  ;;  %v9273_v14 = vrot.slane %v1676_v13, %v362_v11  ;;  %v7326_v13 = vld [vmem:[%s9640_s5 + $0x148] sm:$0xff]  }
 0x22e   : > { %4247 = vmatprep.subr.bf16.mxu1 %v7268_v21 }
 0x230   : > { %3733 = vmatpush1.bf16.msra.mxu0 %v7263_v59 }
 0x231   : > { %4248 = vmatpush1.bf16.msra.mxu1 %v7266_v63  ;;  %3734 = vmatprep.subr.bf16.mxu0 %v7271_v40 }
 0x232   : > { %3700 = vmatmul.mubr.bf16.gmra.mrb[80].mxu0 %v8424_v50  ;;  %4249 = vmatprep.subr.bf16.mxu1 %v7274_v17 }
 0x233   : > { %4215 = vmatmul.mubr.bf16.gmra.mrb[80].mxu1 %v8424_v50  ;;  %3742 = vmatprep.mubr.bf16.mxu0 %v8313_v41  ;;  %v7286_v50 = vld [vmem:[%s9638_s3 + $0x9cc] ss:$16 sps:$4 sm:$0xff]  }
 0x234   : > { %3735 = vmatpush1.bf16.msra.mxu0 %v7269_v0  ;;  %4257 = vmatprep.mubr.bf16.mxu1 %v8313_v41  ;;  %v7281_v41 = vld [vmem:[%s9638_s3 + $0x9c0] ss:$16 sps:$4 sm:$0xff]  }
 0x235   : > { %4250 = vmatpush1.bf16.msra.mxu1 %v7272_v4  ;;  %3736 = vmatprep.subr.bf16.mxu0 %v7277_v22 }
 0x236   : > { %4251 = vmatprep.subr.bf16.mxu1 %v7280_v49 }
 0x238   : > { %3737 = vmatpush1.bf16.msra.mxu0 %v7275_v23 }
 0x239   : > { %4252 = vmatpush1.bf16.msra.mxu1 %v7278_v27  ;;  %3738 = vmatprep.subr.bf16.mxu0 %v7283_v56 }
 0x23a   : > { %4253 = vmatprep.subr.bf16.mxu1 %v7286_v50 }
 0x23c   : > { %3739 = vmatpush1.bf16.msra.mxu0 %v7281_v41 }
 0x23d   : > { %4254 = vmatpush1.bf16.msra.mxu1 %v7284_v43  ;;  %3740 = vmatprep.subr.bf16.mxu0 %v7289_v30 }
 0x23e   : > { %4255 = vmatprep.subr.bf16.mxu1 %v7292_v28 }
 0x240   : > { %3741 = vmatpush1.bf16.msra.mxu0 %v7287_v29 }
 0x241   : > { %4256 = vmatpush1.bf16.msra.mxu1 %v7290_v35  ;;  %6236 = vmatprep.subr.bf16.mxu0 %v7293_v2 }
 0x242   : > { %6258 = vmatprep.subr.bf16.mxu1 %v7303_v16 }
 0x243   : > { %3743 = vmatmul.mubr.bf16.vlgmr.msra.gmra.mrb[56].mxu0 %v8310_v47 }
 0x244   : > { %4258 = vmatmul.mubr.bf16.vlgmr.msra.gmra.mrb[56].mxu1 %v8310_v47  ;;  %3752 = vmatprep.mubr.bf16.mxu0 %v8334_v20  ;;  %v7309_v47 = vld [vmem:[%s9640_s5 + $0xd0] sm:$0xff]  }
 0x245   : > { %4267 = vmatprep.mubr.bf16.mxu1 %v8334_v20  ;;  %6237 = vmatpush3.bf16.msra.mxu0 %v7294_v38  ;;  %v7298_v20 = vld [vmem:[%s9640_s5 + $0x10] sm:$0xff]  }
 0x246   : > { %6238 = vmatprep.subr.bf16.mxu0 %v7295_v52  ;;  %6259 = vmatpush3.bf16.msra.mxu1 %v7304_v3 }
 0x247   : > { %6260 = vmatprep.subr.bf16.mxu1 %v7307_v6 }
 0x249   : > { %6239 = vmatpush3.bf16.msra.mxu0 %v7296_v57 }
 0x24a   : > { %6240 = vmatprep.subr.bf16.mxu0 %v7297_v19  ;;  %6261 = vmatpush3.bf16.msra.mxu1 %v7308_v42 }
 0x24b   : > { %3753 = vmatmul.mubr.bf16.gmra.mrb[60].mxu0 %v8330_v37  ;;  %6262 = vmatprep.subr.bf16.mxu1 %v7309_v47 }
 0x24c   : > { %4268 = vmatmul.mubr.bf16.gmra.mrb[60].mxu1 %v8330_v37  ;;  %3762 = vmatprep.mubr.bf16.mxu0 %v8355_v55  ;;  %v7302_v37 = vld [vmem:[%s9640_s5 + $0x20] sm:$0xff]  }
 0x24d   : > { %4277 = vmatprep.mubr.bf16.mxu1 %v8355_v55  ;;  %6241 = vmatpush3.bf16.msra.mxu0 %v7298_v20  ;;  %v7305_v55 = vld [vmem:[%s9640_s5 + $0x68] sm:$0xff]  }
 0x24e   : > { %6242 = vmatprep.subr.bf16.mxu0 %v7299_v1  ;;  %6263 = vmatpush3.bf16.msra.mxu1 %v7310_v18 }
 0x251   : > { %6243 = vmatpush3.bf16.msra.mxu0 %v7300_v39 }
 0x252   : > { %6244 = vmatprep.subr.bf16.mxu0 %v7301_v48 }
 0x253   : > { %3763 = vmatmul.mubr.bf16.gmra.mrb[64].mxu0 %v8348_v25 }
 0x254   : > { %4278 = vmatmul.mubr.bf16.gmra.mrb[64].mxu1 %v8348_v25  ;;  %3772 = vmatprep.mubr.bf16.mxu0 %v8373_v32  ;;  %v7313_v25 = vld [vmem:[%s9640_s5 + $0xd8] sm:$0xff]  }
 0x255   : > { %4287 = vmatprep.mubr.bf16.mxu1 %v8373_v32  ;;  %6245 = vmatpush3.bf16.msra.mxu0 %v7302_v37  ;;  %v7311_v32 = vld [vmem:[%s9640_s5 + $0x70] sm:$0xff]  }
 0x256   : > { %6246 = vmatprep.subr.bf16.mxu0 %v7305_v55  ;;  %6264 = vmatprep.subr.bf16.mxu1 %v7313_v25 }
 0x259   : > { %6247 = vmatpush3.bf16.msra.mxu0 %v7306_v54 }
 0x25a   : > { %6248 = vmatprep.subr.bf16.mxu0 %v7311_v32 }
 0x25b   : > { %3773 = vmatmul.mubr.bf16.gmra.mrb[68].mxu0 %v8370_v12 }
 0x25c   : > { %4288 = vmatmul.mubr.bf16.gmra.mrb[68].mxu1 %v8370_v12  ;;  %3782 = vmatprep.mubr.bf16.mxu0 %v8396_v34  ;;  %v7314_v12 = vld [vmem:[%s9640_s5 + $0x98] sm:$0xff]  }
 0x25d   : > { %4297 = vmatprep.mubr.bf16.mxu1 %v8396_v34  ;;  %6265 = vmatpush3.bf16.msra.mxu1 %v7314_v12  ;;  %v7317_v34 = vld [vmem:[%s9640_s5 + $0xa0] sm:$0xff]  }
 0x263   : > { %3783 = vmatmul.mubr.bf16.gmra.mrb[72].mxu0 %v8392_v24 }
 0x264   : > { %4298 = vmatmul.mubr.bf16.gmra.mrb[72].mxu1 %v8392_v24  ;;  %3792 = vmatprep.mubr.bf16.mxu0 %v8412_v58  ;;  %v7315_v24 = vld [vmem:[%s9640_s5 + $0xe0] sm:$0xff]  }
 0x265   : > { %4307 = vmatprep.mubr.bf16.mxu1 %v8412_v58  ;;  %6266 = vmatprep.subr.bf16.mxu1 %v7315_v24  ;;  %v7319_v58 = vld [vmem:[%s9640_s5 + $0xe8] sm:$0xff]  }
 0x266   : > { %6267 = vmatpush3.bf16.msra.mxu1 %v7317_v34 }
 0x267   : > { %6268 = vmatprep.subr.bf16.mxu1 %v7319_v58 }
 0x26a   : > { %6269 = vmatpush3.bf16.msra.mxu1 %v7320_v5 }
 0x26b   : > { %3793 = vmatmul.mubr.bf16.gmra.mrb[76].mxu0 %v8407_v36  ;;  %6270 = vmatprep.subr.bf16.mxu1 %v7321_v53 }
 0x26c   : > { %4308 = vmatmul.mubr.bf16.gmra.mrb[76].mxu1 %v8407_v36  ;;  %3802 = vmatprep.mubr.bf16.mxu0 %v7469_v8  ;;  %v7316_v36 = vld [vmem:[%s9640_s5 + $0x78] sm:$0xff]  }
 0x26d   : > { %4317 = vmatprep.mubr.bf16.mxu1 %v7469_v8 }
 0x26e   : > { %6271 = vmatpush3.bf16.msra.mxu1 %v7323_v62 }
 0x26f   : > { %6272 = vmatprep.subr.bf16.mxu1 %v7325_v45 }
 0x272   : > { %6273 = vmatpush3.bf16.msra.mxu1 %v7327_v33 }
 0x273   : > { %3803 = vmatmul.mubr.bf16.gmra.mrb[80].mxu0 %v7469_v8  ;;  %6302 = vmatprep.subr.bf16.mxu1 %v7330_v31 }
 0x274   : > { %4318 = vmatmul.mubr.bf16.gmra.mrb[80].mxu1 %v7469_v8  ;;  %v7312_v8 = vld [vmem:[%s9640_s5 + $0x30] sm:$0xff]  }
 0x275   : > { %6249 = vmatpush3.bf16.msra.mxu0 %v7312_v8 }
 0x276   : > { %6250 = vmatprep.subr.bf16.mxu0 %v7316_v36 }
 0x279   : > { %6251 = vmatpush3.bf16.msra.mxu0 %v7318_v61 }
 0x27a   : > { %6280 = vmatprep.subr.bf16.mxu0 %v7322_v44  ;;  %v7324_v44 = vld [vmem:[%s9640_s5 + $0x100] sm:$0xff]  }
 0x316   : > { %v3744_v60 = vpop.f32.mrb[56].mxu0 }
 0x317   : > { %v6390_v21 = vadd.f32 %v3744_v60, %v9261_v51  ;;  %v4259_v59 = vpop.f32.mrb[56].mxu1  ;;  %v3746_v63 = vpop.f32.mrb[57].mxu0 }
 0x318   : > { %v6418_v7 = vadd.f32 %v4259_v59, %v9265_v46  ;;  %v6391_v40 = vadd.f32 %v3746_v63, %v9269_v15  ;;  %v4261_v17 = vpop.f32.mrb[57].mxu1  ;;  %v3748_v9 = vpop.f32.mrb[58].mxu0 }
 0x319   : > { %v4328_v0 = vmax.f32 %v6390_v21, 0.0  ;;  %v6419_v4 = vadd.f32 %v4261_v17, %v9273_v14  ;;  %v6392_v10 = vadd.f32 %v3748_v9, %v9261_v51  ;;  %v4263_v22 = vpop.f32.mrb[58].mxu1  ;;  %v3750_v26 = vpop.f32.mrb[59].mxu0 }
 0x31a   : > { %v4330_v11 = vmax.f32 %v6418_v7, 0.0  ;;  %v4329_v49 = vmax.f32 %v6391_v40, 0.0  ;;  %v6420_v23 = vadd.f32 %v4263_v22, %v9265_v46  ;;  %v6393_v27 = vadd.f32 %v3750_v26, %v9269_v15  ;;  %v4265_v56 = vpop.f32.mrb[59].mxu1  ;;  %v7328_v22 = vld [vmem:[%s9640_s5 + $0x108] sm:$0xff]  }
 0x31b   : > { %v4331_v50 = vmax.f32 %v6419_v4, 0.0  ;;  %v4332_v41 = vmax.f32 %v6392_v10, 0.0  ;;  %v6421_v43 = vadd.f32 %v4265_v56, %v9273_v14 }
 0x31c   : > { %v4384_v30 = vmax.f32 %v4328_v0, %v4330_v11  ;;  %v4334_v28 = vmax.f32 %v6420_v23, 0.0  ;;  %v4333_v29 = vmax.f32 %v6393_v27, 0.0 }
 0x31d   : > { %v4385_v35 = vmax.f32 %v4329_v49, %v4331_v50  ;;  %v4335_v2 = vmax.f32 %v6421_v43, 0.0  ;;  %v7329_v50 = vld [vmem:[%s9640_s5 + $0x150] sm:$0xff]  }
 0x31e   : > { %v4386_v16 = vmax.f32 %v4332_v41, %v4334_v28  ;;  %v3754_v38 = vpop.f32.mrb[60].mxu0 }
 0x31f   : > { %v4387_v52 = vmax.f32 %v4333_v29, %v4335_v2  ;;  %v6394_v3 = vadd.f32 %v3754_v38, %v9261_v51  ;;  %v4269_v6 = vpop.f32.mrb[60].mxu1  ;;  %v3756_v57 = vpop.f32.mrb[61].mxu0 }
 0x320   : > { %v4412_v19 = vmax.f32 %v4384_v30, %v4386_v16  ;;  %v6422_v42 = vadd.f32 %v4269_v6, %v9265_v46  ;;  %v6395_v47 = vadd.f32 %v3756_v57, %v9269_v15  ;;  %v4271_v20 = vpop.f32.mrb[61].mxu1  ;;  %v3758_v1 = vpop.f32.mrb[62].mxu0  ;;  %v7331_v6 = vld [vmem:[%s9640_s5 + $0x110] sm:$0xff]   ;;  %v7332_v57 = vld [vmem:[%s9640_s5 + $0x180] sm:$0xff]  }
 0x321   : > { %v4336_v18 = vmax.f32 %v6394_v3, 0.0  ;;  %v6423_v39 = vadd.f32 %v4271_v20, %v9273_v14  ;;  %v6396_v48 = vadd.f32 %v3758_v1, %v9261_v51  ;;  %v4273_v37 = vpop.f32.mrb[62].mxu1  ;;  %v3760_v55 = vpop.f32.mrb[63].mxu0  ;;  %v4413_v54 = vmax.f32 %v4385_v35, %v4387_v52  ;;  %v7333_v1 = vld [vmem:[%s9640_s5 + $0x158] sm:$0xff]  }
 0x322   : > { %v4338_v25 = vmax.f32 %v6422_v42, 0.0  ;;  %v4337_v12 = vmax.f32 %v6395_v47, 0.0  ;;  %v6424_v32 = vadd.f32 %v4273_v37, %v9265_v46  ;;  %v4275_v24 = vpop.f32.mrb[63].mxu1  ;;  %v6397_v36 = vadd.f32 %v3760_v55, %v9269_v15 }
 0x323   : > { %v4339_v8 = vmax.f32 %v6423_v39, 0.0  ;;  %v4340_v34 = vmax.f32 %v6396_v48, 0.0  ;;  %v6425_v58 = vadd.f32 %v4275_v24, %v9273_v14  ;;  %v4427_v53 = vpack.c.bf16 %v4413_v54, %v4413_v54 }
 0x324   : > { %v4388_v61 = vmax.f32 %v4336_v18, %v4338_v25  ;;  %v4342_v5 = vmax.f32 %v6424_v32, 0.0  ;;  %v4426_v62 = vpack.c.bf16 %v4412_v19, %v4412_v19  ;;  %v4341_v33 = vmax.f32 %v6397_v36, 0.0  ;;  %v7334_v18 = vld [vmem:[%s9640_s5 + $0x1c8] sm:$0xff]   ;;  %v7335_v36 = vld [vmem:[%s9640_s5 + $0x118] sm:$0xff]  }
 0x325   : > { %v4389_v45 = vmax.f32 %v4337_v12, %v4339_v8  ;;  %v4343_v31 = vmax.f32 %v6425_v58, 0.0  ;;  %5375 = vmatprep.mubr.bf16.mxu0 %v4427_v53  ;;  %v7336_v58 = vld [vmem:[%s9640_s5 + $0x188] sm:$0xff]  }
 0x326   : > { %v4390_v60 = vmax.f32 %v4340_v34, %v4342_v5  ;;  %v3764_v21 = vpop.f32.mrb[64].mxu0  ;;  %5376 = vmatmul.mubr.bf16.vlgmr.msra.gmra.mrb[84].mxu0 %v4426_v62 }
 0x327   : > { %v4391_v59 = vmax.f32 %v4341_v33, %v4343_v31  ;;  %v6398_v63 = vadd.f32 %v3764_v21, %v9261_v51  ;;  %v4279_v7 = vpop.f32.mrb[64].mxu1  ;;  %v3766_v40 = vpop.f32.mrb[65].mxu0  ;;  %6281 = vmatpush3.bf16.msra.mxu0 %v7324_v44  ;;  %v7338_v31 = vld [vmem:[%s9640_s5 + $0x1d0] sm:$0xff]  }
 0x328   : > { %v4414_v17 = vmax.f32 %v4388_v61, %v4390_v60  ;;  %v6426_v9 = vadd.f32 %v4279_v7, %v9265_v46  ;;  %v6399_v0 = vadd.f32 %v3766_v40, %v9269_v15  ;;  %v4281_v4 = vpop.f32.mrb[65].mxu1  ;;  %v3768_v10 = vpop.f32.mrb[66].mxu0  ;;  %6282 = vmatprep.subr.bf16.mxu0 %v7326_v13 }
 0x329   : > { %v4344_v26 = vmax.f32 %v6398_v63, 0.0  ;;  %v6427_v11 = vadd.f32 %v4281_v4, %v9273_v14  ;;  %v6400_v49 = vadd.f32 %v3768_v10, %v9261_v51  ;;  %v4283_v23 = vpop.f32.mrb[66].mxu1  ;;  %v3770_v27 = vpop.f32.mrb[67].mxu0  ;;  %v4415_v56 = vmax.f32 %v4389_v45, %v4391_v59  ;;  %v7337_v45 = vld [vmem:[%s9640_s5 + $0x160] sm:$0xff]  }
 0x32a   : > { %v4346_v41 = vmax.f32 %v6426_v9, 0.0  ;;  %v4345_v43 = vmax.f32 %v6399_v0, 0.0  ;;  %v6428_v30 = vadd.f32 %v4283_v23, %v9265_v46  ;;  %v4285_v28 = vpop.f32.mrb[67].mxu1  ;;  %v6401_v2 = vadd.f32 %v3770_v27, %v9269_v15  ;;  %v7339_v10 = vld [vmem:[%s9640_s5 + $0x120] sm:$0xff]   ;;  %v7341_v23 = vld [vmem:[%s9640_s5 + $0x168] sm:$0xff]   ;;  %v7342_v27 = vld [vmem:[%s9640_s5 + $0x1d8] sm:$0xff]  }
 0x32b   : > { %v4347_v29 = vmax.f32 %v6427_v11, 0.0  ;;  %v4348_v35 = vmax.f32 %v6400_v49, 0.0  ;;  %v6429_v16 = vadd.f32 %v4285_v28, %v9273_v14  ;;  %6283 = vmatpush3.bf16.msra.mxu0 %v7328_v22  ;;  %v4429_v3 = vpack.c.bf16 %v4415_v56, %v4415_v56  ;;  %v7340_v22 = vld [vmem:[%s9640_s5 + $0x190] sm:$0xff]  }
 0x32c   : > { %v4392_v38 = vmax.f32 %v4344_v26, %v4346_v41  ;;  %v4350_v52 = vmax.f32 %v6428_v30, 0.0  ;;  %v4428_v19 = vpack.c.bf16 %v4414_v17, %v4414_v17  ;;  %v4349_v47 = vmax.f32 %v6401_v2, 0.0  ;;  %6284 = vmatprep.subr.bf16.mxu0 %v7329_v50 }
 0x32d   : > { %v4393_v42 = vmax.f32 %v4345_v43, %v4347_v29  ;;  %v4351_v20 = vmax.f32 %v6429_v16, 0.0  ;;  %5415 = vmatprep.mubr.bf16.mxu1 %v4429_v3  ;;  %v7344_v3 = vld [vmem:[%s9640_s5 + $0x198] sm:$0xff]  }
 0x32e   : > { %v4394_v39 = vmax.f32 %v4348_v35, %v4350_v52  ;;  %v3774_v48 = vpop.f32.mrb[68].mxu0  ;;  %5416 = vmatmul.mubr.bf16.vlgmr.msra.gmra.mrb[84].mxu1 %v4428_v19  ;;  %v7343_v52 = vld [vmem:[%s9640_s5 + $0x128] sm:$0xff]  }
 0x32f   : > { %v4395_v37 = vmax.f32 %v4349_v47, %v4351_v20  ;;  %v6402_v55 = vadd.f32 %v3774_v48, %v9261_v51  ;;  %v4289_v54 = vpop.f32.mrb[68].mxu1  ;;  %v3776_v25 = vpop.f32.mrb[69].mxu0  ;;  %6285 = vmatpush3.bf16.msra.mxu0 %v7331_v6  ;;  %6303 = vmatpush3.bf16.msra.mxu1 %v7332_v57  ;;  %v7345_v20 = vld [vmem:[%s9640_s5 + $0x170] sm:$0xff]  }
 0x330   : > { %v9324_v12 = vmax.f32 %v4392_v38, %v4394_v39  ;;  %v6430_v32 = vadd.f32 %v4289_v54, %v9265_v46  ;;  %v6403_v24 = vadd.f32 %v3776_v25, %v9269_v15  ;;  %v4291_v8 = vpop.f32.mrb[69].mxu1  ;;  %v3778_v34 = vpop.f32.mrb[70].mxu0  ;;  %6286 = vmatprep.subr.bf16.mxu0 %v7333_v1  ;;  %6304 = vmatprep.subr.bf16.mxu1 %v7334_v18  ;;  %v7346_v1 = vld [vmem:[%s9640_s5 + $0x1e0] sm:$0xff]  }
 0x331   : > { %v4352_v61 = vmax.f32 %v6402_v55, 0.0  ;;  %v6431_v5 = vadd.f32 %v4291_v8, %v9273_v14  ;;  %v6404_v53 = vadd.f32 %v3778_v34, %v9261_v51  ;;  %v4293_v44 = vpop.f32.mrb[70].mxu1  ;;  %v3780_v62 = vpop.f32.mrb[71].mxu0  ;;  %v4417_v33 = vmax.f32 %v4393_v42, %v4395_v37 }
 0x332   : > { %v4354_v13 = vmax.f32 %v6430_v32, 0.0  ;;  %v4353_v60 = vmax.f32 %v6403_v24, 0.0  ;;  %v6432_v21 = vadd.f32 %v4293_v44, %v9265_v46  ;;  %v4295_v59 = vpop.f32.mrb[71].mxu1  ;;  %v6405_v40 = vadd.f32 %v3780_v62, %v9269_v15  ;;  %v7349_v62 = vld [vmem:[%s9640_s5 + $0x178] sm:$0xff]  }
 0x333   : > { %v4355_v63 = vmax.f32 %v6431_v5, 0.0  ;;  %v4356_v7 = vmax.f32 %v6404_v53, 0.0  ;;  %v6433_v17 = vadd.f32 %v4295_v59, %v9273_v14  ;;  %6287 = vmatpush3.bf16.msra.mxu0 %v7335_v36  ;;  %6305 = vmatpush3.bf16.msra.mxu1 %v7336_v58  ;;  %v4431_v4 = vpack.c.bf16 %v4417_v33, %v4417_v33  ;;  %v7347_v58 = vld [vmem:[%s9640_s5 + $0x130] sm:$0xff]  }
 0x334   : > { %v4396_v9 = vmax.f32 %v4352_v61, %v4354_v13  ;;  %v4358_v0 = vmax.f32 %v6432_v21, 0.0  ;;  %v4357_v11 = vmax.f32 %v6405_v40, 0.0  ;;  %6288 = vmatprep.subr.bf16.mxu0 %v7337_v45  ;;  %6306 = vmatprep.subr.bf16.mxu1 %v7338_v31  ;;  %v7348_v61 = vld [vmem:[%s9640_s5 + $0x1a0] sm:$0xff]   ;;  %v7350_v45 = vld [vmem:[%s9640_s5 + $0x1e8] sm:$0xff]  }
 0x335   : > { %v4397_v26 = vmax.f32 %v4353_v60, %v4355_v63  ;;  %v4359_v49 = vmax.f32 %v6433_v17, 0.0  ;;  %5455 = vmatprep.mubr.bf16.mxu0 %v4431_v4  ;;  %v7352_v4 = vld [vmem:[%s9640_s5 + $0x1a8] sm:$0xff]  }
 0x336   : > { %v4398_v56 = vmax.f32 %v4356_v7, %v4358_v0  ;;  %v3784_v50 = vpop.f32.mrb[72].mxu0  ;;  %v7351_v0 = vld [vmem:[%s9640_s5 + $0x138] sm:$0xff]  }
 0x337   : > { %v4399_v41 = vmax.f32 %v4357_v11, %v4359_v49  ;;  %v6406_v43 = vadd.f32 %v3784_v50, %v9261_v51  ;;  %v4299_v30 = vpop.f32.mrb[72].mxu1  ;;  %v3786_v28 = vpop.f32.mrb[73].mxu0  ;;  %6289 = vmatpush3.bf16.msra.mxu0 %v7339_v10  ;;  %6307 = vmatpush3.bf16.msra.mxu1 %v7340_v22 }
 0x338   : > { %v9358_v29 = vmax.f32 %v4396_v9, %v4398_v56  ;;  %v6434_v35 = vadd.f32 %v4299_v30, %v9265_v46  ;;  %v6407_v2 = vadd.f32 %v3786_v28, %v9269_v15  ;;  %v4301_v16 = vpop.f32.mrb[73].mxu1  ;;  %v3788_v38 = vpop.f32.mrb[74].mxu0  ;;  %6290 = vmatprep.subr.bf16.mxu0 %v7341_v23  ;;  %6308 = vmatprep.subr.bf16.mxu1 %v7342_v27  ;;  %v7353_v23 = vld [vmem:[%s9640_s5 + $0x1f0] sm:$0xff]   ;;  %v7354_v27 = vld [vmem:[%s9640_s5 + $0x240] sm:$0xff]  }
 0x339   : > { %v4360_v6 = vmax.f32 %v6406_v43, 0.0  ;;  %v6435_v57 = vadd.f32 %v4301_v16, %v9273_v14  ;;  %v6408_v19 = vadd.f32 %v3788_v38, %v9261_v51  ;;  %v4303_v42 = vpop.f32.mrb[74].mxu1  ;;  %v3790_v47 = vpop.f32.mrb[75].mxu0  ;;  %v4419_v18 = vmax.f32 %v4397_v26, %v4399_v41 }
 0x33a   : > { %v4362_v39 = vmax.f32 %v6434_v35, 0.0  ;;  %v4361_v48 = vmax.f32 %v6407_v2, 0.0  ;;  %v6436_v37 = vadd.f32 %v4303_v42, %v9265_v46  ;;  %v4305_v55 = vpop.f32.mrb[75].mxu1  ;;  %v6409_v32 = vadd.f32 %v3790_v47, %v9269_v15 }
 0x33b   : > { %v4363_v54 = vmax.f32 %v6435_v57, 0.0  ;;  %v4364_v25 = vmax.f32 %v6408_v19, 0.0  ;;  %v6437_v24 = vadd.f32 %v4305_v55, %v9273_v14  ;;  %6291 = vmatpush3.bf16.msra.mxu0 %v7343_v52  ;;  %6309 = vmatpush3.bf16.msra.mxu1 %v7344_v3  ;;  %v4433_v36 = vpack.c.bf16 %v4419_v18, %v4419_v18  ;;  %v7356_v57 = vld [vmem:[%s9640_s5 + $0x200] sm:$0xff]  }
 0x33c   : > { %v4400_v8 = vmax.f32 %v4360_v6, %v4362_v39  ;;  %v4366_v34 = vmax.f32 %v6436_v37, 0.0  ;;  %v4365_v53 = vmax.f32 %v6409_v32, 0.0  ;;  %6292 = vmatprep.subr.bf16.mxu0 %v7345_v20  ;;  %6310 = vmatprep.subr.bf16.mxu1 %v7346_v1  ;;  %v4430_v38 = vpack.c.bf16 %v9324_v12, %v9324_v12  ;;  %v7355_v6 = vld [vmem:[%s9640_s5 + $0x1b0] sm:$0xff]   ;;  %v7357_v12 = vld [vmem:[%s9640_s5 + $0x1f8] sm:$0xff]   ;;  %v7358_v39 = vld [vmem:[%s9640_s5 + $0x248] sm:$0xff]  }
 0x33d   : > { %v4401_v5 = vmax.f32 %v4361_v48, %v4363_v54  ;;  %v4367_v44 = vmax.f32 %v6437_v24, 0.0  ;;  %5495 = vmatprep.mubr.bf16.mxu1 %v4433_v36  ;;  %v7359_v36 = vld [vmem:[%s9640_s5 + $0x1b8] sm:$0xff]  }
 0x33e   : > { %v4402_v33 = vmax.f32 %v4364_v25, %v4366_v34  ;;  %v3794_v31 = vpop.f32.mrb[76].mxu0 }
 0x33f   : > { %v4403_v13 = vmax.f32 %v4365_v53, %v4367_v44  ;;  %v6410_v60 = vadd.f32 %v3794_v31, %v9261_v51  ;;  %v4309_v21 = vpop.f32.mrb[76].mxu1  ;;  %v3796_v59 = vpop.f32.mrb[77].mxu0  ;;  %6293 = vmatpush3.bf16.msra.mxu0 %v7347_v58  ;;  %6311 = vmatpush3.bf16.msra.mxu1 %v7348_v61  ;;  %v7360_v58 = vld [vmem:[%s9640_s5 + $0x208] sm:$0xff]  }
 0x340   : > { %v9392_v63 = vmax.f32 %v4400_v8, %v4402_v33  ;;  %v6438_v7 = vadd.f32 %v4309_v21, %v9265_v46  ;;  %v6411_v40 = vadd.f32 %v3796_v59, %v9269_v15  ;;  %v4311_v17 = vpop.f32.mrb[77].mxu1  ;;  %v3798_v9 = vpop.f32.mrb[78].mxu0  ;;  %6294 = vmatprep.subr.bf16.mxu0 %v7349_v62  ;;  %6312 = vmatprep.subr.bf16.mxu1 %v7350_v45  ;;  %v7361_v45 = vld [vmem:[%s9640_s5 + $0x250] sm:$0xff]   ;;  %v7362_v33 = vld [vmem:[%s9640_s5 + $0x2c0] sm:$0xff]  }
 0x341   : > { %v4368_v10 = vmax.f32 %v6410_v60, 0.0  ;;  %v6439_v22 = vadd.f32 %v4311_v17, %v9273_v14  ;;  %v6412_v26 = vadd.f32 %v3798_v9, %v9261_v51  ;;  %v4313_v11 = vpop.f32.mrb[78].mxu1  ;;  %v3800_v49 = vpop.f32.mrb[79].mxu0  ;;  %v4421_v56 = vmax.f32 %v4401_v5, %v4403_v13 }
 0x342   : > { %v4370_v50 = vmax.f32 %v6438_v7, 0.0  ;;  %v4369_v41 = vmax.f32 %v6411_v40, 0.0  ;;  %v6440_v43 = vadd.f32 %v4313_v11, %v9265_v46  ;;  %v4315_v30 = vpop.f32.mrb[79].mxu1  ;;  %v6413_v2 = vadd.f32 %v3800_v49, %v9269_v15  ;;  %v7366_v49 = vld [vmem:[%s9640_s5 + $0x2c8] sm:$0xff]  }
 0x343   : > { %v4371_v28 = vmax.f32 %v6439_v22, 0.0  ;;  %v4372_v35 = vmax.f32 %v6412_v26, 0.0  ;;  %v6441_v16 = vadd.f32 %v4315_v30, %v9273_v14  ;;  %6295 = vmatpush3.bf16.msra.mxu0 %v7351_v0  ;;  %6313 = vmatpush3.bf16.msra.mxu1 %v7352_v4  ;;  %v4435_v20 = vpack.c.bf16 %v4421_v56, %v4421_v56  ;;  %v7367_v56 = vld [vmem:[%s9640_s5 + $0x218] sm:$0xff]  }
 0x344   : > { %v4404_v52 = vmax.f32 %v4368_v10, %v4370_v50  ;;  %v4374_v3 = vmax.f32 %v6440_v43, 0.0  ;;  %v4373_v42 = vmax.f32 %v6413_v2, 0.0  ;;  %6314 = vmatprep.subr.bf16.mxu1 %v7353_v23  ;;  %6324 = vmatprep.subr.bf16.mxu0 %v7354_v27  ;;  %v4432_v9 = vpack.c.bf16 %v9358_v29, %v9358_v29  ;;  %v7363_v10 = vld [vmem:[%s9640_s5 + $0x210] sm:$0xff]   ;;  %v7365_v29 = vld [vmem:[%s9640_s5 + $0x258] sm:$0xff]   ;;  %v7368_v50 = vld [vmem:[%s9640_s5 + $0x288] sm:$0xff]  }
 0x345   : > { %v4405_v19 = vmax.f32 %v4369_v41, %v4371_v28  ;;  %v4375_v47 = vmax.f32 %v6441_v16, 0.0  ;;  %v7369_v41 = vld [vmem:[%s9640_s5 + $0x260] sm:$0xff]   ;;  %v7370_v43 = vld [vmem:[%s9640_s5 + $0x2d0] sm:$0xff]   ;;  %v7373_v2 = vld [vmem:[%s9640_s5 + $0x268] sm:$0xff]  }
 0x346   : > { %v4406_v1 = vmax.f32 %v4372_v35, %v4374_v3  ;;  %v3804_v18 = vpop.f32.mrb[80].mxu0  ;;  %5456 = vmatmul.mubr.bf16.vlgmr.msra.gmra.mrb[88].mxu0 %v4430_v38  ;;  %v7371_v28 = vld [vmem:[%s9640_s5 + $0x220] sm:$0xff]   ;;  %v7372_v35 = vld [vmem:[%s9640_s5 + $0x290] sm:$0xff]   ;;  %v7374_v16 = vld [vmem:[%s9640_s5 + $0x2d8] sm:$0xff]  }
 0x347   : > { %v4407_v48 = vmax.f32 %v4373_v42, %v4375_v47  ;;  %v6414_v37 = vadd.f32 %v3804_v18, %v9261_v51  ;;  %v4319_v55 = vpop.f32.mrb[80].mxu1  ;;  %v3806_v54 = vpop.f32.mrb[81].mxu0  ;;  %6315 = vmatpush3.bf16.msra.mxu1 %v7355_v6  ;;  %6325 = vmatpush3.bf16.msra.mxu0 %v7356_v57  ;;  %v7375_v38 = vld [vmem:[%s9640_s5 + $0x228] sm:$0xff]   ;;  %v7377_v3 = vld [vmem:[%s9640_s5 + $0x270] sm:$0xff]   ;;  %v7378_v6 = vld [vmem:[%s9640_s5 + $0x2e0] sm:$0xff]  }
 0x348   : > { %v9428_v25 = vmax.f32 %v4404_v52, %v4406_v1  ;;  %v6442_v32 = vadd.f32 %v4319_v55, %v9265_v46  ;;  %v6415_v24 = vadd.f32 %v3806_v54, %v9269_v15  ;;  %v4321_v8 = vpop.f32.mrb[81].mxu1  ;;  %v3808_v34 = vpop.f32.mrb[82].mxu0  ;;  %5535 = vmatprep.mubr.bf16.mxu0 %v4435_v20  ;;  %6316 = vmatprep.subr.bf16.mxu1 %v7357_v12  ;;  %v7376_v52 = vld [vmem:[%s9640_s5 + $0x298] sm:$0xff]   ;;  %v7379_v57 = vld [vmem:[%s9640_s5 + $0x230] sm:$0xff]   ;;  %v7382_v47 = vld [vmem:[%s9640_s5 + $0x2e8] sm:$0xff]  }
 0x349   : > { %v4376_v61 = vmax.f32 %v6414_v37, 0.0  ;;  %v6443_v5 = vadd.f32 %v4321_v8, %v9273_v14  ;;  %v6416_v53 = vadd.f32 %v3808_v34, %v9261_v51  ;;  %v4323_v44 = vpop.f32.mrb[82].mxu1  ;;  %v3810_v62 = vpop.f32.mrb[83].mxu0  ;;  %v4423_v31 = vmax.f32 %v4405_v19, %v4407_v48  ;;  %6326 = vmatprep.subr.bf16.mxu0 %v7358_v39  ;;  %v7380_v19 = vld [vmem:[%s9640_s5 + $0x2a0] sm:$0xff]   ;;  %v7381_v42 = vld [vmem:[%s9640_s5 + $0x278] sm:$0xff]   ;;  %v7384_v12 = vld [vmem:[%s9640_s5 + $0x2a8] sm:$0xff]  }
 0x34a   : > { %v4378_v13 = vmax.f32 %v6442_v32, 0.0  ;;  %v4377_v60 = vmax.f32 %v6415_v24, 0.0  ;;  %v6444_v21 = vadd.f32 %v4323_v44, %v9265_v46  ;;  %v4325_v59 = vpop.f32.mrb[83].mxu1  ;;  %v6417_v40 = vadd.f32 %v3810_v62, %v9269_v15  ;;  %v7364_v46 = vld [vmem:[%s9640_s5 + $0x280] sm:$0xff]   ;;  %v7383_v20 = vld [vmem:[%s9640_s5 + $0x238] sm:$0xff]   ;;  %v7385_v1 = vld [vmem:[%s9640_s5 + $0x2f0] sm:$0xff]  }
 0x34b   : > { %v4379_v7 = vmax.f32 %v6443_v5, 0.0  ;;  %v4380_v51 = vmax.f32 %v6416_v53, 0.0  ;;  %v6445_v17 = vadd.f32 %v4325_v59, %v9273_v14  ;;  %6317 = vmatpush3.bf16.msra.mxu1 %v7359_v36  ;;  %6327 = vmatpush3.bf16.msra.mxu0 %v7360_v58  ;;  %v4437_v14 = vpack.c.bf16 %v4423_v31, %v4423_v31  ;;  %v7386_v18 = vld [vmem:[%s9640_s5 + $0x340] sm:$0xff]   ;;  %v7387_v39 = vld [vmem:[%s9640_s5 + $0x2b0] sm:$0xff]   ;;  %v7389_v55 = vld [vmem:[%s9640_s5 + $0x2f8] sm:$0xff]  }
 0x34c   : > { %v4408_v0 = vmax.f32 %v4376_v61, %v4378_v13  ;;  %v4382_v4 = vmax.f32 %v6444_v21, 0.0  ;;  %v4381_v26 = vmax.f32 %v6417_v40, 0.0  ;;  %6328 = vmatprep.subr.bf16.mxu0 %v7361_v45  ;;  %6346 = vmatprep.subr.bf16.mxu1 %v7362_v33  ;;  %v7388_v48 = vld [vmem:[%s9640_s5 + $0x300] sm:$0xff]   ;;  %v4434_v37 = vpack.c.bf16 %v9392_v63, %v9392_v63  ;;  %v7390_v54 = vld [vmem:[%s9640_s5 + $0x348] sm:$0xff]   ;;  %v7391_v24 = vld [vmem:[%s9640_s5 + $0x2b8] sm:$0xff]  }
 0x34d   : > { %v4409_v22 = vmax.f32 %v4377_v60, %v4379_v7  ;;  %v4383_v15 = vmax.f32 %v6445_v17, 0.0  ;;  %v7392_v63 = vld [vmem:[%s9640_s5 + $0x308] sm:$0xff]   ;;  %v7393_v8 = vld [vmem:[%s9640_s5 + $0x350] sm:$0xff]   ;;  %v4436_v36 = vpack.c.bf16 %v9428_v25, %v9428_v25  ;;  %v7395_v58 = vld [vmem:[%s9640_s5 + $0x358] sm:$0xff]  }
 0x34e   : > { %v4410_v11 = vmax.f32 %v4380_v51, %v4382_v4  ;;  %5496 = vmatmul.mubr.bf16.vlgmr.msra.gmra.mrb[88].mxu1 %v4432_v9  ;;  %v7394_v34 = vld [vmem:[%s9640_s5 + $0x310] sm:$0xff]   ;;  %v7396_v61 = vld [vmem:[%s9640_s5 + $0x318] sm:$0xff]   ;;  %v7397_v5 = vld [vmem:[%s9640_s5 + $0x360] sm:$0xff]  }
 0x34f   : > { %v4411_v23 = vmax.f32 %v4381_v26, %v4383_v15  ;;  %6329 = vmatpush3.bf16.msra.mxu0 %v7363_v10  ;;  %6347 = vmatpush3.bf16.msra.mxu1 %v7364_v46  ;;  %v7398_v25 = vld [vmem:[%s9640_s5 + $0x320] sm:$0xff]   ;;  %v7399_v53 = vld [vmem:[%s9640_s5 + $0x368] sm:$0xff]   ;;  %v7401_v62 = vld [vmem:[%s9640_s5 + $0x370] sm:$0xff]  }
 0x350   : > { %v9463_v27 = vmax.f32 %v4408_v0, %v4410_v11  ;;  %5575 = vmatprep.mubr.bf16.mxu1 %v4437_v14  ;;  %6330 = vmatprep.subr.bf16.mxu0 %v7365_v29  ;;  %v7400_v44 = vld [vmem:[%s9640_s5 + $0x328] sm:$0xff]   ;;  %v7402_v45 = vld [vmem:[%s9640_s5 + $0x330] sm:$0xff]   ;;  %v7403_v33 = vld [vmem:[%s9640_s5 + $0x378] sm:$0xff]  }
 0x351   : > { %v4425_v30 = vmax.f32 %v4409_v22, %v4411_v23  ;;  %6348 = vmatprep.subr.bf16.mxu1 %v7366_v49  ;;  %v7404_v31 = vld [vmem:[%s9640_s5 + $0x338] sm:$0xff]   ;;  %v6119_v40 = vld [vmem:[%s9641_s6] ss:$0 sm:$0xff] }
 0x352   : > { %v4438_v13 = vpack.c.bf16 %v9463_v27, %v9463_v27 }
 0x353   : > { %6331 = vmatpush3.bf16.msra.mxu0 %v7367_v56  ;;  %6349 = vmatpush3.bf16.msra.mxu1 %v7368_v50  ;;  %v4439_v32 = vpack.c.bf16 %v4425_v30, %v4425_v30 }
 0x354   : > { %6332 = vmatprep.subr.bf16.mxu0 %v7369_v41  ;;  %6350 = vmatprep.subr.bf16.mxu1 %v7370_v43 }
 0x357   : > { %6333 = vmatpush3.bf16.msra.mxu0 %v7371_v28  ;;  %6351 = vmatpush3.bf16.msra.mxu1 %v7372_v35 }
 0x358   : > { %6334 = vmatprep.subr.bf16.mxu0 %v7373_v2  ;;  %6352 = vmatprep.subr.bf16.mxu1 %v7374_v16 }
 0x35b   : > { %6335 = vmatpush3.bf16.msra.mxu0 %v7375_v38  ;;  %6353 = vmatpush3.bf16.msra.mxu1 %v7376_v52 }
 0x35c   : > { %6336 = vmatprep.subr.bf16.mxu0 %v7377_v3  ;;  %6354 = vmatprep.subr.bf16.mxu1 %v7378_v6 }
 0x35f   : > { %6337 = vmatpush3.bf16.msra.mxu0 %v7379_v57  ;;  %6355 = vmatpush3.bf16.msra.mxu1 %v7380_v19 }
 0x360   : > { %6338 = vmatprep.subr.bf16.mxu0 %v7381_v42  ;;  %6356 = vmatprep.subr.bf16.mxu1 %v7382_v47 }
 0x363   : > { %6339 = vmatpush3.bf16.msra.mxu0 %v7383_v20  ;;  %6357 = vmatpush3.bf16.msra.mxu1 %v7384_v12 }
 0x364   : > { %6358 = vmatprep.subr.bf16.mxu1 %v7385_v1  ;;  %6368 = vmatprep.subr.bf16.mxu0 %v7386_v18 }
 0x366   : > { %5536 = vmatmul.mubr.bf16.vlgmr.msra.gmra.mrb[92].mxu0 %v4434_v37 }
 0x367   : > { %6359 = vmatpush3.bf16.msra.mxu1 %v7387_v39  ;;  %6369 = vmatpush3.bf16.msra.mxu0 %v7388_v48 }
 0x368   : > { %5615 = vmatprep.mubr.bf16.mxu0 %v4439_v32  ;;  %6360 = vmatprep.subr.bf16.mxu1 %v7389_v55 }
 0x369   : > { %6370 = vmatprep.subr.bf16.mxu0 %v7390_v54 }
 0x36b   : > { %6361 = vmatpush3.bf16.msra.mxu1 %v7391_v24  ;;  %6371 = vmatpush3.bf16.msra.mxu0 %v7392_v63 }
 0x36c   : > { %6372 = vmatprep.subr.bf16.mxu0 %v7393_v8 }
 0x36e   : > { %5576 = vmatmul.mubr.bf16.vlgmr.msra.gmra.mrb[92].mxu1 %v4436_v36 }
 0x36f   : > { %6373 = vmatpush3.bf16.msra.mxu0 %v7394_v34 }
 0x370   : > { %6374 = vmatprep.subr.bf16.mxu0 %v7395_v58 }
 0x373   : > { %6375 = vmatpush3.bf16.msra.mxu0 %v7396_v61 }
 0x374   : > { %6376 = vmatprep.subr.bf16.mxu0 %v7397_v5 }
 0x377   : > { %6377 = vmatpush3.bf16.msra.mxu0 %v7398_v25 }
 0x378   : > { %6378 = vmatprep.subr.bf16.mxu0 %v7399_v53 }
 0x37b   : > { %6379 = vmatpush3.bf16.msra.mxu0 %v7400_v44 }
 0x37c   : > { %6380 = vmatprep.subr.bf16.mxu0 %v7401_v62 }
 0x37f   : > { %6381 = vmatpush3.bf16.msra.mxu0 %v7402_v45 }
 0x380   : > { %6382 = vmatprep.subr.bf16.mxu0 %v7403_v33 }
 0x383   : > { %6383 = vmatpush3.bf16.msra.mxu0 %v7404_v31 }
 0x386   : > { %5616 = vmatmul.mubr.bf16.vlgmr.msra.gmra.mrb[96].mxu0 %v4438_v13 }
 0x3f9   : > { %v6252_v60 = vpop.f32.mrb[84].mxu0 }
 0x3fa   : > { %v6253_v21 = vpop.f32.mrb[85].mxu0 }
 0x3fb   : > { %v6254_v59 = vadd.f32 %v6253_v21, %v6252_v60  ;;  %v6255_v7 = vpop.f32.mrb[86].mxu0 }
 0x3fc   : > { %v6256_v51 = vpop.f32.mrb[87].mxu0 }
 0x3fd   : > { %v5378_v0 = vadd.f32 %v6254_v59, %v6119_v40 }
 0x401   : > { %v6274_v17 = vpop.f32.mrb[84].mxu1 }
 0x402   : > { %v6275_v9 = vpop.f32.mrb[85].mxu1 }
 0x403   : > { %v6276_v4 = vadd.f32 %v6275_v9, %v6274_v17  ;;  %v6277_v10 = vpop.f32.mrb[86].mxu1 }
 0x404   : > { %v6278_v46 = vpop.f32.mrb[87].mxu1 }
 0x405   : > { %v5418_v22 = vadd.f32 %v6276_v4, %v5378_v0 }
 0x419   : > { %v6296_v26 = vpop.f32.mrb[88].mxu0 }
 0x41a   : > { %v6297_v15 = vpop.f32.mrb[89].mxu0 }
 0x41b   : > { %v6298_v14 = vadd.f32 %v6297_v15, %v6296_v26  ;;  %v6299_v29 = vpop.f32.mrb[90].mxu0 }
 0x41c   : > { %v6300_v11 = vpop.f32.mrb[91].mxu0 }
 0x41d   : > { %v5458_v49 = vadd.f32 %v6298_v14, %v5418_v22 }
 0x421   : > { %v6318_v23 = vpop.f32.mrb[88].mxu1 }
 0x422   : > { %v6319_v27 = vpop.f32.mrb[89].mxu1 }
 0x423   : > { %v6320_v56 = vadd.f32 %v6319_v27, %v6318_v23  ;;  %v6321_v50 = vpop.f32.mrb[90].mxu1 }
 0x424   : > { %v6322_v41 = vpop.f32.mrb[91].mxu1 }
 0x425   : > { %v5498_v43 = vadd.f32 %v6320_v56, %v5458_v49 }
 0x439   : > { %v6340_v30 = vpop.f32.mrb[92].mxu0 }
 0x43a   : > { %v6341_v28 = vpop.f32.mrb[93].mxu0 }
 0x43b   : > { %v6342_v35 = vadd.f32 %v6341_v28, %v6340_v30  ;;  %v6343_v2 = vpop.f32.mrb[94].mxu0 }
 0x43c   : > { %v6344_v16 = vpop.f32.mrb[95].mxu0 }
 0x43d   : > { %v5538_v38 = vadd.f32 %v6342_v35, %v5498_v43 }
 0x441   : > { %v6362_v52 = vpop.f32.mrb[92].mxu1 }
 0x442   : > { %v6363_v3 = vpop.f32.mrb[93].mxu1 }
 0x443   : > { %v6364_v6 = vadd.f32 %v6363_v3, %v6362_v52  ;;  %v6365_v57 = vpop.f32.mrb[94].mxu1 }
 0x444   : > { %v6366_v19 = vpop.f32.mrb[95].mxu1 }
 0x445   : > { %v5578_v42 = vadd.f32 %v6364_v6, %v5538_v38 }
 0x459   : > { %v6384_v47 = vpop.f32.mrb[96].mxu0 }
 0x45a   : > { %v6385_v20 = vpop.f32.mrb[97].mxu0 }
 0x45b   : > { %v6386_v12 = vadd.f32 %v6385_v20, %v6384_v47  ;;  %v6387_v1 = vpop.f32.mrb[98].mxu0 }
 0x45c   : > { %v6388_v18 = vpop.f32.mrb[99].mxu0 }
 0x45d   : > { %v5618_v39 = vadd.f32 %v6386_v12, %v5578_v42 }
 0x45f   : > { %5623 = vst [vmem:[%s271_s22] sm:$0xff] %v5618_v39 }
 0x460   : > { %7418 = shalt.err (!%p7415_p3)
}
 0x461   : > { %s7419_s23 = scalar_lea.hbm %s9593_s17, 128  ;;  %s7423_s9 = scalar_lea.hbm %s9642_s7, 256 }
 0x462   : > { %p7420_p4 = scmp.ne.s32.totalorder %s9593_s17, %s7419_s23  ;;  %p7424_p9 = scmp.lt.u32.totalorder %s9593_s17, %s9642_s7 }
 0x463   : > { %p7425_p10 = scmp.lt.u32.totalorder %s7423_s9, %s7419_s23  ;;  %p7427_p12 = scmp.lt.u32.totalorder %s7419_s23, %s9593_s17 }
 0x464   : > { %p7421_p7 = pnand %p7420_p4, %p7549_p5 }
 0x465   : > { %p7426_p11 = por %p7425_p10, %p7424_p9 }
 0x466   : > { %p7422_p8 = pneg %p7421_p7 }
 0x467   : > { %p7428_p13 = por %p7427_p12, %p7426_p11 }
 0x469   : > { %p7429_p0 = pnand %p7428_p13, %p7422_p8 }
 0x46b   : > { %7432 = shalt.err (!%p7429_p0)
}
 0x46c   : > { %6671 = dma.vmem_to_hbm [thread:$0]  (%p7549_p5), %s9595_s14, 128, %s9593_s17, %s5625_s13  }
 0x46d PF: > { %p6677_p1 = scmp.ge.s32.totalorder %s7467_s27, 2  ;;  %s5650_s15 = sand.u32 1, %s7455_s24  }
 0x46e   : > { %s5651_s16 = scalar_lea.sflag [#allocation3], %s5650_s15 }
 0x46f   : > { %p6674_p2 = pnand %p6677_p1, %p7553_p6 }
 0x471   : > { %7450 = dma.done.wait (!%p6674_p2), %s5651_s16, 128  }
 0x472   : > { %7452 = vsyncadd (!%p6674_p2), %s5651_s16, 4294967168  ;;  %p17_p3 = scmp.ge.s32.totalorder %s7536_s30, 4   ;;  %s9645_s24 = smov %s7459_s25 }
 0x473   : > { %s9646_s25 = smov %s7463_s26  ;;  %s9647_s26 = smov %s7547_s10 }
 0x474   : > { %s9648_s27 = smov %s7536_s30  ;;  %19 = sbr.rel (!%p17_p3) target bundleno = 3 (0x3), region = 83 }
 0x47b   :  { %5656 = vsyncpa [#allocation3], 1 }
 0x47c   :  { %5658 = vsyncpa [#allocation3 + $0x1], 1 }

</bundles_post_ra>
